<compile_context>
chip_gen: v7x
topology: tpu7x:2x2x1
jax: 0.10.0
libtpu: 0.0.40
codegen_flags: <defaults>
</compile_context>

<pallas_src>
import functools
import math

import jax
import jax.numpy as jnp
from jax.experimental import pallas as pl
from jax.experimental.pallas import tpu as pltpu
from jax.scipy.special import erf as _erf_ref   # only used by the pure-JAX reference

_LN_EPS = 1e-5  # torch.nn.LayerNorm default


# ----------------------------- in-kernel math ------------------------------ #

def _erf(x):
    # erf from primitives guaranteed to lower in Mosaic (exp/select/mul/add):
    # Abramowitz & Stegun 7.1.26, |abs err| < 1.5e-7 (f32 precision), matching
    # PyTorch's exact (erf-based) nn.GELU() at f32 accuracy.
    a1, a2, a3, a4, a5 = (0.254829592, -0.284496736, 1.421413741,
                          -1.453152027, 1.061405429)
    p = 0.3275911
    sign = jnp.where(x >= 0.0, 1.0, -1.0)
    z = jnp.abs(x)
    # exact divide kept on purpose: approx reciprocal (~2^-12) would eat most
    # of the 1e-4 accuracy budget; this is 4 tiny divides per kernel call.
    t = 1.0 / (1.0 + p * z)
    poly = ((((a5 * t + a4) * t + a3) * t + a2) * t + a1) * t
    return sign * (1.0 - poly * jnp.exp(-z * z))


def _gelu_exact(x):
    # torch.nn.GELU() default (approximate='none'): 0.5 * x * (1 + erf(x/sqrt(2)))
    return 0.5 * x * (1.0 + _erf(x * (1.0 / math.sqrt(2.0))))


# --------------------------------- kernel ---------------------------------- #

def _residual_cnn_kernel(x_ref,                              # (T, L) f32
                         wv1_ref, bv1_ref, g1_ref, be1_ref,  # conv1/LN1 per-lane params
                         wv2_ref, bv2_ref, g2_ref, be2_ref,  # conv2/LN2 per-lane params
                         o_ref,                              # (T, L)
                         *, b, c, t, f, k):
    L = b * c * f
    pad = k // 2

    x = x_ref[...].astype(jnp.float32)                       # (T, L)

    # Hoisted constants: lane iota + butterfly masks for the segmented-F
    # reduction, and per-kh row-validity masks for the T halo.
    lane = jax.lax.broadcasted_iota(jnp.int32, (t, L), 1)
    bfly_masks = []
    step = 1
    while step < f:
        bfly_masks.append(jnp.bitwise_and(lane, step) == 0)
        step *= 2
    row = jax.lax.broadcasted_iota(jnp.int32, (t, 1), 0)
    row_masks = [((row + (kh - pad)) >= 0) & ((row + (kh - pad)) < t)
                 for kh in range(k)]

    def seg_mean_over_f(v):
        # Mean over each contiguous group of `f` lanes (one (b,c) plane's F
        # axis), broadcast back to every lane of that group.  Hypercube
        # butterfly: partner = lane XOR step; never selects a wrapped value.
        acc = v
        s = 1
        for m in bfly_masks:
            up = pltpu.roll(acc, (L - s) % L, axis=1)   # acc[l + s]
            dn = pltpu.roll(acc, s, axis=1)             # acc[l - s]
            acc = acc + jnp.where(m, up, dn)
            s *= 2
        return acc * (1.0 / f)

    def layer_norm(v, g_ref_, be_ref_):
        mean = seg_mean_over_f(v)
        cen = v - mean
        var = seg_mean_over_f(cen * cen)               # biased var, like torch
        return cen * jax.lax.rsqrt(var + _LN_EPS) * g_ref_[...] + be_ref_[...]

    def conv(v, wv_ref, bv_ref):
        # 'same' KxK conv with channel mixing as lane rolls: lane l encodes
        # (b, ci, fi), so (ci -> ci+d, fi -> fi+dw) is a lane shift of d*F+dw.
        # All border / channel-range masking is folded into the per-lane tap
        # weight planes (zeros where invalid), so each tap = roll + FMA.
        acc = jnp.zeros((t, L), jnp.float32) + bv_ref[...]
        tap = 0
        for kh in range(k):
            dt_ = kh - pad
            if dt_ == 0:
                v_kh = v
            else:
                v_kh = jnp.where(row_masks[kh],
                                 pltpu.roll(v, (-dt_) % t, axis=0), 0.0)
            for d in range(-(c - 1), c):
                for kw in range(k):
                    sft = (-(d * f + (kw - pad))) % L
                    shifted = v_kh if sft == 0 else pltpu.roll(v_kh, sft, axis=1)
                    w_row = wv_ref[pl.ds(tap, 1), :]          # (1, L)
                    acc = acc + w_row * shifted
                    tap += 1
        return acc

    # LayerNorm -> GELU -> Dropout(identity in eval) -> Conv2d
    y = layer_norm(x, g1_ref, be1_ref)
    y = _gelu_exact(y)
    # TODO(synk): training-mode Dropout RNG is not modeled (eval-mode identity).
    y = conv(y, wv1_ref, bv1_ref)

    # LayerNorm -> GELU -> Dropout(identity) -> Conv2d
    y = layer_norm(y, g2_ref, be2_ref)
    y = _gelu_exact(y)
    y = conv(y, wv2_ref, bv2_ref)

    # residual add; (T, L) store is fully lane-dense (unmasked vst + dense DMA)
    o_ref[...] = (x + y).astype(o_ref.dtype)


# ------------------------------ host helpers -------------------------------- #

def _build_tap_planes(w, b_sz, c, f, k):
    """Per-tap per-lane weight planes, shape (K*(2C-1)*K, B*C*F).

    Row order matches the kernel loops (kh outer, d=ci-co middle, kw inner).
    Entry [tap, l] = w[co(l), co(l)+d, kh, kw], zeroed where the tap is invalid
    (channel offset or F border out of range), so the kernel needs no masking
    beyond the T halo.
    """
    pad = k // 2
    L = b_sz * c * f
    lane = jnp.arange(L)
    co = (lane // f) % c
    fi = lane % f
    rows = []
    for kh in range(k):
        for d in range(-(c - 1), c):
            ci = co + d
            ci_ok = (ci >= 0) & (ci < c)
            ci_cl = jnp.clip(ci, 0, c - 1)
            for kw in range(k):
                fo = fi + (kw - pad)
                valid = ci_ok & (fo >= 0) & (fo < f)
                rows.append(jnp.where(valid, w[co, ci_cl, kh, kw], 0.0))
    return jnp.stack(rows).astype(jnp.float32)


def residual_cnn_forward(x, params, *, kernel_size):
    """x: (B, C, T, F) float32;  params = (w1, b1, w2, b2, g1, be1, g2, be2)."""
    w1, b1, w2, b2, g1, be1, g2, be2 = params
    B, C, T, F = x.shape
    K = kernel_size
    assert K % 2 == 1, "'same' residual conv requires odd kernel size"
    assert (F & (F - 1)) == 0, "segmented lane reduction assumes power-of-2 n_feats"
    assert w1.shape == (C, C, K, K) and w2.shape == (C, C, K, K)

    L = B * C * F
    n_taps = K * (2 * C - 1) * K

    # Lane-dense layout: lanes = (b, c, f) flattened (= 128 for the toy config),
    # sublanes = t.  Wrapper transpose/reshape is layout plumbing only.
    x_l = jnp.transpose(x, (2, 0, 1, 3)).reshape(T, L)

    wv1 = _build_tap_planes(w1, B, C, F, K)
    wv2 = _build_tap_planes(w2, B, C, F, K)
    bv1 = jnp.tile(jnp.repeat(b1, F), B).reshape(1, L)     # bias[c(l)]
    bv2 = jnp.tile(jnp.repeat(b2, F), B).reshape(1, L)
    g1v = jnp.tile(g1, B * C).reshape(1, L)                # gamma[f(l)]
    be1v = jnp.tile(be1, B * C).reshape(1, L)
    g2v = jnp.tile(g2, B * C).reshape(1, L)
    be2v = jnp.tile(be2, B * C).reshape(1, L)

    def full(shape):
        return pl.BlockSpec(shape, lambda i: (0,) * len(shape))

    kernel = functools.partial(_residual_cnn_kernel, b=B, c=C, t=T, f=F, k=K)

    # Single grid step: whole 8 KiB working set in one invocation (no per-step
    # overhead).  For production shapes, tile T with a K//2 halo and keep a
    # "parallel" B/T axis for multi-TensorCore chips (v7x).
    out_l = pl.pallas_call(
        kernel,
        out_shape=jax.ShapeDtypeStruct((T, L), x.dtype),
        grid_spec=pltpu.PrefetchScalarGridSpec(
            num_scalar_prefetch=0,
            grid=(1,),
            in_specs=[full((T, L)),
                      full((n_taps, L)), full((1, L)), full((1, L)), full((1, L)),
                      full((n_taps, L)), full((1, L)), full((1, L)), full((1, L))],
            out_specs=full((T, L)),
        ),
        compiler_params=pltpu.CompilerParams(
            dimension_semantics=("arbitrary",)),
    )(x_l, wv1, bv1, g1v, be1v, wv2, bv2, g2v, be2v)

    return out_l.reshape(T, B, C, F).transpose(1, 2, 0, 3)


# --------------------------- pure-JAX reference ----------------------------- #

def _reference(x, params, *, kernel_size):
    w1, b1, w2, b2, g1, be1, g2, be2 = params
    k = kernel_size

    def ln(v, g, b):
        m = jnp.mean(v, axis=-1, keepdims=True)
        var = jnp.mean((v - m) ** 2, axis=-1, keepdims=True)
        return (v - m) * jax.lax.rsqrt(var + _LN_EPS) * g + b

    def gelu(v):
        return 0.5 * v * (1.0 + _erf_ref(v / jnp.sqrt(2.0)))

    def conv(v, w, b):
        out = jax.lax.conv_general_dilated(
            v, w, window_strides=(1, 1),
            padding=[(k // 2, k // 2), (k // 2, k // 2)],
            dimension_numbers=("NCHW", "OIHW", "NCHW"),
            precision=jax.lax.Precision.HIGHEST)
        return out + b[None, :, None, None]

    y = conv(gelu(ln(x, g1, be1)), w1, b1)
    y = conv(gelu(ln(y, g2, be2)), w2, b2)
    return x + y


# ----------------------------------- main ----------------------------------- #

if __name__ == "__main__":
    # ResidualCNN(in_channels=4, out_channels=4, kernel=3, stride=1,
    #             dropout=0.1, n_feats=16); input (B, C, T, F) = (2, 4, 16, 16).
    B, C, T, F = 2, 4, 16, 16
    K = 3

    key = jax.random.PRNGKey(0)
    kx, kw1, kb1, kw2, kb2, kg1, kbe1, kg2, kbe2 = jax.random.split(key, 9)

    x = jax.random.normal(kx, (B, C, T, F), jnp.float32)

    fan_in = C * K * K
    bound = 1.0 / math.sqrt(fan_in)          # PyTorch Conv2d default init bound
    w1 = jax.random.uniform(kw1, (C, C, K, K), jnp.float32, -bound, bound)
    b1 = jax.random.uniform(kb1, (C,), jnp.float32, -bound, bound)
    w2 = jax.random.uniform(kw2, (C, C, K, K), jnp.float32, -bound, bound)
    b2 = jax.random.uniform(kb2, (C,), jnp.float32, -bound, bound)
    # LayerNorm affine (PyTorch inits ones/zeros; perturb to exercise the path)
    g1 = 1.0 + 0.1 * jax.random.normal(kg1, (F,), jnp.float32)
    be1 = 0.1 * jax.random.normal(kbe1, (F,), jnp.float32)
    g2 = 1.0 + 0.1 * jax.random.normal(kg2, (F,), jnp.float32)
    be2 = 0.1 * jax.random.normal(kbe2, (F,), jnp.float32)

    params = (w1, b1, w2, b2, g1, be1, g2, be2)

    out = jax.block_until_ready(residual_cnn_forward(x, params, kernel_size=K))
    ref = jax.block_until_ready(_reference(x, params, kernel_size=K))

    assert out.shape == x.shape and out.dtype == x.dtype
    assert jnp.allclose(out, ref, atol=1e-4, rtol=1e-4), "mismatch vs reference"

    print("KERNEL_OK")
</pallas_src>

<mosaic_0001>
module attributes {stable_mosaic.version = 11 : i64} {
  func.func @_residual_cnn_kernel(%arg0: i32, %arg1: memref<16x128xf32, #tpu.memory_space<vmem>>, %arg2: memref<63x128xf32, #tpu.memory_space<vmem>>, %arg3: memref<1x128xf32, #tpu.memory_space<vmem>>, %arg4: memref<1x128xf32, #tpu.memory_space<vmem>>, %arg5: memref<1x128xf32, #tpu.memory_space<vmem>>, %arg6: memref<63x128xf32, #tpu.memory_space<vmem>>, %arg7: memref<1x128xf32, #tpu.memory_space<vmem>>, %arg8: memref<1x128xf32, #tpu.memory_space<vmem>>, %arg9: memref<1x128xf32, #tpu.memory_space<vmem>>, %arg10: memref<16x128xf32, #tpu.memory_space<vmem>>) attributes {dimension_semantics = [#tpu.dimension_semantics<arbitrary>], iteration_bounds = array<i64: 1>, scalar_prefetch = 0 : i64, scratch_operands = 0 : i64, tpu.core_type = #tpu.core_type<tc>, window_params = [{pipeline_mode = #tpu.pipeline_mode<synchronous>, transform_indices = @transform_0, window_bounds = array<i64: 16, 128>}, {pipeline_mode = #tpu.pipeline_mode<synchronous>, transform_indices = @transform_1, window_bounds = array<i64: 63, 128>}, {pipeline_mode = #tpu.pipeline_mode<synchronous>, transform_indices = @transform_2, window_bounds = array<i64: 1, 128>}, {pipeline_mode = #tpu.pipeline_mode<synchronous>, transform_indices = @transform_3, window_bounds = array<i64: 1, 128>}, {pipeline_mode = #tpu.pipeline_mode<synchronous>, transform_indices = @transform_4, window_bounds = array<i64: 1, 128>}, {pipeline_mode = #tpu.pipeline_mode<synchronous>, transform_indices = @transform_5, window_bounds = array<i64: 63, 128>}, {pipeline_mode = #tpu.pipeline_mode<synchronous>, transform_indices = @transform_6, window_bounds = array<i64: 1, 128>}, {pipeline_mode = #tpu.pipeline_mode<synchronous>, transform_indices = @transform_7, window_bounds = array<i64: 1, 128>}, {pipeline_mode = #tpu.pipeline_mode<synchronous>, transform_indices = @transform_8, window_bounds = array<i64: 1, 128>}, {pipeline_mode = #tpu.pipeline_mode<synchronous>, transform_indices = @transform_9, window_bounds = array<i64: 16, 128>}]} {
    %c0 = arith.constant 0 : index
    %c0_0 = arith.constant 0 : index
    %0 = vector.load %arg1[%c0, %c0_0] : memref<16x128xf32, #tpu.memory_space<vmem>>, vector<16x128xf32>
    %1 = tpu.iota {dimensions = array<i32: 1>} : vector<16x128xi32>
    %c1_i32 = arith.constant 1 : i32
    %2 = vector.broadcast %c1_i32 : i32 to vector<16x128xi32>
    %3 = arith.andi %1, %2 : vector<16x128xi32>
    %c0_i32 = arith.constant 0 : i32
    %4 = vector.broadcast %c0_i32 : i32 to vector<16x128xi32>
    %5 = arith.cmpi eq, %3, %4 : vector<16x128xi32>
    %c2_i32 = arith.constant 2 : i32
    %6 = vector.broadcast %c2_i32 : i32 to vector<16x128xi32>
    %7 = arith.andi %1, %6 : vector<16x128xi32>
    %c0_i32_1 = arith.constant 0 : i32
    %8 = vector.broadcast %c0_i32_1 : i32 to vector<16x128xi32>
    %9 = arith.cmpi eq, %7, %8 : vector<16x128xi32>
    %c4_i32 = arith.constant 4 : i32
    %10 = vector.broadcast %c4_i32 : i32 to vector<16x128xi32>
    %11 = arith.andi %1, %10 : vector<16x128xi32>
    %c0_i32_2 = arith.constant 0 : i32
    %12 = vector.broadcast %c0_i32_2 : i32 to vector<16x128xi32>
    %13 = arith.cmpi eq, %11, %12 : vector<16x128xi32>
    %c8_i32 = arith.constant 8 : i32
    %14 = vector.broadcast %c8_i32 : i32 to vector<16x128xi32>
    %15 = arith.andi %1, %14 : vector<16x128xi32>
    %c0_i32_3 = arith.constant 0 : i32
    %16 = vector.broadcast %c0_i32_3 : i32 to vector<16x128xi32>
    %17 = arith.cmpi eq, %15, %16 : vector<16x128xi32>
    %18 = tpu.iota {dimensions = array<i32: 0>} : vector<16x1xi32>
    %c-1_i32 = arith.constant -1 : i32
    %19 = vector.broadcast %c-1_i32 : i32 to vector<16x1xi32>
    %20 = arith.addi %18, %19 : vector<16x1xi32>
    %c0_i32_4 = arith.constant 0 : i32
    %21 = vector.broadcast %c0_i32_4 : i32 to vector<16x1xi32>
    %22 = arith.cmpi sge, %20, %21 : vector<16x1xi32>
    %c-1_i32_5 = arith.constant -1 : i32
    %23 = vector.broadcast %c-1_i32_5 : i32 to vector<16x1xi32>
    %24 = arith.addi %18, %23 : vector<16x1xi32>
    %c16_i32 = arith.constant 16 : i32
    %25 = vector.broadcast %c16_i32 : i32 to vector<16x1xi32>
    %26 = arith.cmpi slt, %24, %25 : vector<16x1xi32>
    %27 = arith.andi %22, %26 : vector<16x1xi1>
    %c1_i32_6 = arith.constant 1 : i32
    %28 = vector.broadcast %c1_i32_6 : i32 to vector<16x1xi32>
    %29 = arith.addi %18, %28 : vector<16x1xi32>
    %c0_i32_7 = arith.constant 0 : i32
    %30 = vector.broadcast %c0_i32_7 : i32 to vector<16x1xi32>
    %31 = arith.cmpi sge, %29, %30 : vector<16x1xi32>
    %c1_i32_8 = arith.constant 1 : i32
    %32 = vector.broadcast %c1_i32_8 : i32 to vector<16x1xi32>
    %33 = arith.addi %18, %32 : vector<16x1xi32>
    %c16_i32_9 = arith.constant 16 : i32
    %34 = vector.broadcast %c16_i32_9 : i32 to vector<16x1xi32>
    %35 = arith.cmpi slt, %33, %34 : vector<16x1xi32>
    %36 = arith.andi %31, %35 : vector<16x1xi1>
    %c127_i32 = arith.constant 127 : i32
    %37 = tpu.dynamic_rotate %0 by %c127_i32 dim 1 : vector<16x128xf32>, i32 -> vector<16x128xf32>
    %c1_i32_10 = arith.constant 1 : i32
    %38 = tpu.dynamic_rotate %0 by %c1_i32_10 dim 1 : vector<16x128xf32>, i32 -> vector<16x128xf32>
    %39 = arith.select %5, %37, %38 : vector<16x128xi1>, vector<16x128xf32>
    %40 = arith.addf %0, %39 : vector<16x128xf32>
    %c126_i32 = arith.constant 126 : i32
    %41 = tpu.dynamic_rotate %40 by %c126_i32 dim 1 : vector<16x128xf32>, i32 -> vector<16x128xf32>
    %c2_i32_11 = arith.constant 2 : i32
    %42 = tpu.dynamic_rotate %40 by %c2_i32_11 dim 1 : vector<16x128xf32>, i32 -> vector<16x128xf32>
    %43 = arith.select %9, %41, %42 : vector<16x128xi1>, vector<16x128xf32>
    %44 = arith.addf %40, %43 : vector<16x128xf32>
    %c124_i32 = arith.constant 124 : i32
    %45 = tpu.dynamic_rotate %44 by %c124_i32 dim 1 : vector<16x128xf32>, i32 -> vector<16x128xf32>
    %c4_i32_12 = arith.constant 4 : i32
    %46 = tpu.dynamic_rotate %44 by %c4_i32_12 dim 1 : vector<16x128xf32>, i32 -> vector<16x128xf32>
    %47 = arith.select %13, %45, %46 : vector<16x128xi1>, vector<16x128xf32>
    %48 = arith.addf %44, %47 : vector<16x128xf32>
    %c120_i32 = arith.constant 120 : i32
    %49 = tpu.dynamic_rotate %48 by %c120_i32 dim 1 : vector<16x128xf32>, i32 -> vector<16x128xf32>
    %c8_i32_13 = arith.constant 8 : i32
    %50 = tpu.dynamic_rotate %48 by %c8_i32_13 dim 1 : vector<16x128xf32>, i32 -> vector<16x128xf32>
    %51 = arith.select %17, %49, %50 : vector<16x128xi1>, vector<16x128xf32>
    %52 = arith.addf %48, %51 : vector<16x128xf32>
    %cst = arith.constant 6.250000e-02 : f32
    %53 = vector.broadcast %cst : f32 to vector<16x128xf32>
    %54 = arith.mulf %52, %53 : vector<16x128xf32>
    %55 = arith.subf %0, %54 : vector<16x128xf32>
    %56 = arith.mulf %55, %55 : vector<16x128xf32>
    %c127_i32_14 = arith.constant 127 : i32
    %57 = tpu.dynamic_rotate %56 by %c127_i32_14 dim 1 : vector<16x128xf32>, i32 -> vector<16x128xf32>
    %c1_i32_15 = arith.constant 1 : i32
    %58 = tpu.dynamic_rotate %56 by %c1_i32_15 dim 1 : vector<16x128xf32>, i32 -> vector<16x128xf32>
    %59 = arith.select %5, %57, %58 : vector<16x128xi1>, vector<16x128xf32>
    %60 = arith.addf %56, %59 : vector<16x128xf32>
    %c126_i32_16 = arith.constant 126 : i32
    %61 = tpu.dynamic_rotate %60 by %c126_i32_16 dim 1 : vector<16x128xf32>, i32 -> vector<16x128xf32>
    %c2_i32_17 = arith.constant 2 : i32
    %62 = tpu.dynamic_rotate %60 by %c2_i32_17 dim 1 : vector<16x128xf32>, i32 -> vector<16x128xf32>
    %63 = arith.select %9, %61, %62 : vector<16x128xi1>, vector<16x128xf32>
    %64 = arith.addf %60, %63 : vector<16x128xf32>
    %c124_i32_18 = arith.constant 124 : i32
    %65 = tpu.dynamic_rotate %64 by %c124_i32_18 dim 1 : vector<16x128xf32>, i32 -> vector<16x128xf32>
    %c4_i32_19 = arith.constant 4 : i32
    %66 = tpu.dynamic_rotate %64 by %c4_i32_19 dim 1 : vector<16x128xf32>, i32 -> vector<16x128xf32>
    %67 = arith.select %13, %65, %66 : vector<16x128xi1>, vector<16x128xf32>
    %68 = arith.addf %64, %67 : vector<16x128xf32>
    %c120_i32_20 = arith.constant 120 : i32
    %69 = tpu.dynamic_rotate %68 by %c120_i32_20 dim 1 : vector<16x128xf32>, i32 -> vector<16x128xf32>
    %c8_i32_21 = arith.constant 8 : i32
    %70 = tpu.dynamic_rotate %68 by %c8_i32_21 dim 1 : vector<16x128xf32>, i32 -> vector<16x128xf32>
    %71 = arith.select %17, %69, %70 : vector<16x128xi1>, vector<16x128xf32>
    %72 = arith.addf %68, %71 : vector<16x128xf32>
    %cst_22 = arith.constant 6.250000e-02 : f32
    %73 = vector.broadcast %cst_22 : f32 to vector<16x128xf32>
    %74 = arith.mulf %72, %73 : vector<16x128xf32>
    %cst_23 = arith.constant 9.99999974E-6 : f32
    %75 = vector.broadcast %cst_23 : f32 to vector<16x128xf32>
    %76 = arith.addf %74, %75 : vector<16x128xf32>
    %77 = math.rsqrt %76 : vector<16x128xf32>
    %78 = arith.mulf %55, %77 : vector<16x128xf32>
    %c0_24 = arith.constant 0 : index
    %c0_25 = arith.constant 0 : index
    %79 = vector.load %arg4[%c0_24, %c0_25] : memref<1x128xf32, #tpu.memory_space<vmem>>, vector<1x128xf32>
    %80 = vector.broadcast %79 : vector<1x128xf32> to vector<16x128xf32>
    %81 = arith.mulf %78, %80 : vector<16x128xf32>
    %c0_26 = arith.constant 0 : index
    %c0_27 = arith.constant 0 : index
    %82 = vector.load %arg5[%c0_26, %c0_27] : memref<1x128xf32, #tpu.memory_space<vmem>>, vector<1x128xf32>
    %83 = vector.broadcast %82 : vector<1x128xf32> to vector<16x128xf32>
    %84 = arith.addf %81, %83 : vector<16x128xf32>
    %cst_28 = arith.constant 5.000000e-01 : f32
    %85 = vector.broadcast %cst_28 : f32 to vector<16x128xf32>
    %86 = arith.mulf %85, %84 : vector<16x128xf32>
    %cst_29 = arith.constant 0.707106769 : f32
    %87 = vector.broadcast %cst_29 : f32 to vector<16x128xf32>
    %88 = arith.mulf %84, %87 : vector<16x128xf32>
    %cst_30 = arith.constant 0.000000e+00 : f32
    %89 = vector.broadcast %cst_30 : f32 to vector<16x128xf32>
    %90 = arith.cmpf oge, %88, %89 : vector<16x128xf32>
    %cst_31 = arith.constant 1.000000e+00 : f32
    %cst_32 = arith.constant -1.000000e+00 : f32
    %91 = vector.broadcast %cst_31 : f32 to vector<16x128xf32>
    %92 = vector.broadcast %cst_32 : f32 to vector<16x128xf32>
    %93 = arith.select %90, %91, %92 : vector<16x128xi1>, vector<16x128xf32>
    %94 = math.absf %88 : vector<16x128xf32>
    %cst_33 = arith.constant 0.327591091 : f32
    %95 = vector.broadcast %cst_33 : f32 to vector<16x128xf32>
    %96 = arith.mulf %95, %94 : vector<16x128xf32>
    %cst_34 = arith.constant 1.000000e+00 : f32
    %97 = vector.broadcast %cst_34 : f32 to vector<16x128xf32>
    %98 = arith.addf %97, %96 : vector<16x128xf32>
    %cst_35 = arith.constant 1.000000e+00 : f32
    %99 = vector.broadcast %cst_35 : f32 to vector<16x128xf32>
    %100 = arith.divf %99, %98 : vector<16x128xf32>
    %cst_36 = arith.constant 1.06140542 : f32
    %101 = vector.broadcast %cst_36 : f32 to vector<16x128xf32>
    %102 = arith.mulf %101, %100 : vector<16x128xf32>
    %cst_37 = arith.constant -1.45315206 : f32
    %103 = vector.broadcast %cst_37 : f32 to vector<16x128xf32>
    %104 = arith.addf %102, %103 : vector<16x128xf32>
    %105 = arith.mulf %104, %100 : vector<16x128xf32>
    %cst_38 = arith.constant 1.42141378 : f32
    %106 = vector.broadcast %cst_38 : f32 to vector<16x128xf32>
    %107 = arith.addf %105, %106 : vector<16x128xf32>
    %108 = arith.mulf %107, %100 : vector<16x128xf32>
    %cst_39 = arith.constant -0.284496725 : f32
    %109 = vector.broadcast %cst_39 : f32 to vector<16x128xf32>
    %110 = arith.addf %108, %109 : vector<16x128xf32>
    %111 = arith.mulf %110, %100 : vector<16x128xf32>
    %cst_40 = arith.constant 0.254829586 : f32
    %112 = vector.broadcast %cst_40 : f32 to vector<16x128xf32>
    %113 = arith.addf %111, %112 : vector<16x128xf32>
    %114 = arith.mulf %113, %100 : vector<16x128xf32>
    %cst_41 = arith.constant 0.000000e+00 : f32
    %115 = vector.broadcast %cst_41 : f32 to vector<16x128xf32>
    %116 = arith.subf %115, %94 : vector<16x128xf32>
    %117 = arith.mulf %116, %94 : vector<16x128xf32>
    %118 = math.exp %117 : vector<16x128xf32>
    %119 = arith.mulf %114, %118 : vector<16x128xf32>
    %cst_42 = arith.constant 1.000000e+00 : f32
    %120 = vector.broadcast %cst_42 : f32 to vector<16x128xf32>
    %121 = arith.subf %120, %119 : vector<16x128xf32>
    %122 = arith.mulf %93, %121 : vector<16x128xf32>
    %cst_43 = arith.constant 1.000000e+00 : f32
    %123 = vector.broadcast %cst_43 : f32 to vector<16x128xf32>
    %124 = arith.addf %123, %122 : vector<16x128xf32>
    %125 = arith.mulf %86, %124 : vector<16x128xf32>
    %cst_44 = arith.constant 0.000000e+00 : f32
    %126 = vector.broadcast %cst_44 : f32 to vector<16x128xf32>
    %c0_45 = arith.constant 0 : index
    %c0_46 = arith.constant 0 : index
    %127 = vector.load %arg3[%c0_45, %c0_46] : memref<1x128xf32, #tpu.memory_space<vmem>>, vector<1x128xf32>
    %128 = vector.broadcast %127 : vector<1x128xf32> to vector<16x128xf32>
    %129 = arith.addf %126, %128 : vector<16x128xf32>
    %c1_i32_47 = arith.constant 1 : i32
    %130 = tpu.dynamic_rotate %125 by %c1_i32_47 dim 0 : vector<16x128xf32>, i32 -> vector<16x128xf32>
    %cst_48 = arith.constant 0.000000e+00 : f32
    %131 = vector.shape_cast %27 : vector<16x1xi1> to vector<16x1xi1>
    %132 = vector.broadcast %131 : vector<16x1xi1> to vector<16x128xi1>
    %133 = vector.broadcast %cst_48 : f32 to vector<16x128xf32>
    %134 = arith.select %132, %130, %133 : vector<16x128xi1>, vector<16x128xf32>
    %c49_i32 = arith.constant 49 : i32
    %135 = tpu.dynamic_rotate %134 by %c49_i32 dim 1 : vector<16x128xf32>, i32 -> vector<16x128xf32>
    %c0_49 = arith.constant 0 : index
    %c0_50 = arith.constant 0 : index
    %136 = vector.load %arg2[%c0_49, %c0_50] : memref<63x128xf32, #tpu.memory_space<vmem>>, vector<1x128xf32>
    %137 = vector.broadcast %136 : vector<1x128xf32> to vector<16x128xf32>
    %138 = arith.mulf %137, %135 : vector<16x128xf32>
    %139 = arith.addf %129, %138 : vector<16x128xf32>
    %c48_i32 = arith.constant 48 : i32
    %140 = tpu.dynamic_rotate %134 by %c48_i32 dim 1 : vector<16x128xf32>, i32 -> vector<16x128xf32>
    %c1 = arith.constant 1 : index
    %c0_51 = arith.constant 0 : index
    %141 = vector.load %arg2[%c1, %c0_51] : memref<63x128xf32, #tpu.memory_space<vmem>>, vector<1x128xf32>
    %142 = vector.broadcast %141 : vector<1x128xf32> to vector<16x128xf32>
    %143 = arith.mulf %142, %140 : vector<16x128xf32>
    %144 = arith.addf %139, %143 : vector<16x128xf32>
    %c47_i32 = arith.constant 47 : i32
    %145 = tpu.dynamic_rotate %134 by %c47_i32 dim 1 : vector<16x128xf32>, i32 -> vector<16x128xf32>
    %c2 = arith.constant 2 : index
    %c0_52 = arith.constant 0 : index
    %146 = vector.load %arg2[%c2, %c0_52] : memref<63x128xf32, #tpu.memory_space<vmem>>, vector<1x128xf32>
    %147 = vector.broadcast %146 : vector<1x128xf32> to vector<16x128xf32>
    %148 = arith.mulf %147, %145 : vector<16x128xf32>
    %149 = arith.addf %144, %148 : vector<16x128xf32>
    %c33_i32 = arith.constant 33 : i32
    %150 = tpu.dynamic_rotate %134 by %c33_i32 dim 1 : vector<16x128xf32>, i32 -> vector<16x128xf32>
    %c3 = arith.constant 3 : index
    %c0_53 = arith.constant 0 : index
    %151 = vector.load %arg2[%c3, %c0_53] : memref<63x128xf32, #tpu.memory_space<vmem>>, vector<1x128xf32>
    %152 = vector.broadcast %151 : vector<1x128xf32> to vector<16x128xf32>
    %153 = arith.mulf %152, %150 : vector<16x128xf32>
    %154 = arith.addf %149, %153 : vector<16x128xf32>
    %c32_i32 = arith.constant 32 : i32
    %155 = tpu.dynamic_rotate %134 by %c32_i32 dim 1 : vector<16x128xf32>, i32 -> vector<16x128xf32>
    %c4 = arith.constant 4 : index
    %c0_54 = arith.constant 0 : index
    %156 = vector.load %arg2[%c4, %c0_54] : memref<63x128xf32, #tpu.memory_space<vmem>>, vector<1x128xf32>
    %157 = vector.broadcast %156 : vector<1x128xf32> to vector<16x128xf32>
    %158 = arith.mulf %157, %155 : vector<16x128xf32>
    %159 = arith.addf %154, %158 : vector<16x128xf32>
    %c31_i32 = arith.constant 31 : i32
    %160 = tpu.dynamic_rotate %134 by %c31_i32 dim 1 : vector<16x128xf32>, i32 -> vector<16x128xf32>
    %c5 = arith.constant 5 : index
    %c0_55 = arith.constant 0 : index
    %161 = vector.load %arg2[%c5, %c0_55] : memref<63x128xf32, #tpu.memory_space<vmem>>, vector<1x128xf32>
    %162 = vector.broadcast %161 : vector<1x128xf32> to vector<16x128xf32>
    %163 = arith.mulf %162, %160 : vector<16x128xf32>
    %164 = arith.addf %159, %163 : vector<16x128xf32>
    %c17_i32 = arith.constant 17 : i32
    %165 = tpu.dynamic_rotate %134 by %c17_i32 dim 1 : vector<16x128xf32>, i32 -> vector<16x128xf32>
    %c6 = arith.constant 6 : index
    %c0_56 = arith.constant 0 : index
    %166 = vector.load %arg2[%c6, %c0_56] : memref<63x128xf32, #tpu.memory_space<vmem>>, vector<1x128xf32>
    %167 = vector.broadcast %166 : vector<1x128xf32> to vector<16x128xf32>
    %168 = arith.mulf %167, %165 : vector<16x128xf32>
    %169 = arith.addf %164, %168 : vector<16x128xf32>
    %c16_i32_57 = arith.constant 16 : i32
    %170 = tpu.dynamic_rotate %134 by %c16_i32_57 dim 1 : vector<16x128xf32>, i32 -> vector<16x128xf32>
    %c7 = arith.constant 7 : index
    %c0_58 = arith.constant 0 : index
    %171 = vector.load %arg2[%c7, %c0_58] : memref<63x128xf32, #tpu.memory_space<vmem>>, vector<1x128xf32>
    %172 = vector.broadcast %171 : vector<1x128xf32> to vector<16x128xf32>
    %173 = arith.mulf %172, %170 : vector<16x128xf32>
    %174 = arith.addf %169, %173 : vector<16x128xf32>
    %c15_i32 = arith.constant 15 : i32
    %175 = tpu.dynamic_rotate %134 by %c15_i32 dim 1 : vector<16x128xf32>, i32 -> vector<16x128xf32>
    %c8 = arith.constant 8 : index
    %c0_59 = arith.constant 0 : index
    %176 = vector.load %arg2[%c8, %c0_59] : memref<63x128xf32, #tpu.memory_space<vmem>>, vector<1x128xf32>
    %177 = vector.broadcast %176 : vector<1x128xf32> to vector<16x128xf32>
    %178 = arith.mulf %177, %175 : vector<16x128xf32>
    %179 = arith.addf %174, %178 : vector<16x128xf32>
    %c1_i32_60 = arith.constant 1 : i32
    %180 = tpu.dynamic_rotate %134 by %c1_i32_60 dim 1 : vector<16x128xf32>, i32 -> vector<16x128xf32>
    %c9 = arith.constant 9 : index
    %c0_61 = arith.constant 0 : index
    %181 = vector.load %arg2[%c9, %c0_61] : memref<63x128xf32, #tpu.memory_space<vmem>>, vector<1x128xf32>
    %182 = vector.broadcast %181 : vector<1x128xf32> to vector<16x128xf32>
    %183 = arith.mulf %182, %180 : vector<16x128xf32>
    %184 = arith.addf %179, %183 : vector<16x128xf32>
    %c10 = arith.constant 10 : index
    %c0_62 = arith.constant 0 : index
    %185 = vector.load %arg2[%c10, %c0_62] : memref<63x128xf32, #tpu.memory_space<vmem>>, vector<1x128xf32>
    %186 = vector.broadcast %185 : vector<1x128xf32> to vector<16x128xf32>
    %187 = arith.mulf %186, %134 : vector<16x128xf32>
    %188 = arith.addf %184, %187 : vector<16x128xf32>
    %c127_i32_63 = arith.constant 127 : i32
    %189 = tpu.dynamic_rotate %134 by %c127_i32_63 dim 1 : vector<16x128xf32>, i32 -> vector<16x128xf32>
    %c11 = arith.constant 11 : index
    %c0_64 = arith.constant 0 : index
    %190 = vector.load %arg2[%c11, %c0_64] : memref<63x128xf32, #tpu.memory_space<vmem>>, vector<1x128xf32>
    %191 = vector.broadcast %190 : vector<1x128xf32> to vector<16x128xf32>
    %192 = arith.mulf %191, %189 : vector<16x128xf32>
    %193 = arith.addf %188, %192 : vector<16x128xf32>
    %c113_i32 = arith.constant 113 : i32
    %194 = tpu.dynamic_rotate %134 by %c113_i32 dim 1 : vector<16x128xf32>, i32 -> vector<16x128xf32>
    %c12 = arith.constant 12 : index
    %c0_65 = arith.constant 0 : index
    %195 = vector.load %arg2[%c12, %c0_65] : memref<63x128xf32, #tpu.memory_space<vmem>>, vector<1x128xf32>
    %196 = vector.broadcast %195 : vector<1x128xf32> to vector<16x128xf32>
    %197 = arith.mulf %196, %194 : vector<16x128xf32>
    %198 = arith.addf %193, %197 : vector<16x128xf32>
    %c112_i32 = arith.constant 112 : i32
    %199 = tpu.dynamic_rotate %134 by %c112_i32 dim 1 : vector<16x128xf32>, i32 -> vector<16x128xf32>
    %c13 = arith.constant 13 : index
    %c0_66 = arith.constant 0 : index
    %200 = vector.load %arg2[%c13, %c0_66] : memref<63x128xf32, #tpu.memory_space<vmem>>, vector<1x128xf32>
    %201 = vector.broadcast %200 : vector<1x128xf32> to vector<16x128xf32>
    %202 = arith.mulf %201, %199 : vector<16x128xf32>
    %203 = arith.addf %198, %202 : vector<16x128xf32>
    %c111_i32 = arith.constant 111 : i32
    %204 = tpu.dynamic_rotate %134 by %c111_i32 dim 1 : vector<16x128xf32>, i32 -> vector<16x128xf32>
    %c14 = arith.constant 14 : index
    %c0_67 = arith.constant 0 : index
    %205 = vector.load %arg2[%c14, %c0_67] : memref<63x128xf32, #tpu.memory_space<vmem>>, vector<1x128xf32>
    %206 = vector.broadcast %205 : vector<1x128xf32> to vector<16x128xf32>
    %207 = arith.mulf %206, %204 : vector<16x128xf32>
    %208 = arith.addf %203, %207 : vector<16x128xf32>
    %c97_i32 = arith.constant 97 : i32
    %209 = tpu.dynamic_rotate %134 by %c97_i32 dim 1 : vector<16x128xf32>, i32 -> vector<16x128xf32>
    %c15 = arith.constant 15 : index
    %c0_68 = arith.constant 0 : index
    %210 = vector.load %arg2[%c15, %c0_68] : memref<63x128xf32, #tpu.memory_space<vmem>>, vector<1x128xf32>
    %211 = vector.broadcast %210 : vector<1x128xf32> to vector<16x128xf32>
    %212 = arith.mulf %211, %209 : vector<16x128xf32>
    %213 = arith.addf %208, %212 : vector<16x128xf32>
    %c96_i32 = arith.constant 96 : i32
    %214 = tpu.dynamic_rotate %134 by %c96_i32 dim 1 : vector<16x128xf32>, i32 -> vector<16x128xf32>
    %c16 = arith.constant 16 : index
    %c0_69 = arith.constant 0 : index
    %215 = vector.load %arg2[%c16, %c0_69] : memref<63x128xf32, #tpu.memory_space<vmem>>, vector<1x128xf32>
    %216 = vector.broadcast %215 : vector<1x128xf32> to vector<16x128xf32>
    %217 = arith.mulf %216, %214 : vector<16x128xf32>
    %218 = arith.addf %213, %217 : vector<16x128xf32>
    %c95_i32 = arith.constant 95 : i32
    %219 = tpu.dynamic_rotate %134 by %c95_i32 dim 1 : vector<16x128xf32>, i32 -> vector<16x128xf32>
    %c17 = arith.constant 17 : index
    %c0_70 = arith.constant 0 : index
    %220 = vector.load %arg2[%c17, %c0_70] : memref<63x128xf32, #tpu.memory_space<vmem>>, vector<1x128xf32>
    %221 = vector.broadcast %220 : vector<1x128xf32> to vector<16x128xf32>
    %222 = arith.mulf %221, %219 : vector<16x128xf32>
    %223 = arith.addf %218, %222 : vector<16x128xf32>
    %c81_i32 = arith.constant 81 : i32
    %224 = tpu.dynamic_rotate %134 by %c81_i32 dim 1 : vector<16x128xf32>, i32 -> vector<16x128xf32>
    %c18 = arith.constant 18 : index
    %c0_71 = arith.constant 0 : index
    %225 = vector.load %arg2[%c18, %c0_71] : memref<63x128xf32, #tpu.memory_space<vmem>>, vector<1x128xf32>
    %226 = vector.broadcast %225 : vector<1x128xf32> to vector<16x128xf32>
    %227 = arith.mulf %226, %224 : vector<16x128xf32>
    %228 = arith.addf %223, %227 : vector<16x128xf32>
    %c80_i32 = arith.constant 80 : i32
    %229 = tpu.dynamic_rotate %134 by %c80_i32 dim 1 : vector<16x128xf32>, i32 -> vector<16x128xf32>
    %c19 = arith.constant 19 : index
    %c0_72 = arith.constant 0 : index
    %230 = vector.load %arg2[%c19, %c0_72] : memref<63x128xf32, #tpu.memory_space<vmem>>, vector<1x128xf32>
    %231 = vector.broadcast %230 : vector<1x128xf32> to vector<16x128xf32>
    %232 = arith.mulf %231, %229 : vector<16x128xf32>
    %233 = arith.addf %228, %232 : vector<16x128xf32>
    %c79_i32 = arith.constant 79 : i32
    %234 = tpu.dynamic_rotate %134 by %c79_i32 dim 1 : vector<16x128xf32>, i32 -> vector<16x128xf32>
    %c20 = arith.constant 20 : index
    %c0_73 = arith.constant 0 : index
    %235 = vector.load %arg2[%c20, %c0_73] : memref<63x128xf32, #tpu.memory_space<vmem>>, vector<1x128xf32>
    %236 = vector.broadcast %235 : vector<1x128xf32> to vector<16x128xf32>
    %237 = arith.mulf %236, %234 : vector<16x128xf32>
    %238 = arith.addf %233, %237 : vector<16x128xf32>
    %c49_i32_74 = arith.constant 49 : i32
    %239 = tpu.dynamic_rotate %125 by %c49_i32_74 dim 1 : vector<16x128xf32>, i32 -> vector<16x128xf32>
    %c21 = arith.constant 21 : index
    %c0_75 = arith.constant 0 : index
    %240 = vector.load %arg2[%c21, %c0_75] : memref<63x128xf32, #tpu.memory_space<vmem>>, vector<1x128xf32>
    %241 = vector.broadcast %240 : vector<1x128xf32> to vector<16x128xf32>
    %242 = arith.mulf %241, %239 : vector<16x128xf32>
    %243 = arith.addf %238, %242 : vector<16x128xf32>
    %c48_i32_76 = arith.constant 48 : i32
    %244 = tpu.dynamic_rotate %125 by %c48_i32_76 dim 1 : vector<16x128xf32>, i32 -> vector<16x128xf32>
    %c22 = arith.constant 22 : index
    %c0_77 = arith.constant 0 : index
    %245 = vector.load %arg2[%c22, %c0_77] : memref<63x128xf32, #tpu.memory_space<vmem>>, vector<1x128xf32>
    %246 = vector.broadcast %245 : vector<1x128xf32> to vector<16x128xf32>
    %247 = arith.mulf %246, %244 : vector<16x128xf32>
    %248 = arith.addf %243, %247 : vector<16x128xf32>
    %c47_i32_78 = arith.constant 47 : i32
    %249 = tpu.dynamic_rotate %125 by %c47_i32_78 dim 1 : vector<16x128xf32>, i32 -> vector<16x128xf32>
    %c23 = arith.constant 23 : index
    %c0_79 = arith.constant 0 : index
    %250 = vector.load %arg2[%c23, %c0_79] : memref<63x128xf32, #tpu.memory_space<vmem>>, vector<1x128xf32>
    %251 = vector.broadcast %250 : vector<1x128xf32> to vector<16x128xf32>
    %252 = arith.mulf %251, %249 : vector<16x128xf32>
    %253 = arith.addf %248, %252 : vector<16x128xf32>
    %c33_i32_80 = arith.constant 33 : i32
    %254 = tpu.dynamic_rotate %125 by %c33_i32_80 dim 1 : vector<16x128xf32>, i32 -> vector<16x128xf32>
    %c24 = arith.constant 24 : index
    %c0_81 = arith.constant 0 : index
    %255 = vector.load %arg2[%c24, %c0_81] : memref<63x128xf32, #tpu.memory_space<vmem>>, vector<1x128xf32>
    %256 = vector.broadcast %255 : vector<1x128xf32> to vector<16x128xf32>
    %257 = arith.mulf %256, %254 : vector<16x128xf32>
    %258 = arith.addf %253, %257 : vector<16x128xf32>
    %c32_i32_82 = arith.constant 32 : i32
    %259 = tpu.dynamic_rotate %125 by %c32_i32_82 dim 1 : vector<16x128xf32>, i32 -> vector<16x128xf32>
    %c25 = arith.constant 25 : index
    %c0_83 = arith.constant 0 : index
    %260 = vector.load %arg2[%c25, %c0_83] : memref<63x128xf32, #tpu.memory_space<vmem>>, vector<1x128xf32>
    %261 = vector.broadcast %260 : vector<1x128xf32> to vector<16x128xf32>
    %262 = arith.mulf %261, %259 : vector<16x128xf32>
    %263 = arith.addf %258, %262 : vector<16x128xf32>
    %c31_i32_84 = arith.constant 31 : i32
    %264 = tpu.dynamic_rotate %125 by %c31_i32_84 dim 1 : vector<16x128xf32>, i32 -> vector<16x128xf32>
    %c26 = arith.constant 26 : index
    %c0_85 = arith.constant 0 : index
    %265 = vector.load %arg2[%c26, %c0_85] : memref<63x128xf32, #tpu.memory_space<vmem>>, vector<1x128xf32>
    %266 = vector.broadcast %265 : vector<1x128xf32> to vector<16x128xf32>
    %267 = arith.mulf %266, %264 : vector<16x128xf32>
    %268 = arith.addf %263, %267 : vector<16x128xf32>
    %c17_i32_86 = arith.constant 17 : i32
    %269 = tpu.dynamic_rotate %125 by %c17_i32_86 dim 1 : vector<16x128xf32>, i32 -> vector<16x128xf32>
    %c27 = arith.constant 27 : index
    %c0_87 = arith.constant 0 : index
    %270 = vector.load %arg2[%c27, %c0_87] : memref<63x128xf32, #tpu.memory_space<vmem>>, vector<1x128xf32>
    %271 = vector.broadcast %270 : vector<1x128xf32> to vector<16x128xf32>
    %272 = arith.mulf %271, %269 : vector<16x128xf32>
    %273 = arith.addf %268, %272 : vector<16x128xf32>
    %c16_i32_88 = arith.constant 16 : i32
    %274 = tpu.dynamic_rotate %125 by %c16_i32_88 dim 1 : vector<16x128xf32>, i32 -> vector<16x128xf32>
    %c28 = arith.constant 28 : index
    %c0_89 = arith.constant 0 : index
    %275 = vector.load %arg2[%c28, %c0_89] : memref<63x128xf32, #tpu.memory_space<vmem>>, vector<1x128xf32>
    %276 = vector.broadcast %275 : vector<1x128xf32> to vector<16x128xf32>
    %277 = arith.mulf %276, %274 : vector<16x128xf32>
    %278 = arith.addf %273, %277 : vector<16x128xf32>
    %c15_i32_90 = arith.constant 15 : i32
    %279 = tpu.dynamic_rotate %125 by %c15_i32_90 dim 1 : vector<16x128xf32>, i32 -> vector<16x128xf32>
    %c29 = arith.constant 29 : index
    %c0_91 = arith.constant 0 : index
    %280 = vector.load %arg2[%c29, %c0_91] : memref<63x128xf32, #tpu.memory_space<vmem>>, vector<1x128xf32>
    %281 = vector.broadcast %280 : vector<1x128xf32> to vector<16x128xf32>
    %282 = arith.mulf %281, %279 : vector<16x128xf32>
    %283 = arith.addf %278, %282 : vector<16x128xf32>
    %c1_i32_92 = arith.constant 1 : i32
    %284 = tpu.dynamic_rotate %125 by %c1_i32_92 dim 1 : vector<16x128xf32>, i32 -> vector<16x128xf32>
    %c30 = arith.constant 30 : index
    %c0_93 = arith.constant 0 : index
    %285 = vector.load %arg2[%c30, %c0_93] : memref<63x128xf32, #tpu.memory_space<vmem>>, vector<1x128xf32>
    %286 = vector.broadcast %285 : vector<1x128xf32> to vector<16x128xf32>
    %287 = arith.mulf %286, %284 : vector<16x128xf32>
    %288 = arith.addf %283, %287 : vector<16x128xf32>
    %c31 = arith.constant 31 : index
    %c0_94 = arith.constant 0 : index
    %289 = vector.load %arg2[%c31, %c0_94] : memref<63x128xf32, #tpu.memory_space<vmem>>, vector<1x128xf32>
    %290 = vector.broadcast %289 : vector<1x128xf32> to vector<16x128xf32>
    %291 = arith.mulf %290, %125 : vector<16x128xf32>
    %292 = arith.addf %288, %291 : vector<16x128xf32>
    %c127_i32_95 = arith.constant 127 : i32
    %293 = tpu.dynamic_rotate %125 by %c127_i32_95 dim 1 : vector<16x128xf32>, i32 -> vector<16x128xf32>
    %c32 = arith.constant 32 : index
    %c0_96 = arith.constant 0 : index
    %294 = vector.load %arg2[%c32, %c0_96] : memref<63x128xf32, #tpu.memory_space<vmem>>, vector<1x128xf32>
    %295 = vector.broadcast %294 : vector<1x128xf32> to vector<16x128xf32>
    %296 = arith.mulf %295, %293 : vector<16x128xf32>
    %297 = arith.addf %292, %296 : vector<16x128xf32>
    %c113_i32_97 = arith.constant 113 : i32
    %298 = tpu.dynamic_rotate %125 by %c113_i32_97 dim 1 : vector<16x128xf32>, i32 -> vector<16x128xf32>
    %c33 = arith.constant 33 : index
    %c0_98 = arith.constant 0 : index
    %299 = vector.load %arg2[%c33, %c0_98] : memref<63x128xf32, #tpu.memory_space<vmem>>, vector<1x128xf32>
    %300 = vector.broadcast %299 : vector<1x128xf32> to vector<16x128xf32>
    %301 = arith.mulf %300, %298 : vector<16x128xf32>
    %302 = arith.addf %297, %301 : vector<16x128xf32>
    %c112_i32_99 = arith.constant 112 : i32
    %303 = tpu.dynamic_rotate %125 by %c112_i32_99 dim 1 : vector<16x128xf32>, i32 -> vector<16x128xf32>
    %c34 = arith.constant 34 : index
    %c0_100 = arith.constant 0 : index
    %304 = vector.load %arg2[%c34, %c0_100] : memref<63x128xf32, #tpu.memory_space<vmem>>, vector<1x128xf32>
    %305 = vector.broadcast %304 : vector<1x128xf32> to vector<16x128xf32>
    %306 = arith.mulf %305, %303 : vector<16x128xf32>
    %307 = arith.addf %302, %306 : vector<16x128xf32>
    %c111_i32_101 = arith.constant 111 : i32
    %308 = tpu.dynamic_rotate %125 by %c111_i32_101 dim 1 : vector<16x128xf32>, i32 -> vector<16x128xf32>
    %c35 = arith.constant 35 : index
    %c0_102 = arith.constant 0 : index
    %309 = vector.load %arg2[%c35, %c0_102] : memref<63x128xf32, #tpu.memory_space<vmem>>, vector<1x128xf32>
    %310 = vector.broadcast %309 : vector<1x128xf32> to vector<16x128xf32>
    %311 = arith.mulf %310, %308 : vector<16x128xf32>
    %312 = arith.addf %307, %311 : vector<16x128xf32>
    %c97_i32_103 = arith.constant 97 : i32
    %313 = tpu.dynamic_rotate %125 by %c97_i32_103 dim 1 : vector<16x128xf32>, i32 -> vector<16x128xf32>
    %c36 = arith.constant 36 : index
    %c0_104 = arith.constant 0 : index
    %314 = vector.load %arg2[%c36, %c0_104] : memref<63x128xf32, #tpu.memory_space<vmem>>, vector<1x128xf32>
    %315 = vector.broadcast %314 : vector<1x128xf32> to vector<16x128xf32>
    %316 = arith.mulf %315, %313 : vector<16x128xf32>
    %317 = arith.addf %312, %316 : vector<16x128xf32>
    %c96_i32_105 = arith.constant 96 : i32
    %318 = tpu.dynamic_rotate %125 by %c96_i32_105 dim 1 : vector<16x128xf32>, i32 -> vector<16x128xf32>
    %c37 = arith.constant 37 : index
    %c0_106 = arith.constant 0 : index
    %319 = vector.load %arg2[%c37, %c0_106] : memref<63x128xf32, #tpu.memory_space<vmem>>, vector<1x128xf32>
    %320 = vector.broadcast %319 : vector<1x128xf32> to vector<16x128xf32>
    %321 = arith.mulf %320, %318 : vector<16x128xf32>
    %322 = arith.addf %317, %321 : vector<16x128xf32>
    %c95_i32_107 = arith.constant 95 : i32
    %323 = tpu.dynamic_rotate %125 by %c95_i32_107 dim 1 : vector<16x128xf32>, i32 -> vector<16x128xf32>
    %c38 = arith.constant 38 : index
    %c0_108 = arith.constant 0 : index
    %324 = vector.load %arg2[%c38, %c0_108] : memref<63x128xf32, #tpu.memory_space<vmem>>, vector<1x128xf32>
    %325 = vector.broadcast %324 : vector<1x128xf32> to vector<16x128xf32>
    %326 = arith.mulf %325, %323 : vector<16x128xf32>
    %327 = arith.addf %322, %326 : vector<16x128xf32>
    %c81_i32_109 = arith.constant 81 : i32
    %328 = tpu.dynamic_rotate %125 by %c81_i32_109 dim 1 : vector<16x128xf32>, i32 -> vector<16x128xf32>
    %c39 = arith.constant 39 : index
    %c0_110 = arith.constant 0 : index
    %329 = vector.load %arg2[%c39, %c0_110] : memref<63x128xf32, #tpu.memory_space<vmem>>, vector<1x128xf32>
    %330 = vector.broadcast %329 : vector<1x128xf32> to vector<16x128xf32>
    %331 = arith.mulf %330, %328 : vector<16x128xf32>
    %332 = arith.addf %327, %331 : vector<16x128xf32>
    %c80_i32_111 = arith.constant 80 : i32
    %333 = tpu.dynamic_rotate %125 by %c80_i32_111 dim 1 : vector<16x128xf32>, i32 -> vector<16x128xf32>
    %c40 = arith.constant 40 : index
    %c0_112 = arith.constant 0 : index
    %334 = vector.load %arg2[%c40, %c0_112] : memref<63x128xf32, #tpu.memory_space<vmem>>, vector<1x128xf32>
    %335 = vector.broadcast %334 : vector<1x128xf32> to vector<16x128xf32>
    %336 = arith.mulf %335, %333 : vector<16x128xf32>
    %337 = arith.addf %332, %336 : vector<16x128xf32>
    %c79_i32_113 = arith.constant 79 : i32
    %338 = tpu.dynamic_rotate %125 by %c79_i32_113 dim 1 : vector<16x128xf32>, i32 -> vector<16x128xf32>
    %c41 = arith.constant 41 : index
    %c0_114 = arith.constant 0 : index
    %339 = vector.load %arg2[%c41, %c0_114] : memref<63x128xf32, #tpu.memory_space<vmem>>, vector<1x128xf32>
    %340 = vector.broadcast %339 : vector<1x128xf32> to vector<16x128xf32>
    %341 = arith.mulf %340, %338 : vector<16x128xf32>
    %342 = arith.addf %337, %341 : vector<16x128xf32>
    %c15_i32_115 = arith.constant 15 : i32
    %343 = tpu.dynamic_rotate %125 by %c15_i32_115 dim 0 : vector<16x128xf32>, i32 -> vector<16x128xf32>
    %cst_116 = arith.constant 0.000000e+00 : f32
    %344 = vector.shape_cast %36 : vector<16x1xi1> to vector<16x1xi1>
    %345 = vector.broadcast %344 : vector<16x1xi1> to vector<16x128xi1>
    %346 = vector.broadcast %cst_116 : f32 to vector<16x128xf32>
    %347 = arith.select %345, %343, %346 : vector<16x128xi1>, vector<16x128xf32>
    %c49_i32_117 = arith.constant 49 : i32
    %348 = tpu.dynamic_rotate %347 by %c49_i32_117 dim 1 : vector<16x128xf32>, i32 -> vector<16x128xf32>
    %c42 = arith.constant 42 : index
    %c0_118 = arith.constant 0 : index
    %349 = vector.load %arg2[%c42, %c0_118] : memref<63x128xf32, #tpu.memory_space<vmem>>, vector<1x128xf32>
    %350 = vector.broadcast %349 : vector<1x128xf32> to vector<16x128xf32>
    %351 = arith.mulf %350, %348 : vector<16x128xf32>
    %352 = arith.addf %342, %351 : vector<16x128xf32>
    %c48_i32_119 = arith.constant 48 : i32
    %353 = tpu.dynamic_rotate %347 by %c48_i32_119 dim 1 : vector<16x128xf32>, i32 -> vector<16x128xf32>
    %c43 = arith.constant 43 : index
    %c0_120 = arith.constant 0 : index
    %354 = vector.load %arg2[%c43, %c0_120] : memref<63x128xf32, #tpu.memory_space<vmem>>, vector<1x128xf32>
    %355 = vector.broadcast %354 : vector<1x128xf32> to vector<16x128xf32>
    %356 = arith.mulf %355, %353 : vector<16x128xf32>
    %357 = arith.addf %352, %356 : vector<16x128xf32>
    %c47_i32_121 = arith.constant 47 : i32
    %358 = tpu.dynamic_rotate %347 by %c47_i32_121 dim 1 : vector<16x128xf32>, i32 -> vector<16x128xf32>
    %c44 = arith.constant 44 : index
    %c0_122 = arith.constant 0 : index
    %359 = vector.load %arg2[%c44, %c0_122] : memref<63x128xf32, #tpu.memory_space<vmem>>, vector<1x128xf32>
    %360 = vector.broadcast %359 : vector<1x128xf32> to vector<16x128xf32>
    %361 = arith.mulf %360, %358 : vector<16x128xf32>
    %362 = arith.addf %357, %361 : vector<16x128xf32>
    %c33_i32_123 = arith.constant 33 : i32
    %363 = tpu.dynamic_rotate %347 by %c33_i32_123 dim 1 : vector<16x128xf32>, i32 -> vector<16x128xf32>
    %c45 = arith.constant 45 : index
    %c0_124 = arith.constant 0 : index
    %364 = vector.load %arg2[%c45, %c0_124] : memref<63x128xf32, #tpu.memory_space<vmem>>, vector<1x128xf32>
    %365 = vector.broadcast %364 : vector<1x128xf32> to vector<16x128xf32>
    %366 = arith.mulf %365, %363 : vector<16x128xf32>
    %367 = arith.addf %362, %366 : vector<16x128xf32>
    %c32_i32_125 = arith.constant 32 : i32
    %368 = tpu.dynamic_rotate %347 by %c32_i32_125 dim 1 : vector<16x128xf32>, i32 -> vector<16x128xf32>
    %c46 = arith.constant 46 : index
    %c0_126 = arith.constant 0 : index
    %369 = vector.load %arg2[%c46, %c0_126] : memref<63x128xf32, #tpu.memory_space<vmem>>, vector<1x128xf32>
    %370 = vector.broadcast %369 : vector<1x128xf32> to vector<16x128xf32>
    %371 = arith.mulf %370, %368 : vector<16x128xf32>
    %372 = arith.addf %367, %371 : vector<16x128xf32>
    %c31_i32_127 = arith.constant 31 : i32
    %373 = tpu.dynamic_rotate %347 by %c31_i32_127 dim 1 : vector<16x128xf32>, i32 -> vector<16x128xf32>
    %c47 = arith.constant 47 : index
    %c0_128 = arith.constant 0 : index
    %374 = vector.load %arg2[%c47, %c0_128] : memref<63x128xf32, #tpu.memory_space<vmem>>, vector<1x128xf32>
    %375 = vector.broadcast %374 : vector<1x128xf32> to vector<16x128xf32>
    %376 = arith.mulf %375, %373 : vector<16x128xf32>
    %377 = arith.addf %372, %376 : vector<16x128xf32>
    %c17_i32_129 = arith.constant 17 : i32
    %378 = tpu.dynamic_rotate %347 by %c17_i32_129 dim 1 : vector<16x128xf32>, i32 -> vector<16x128xf32>
    %c48 = arith.constant 48 : index
    %c0_130 = arith.constant 0 : index
    %379 = vector.load %arg2[%c48, %c0_130] : memref<63x128xf32, #tpu.memory_space<vmem>>, vector<1x128xf32>
    %380 = vector.broadcast %379 : vector<1x128xf32> to vector<16x128xf32>
    %381 = arith.mulf %380, %378 : vector<16x128xf32>
    %382 = arith.addf %377, %381 : vector<16x128xf32>
    %c16_i32_131 = arith.constant 16 : i32
    %383 = tpu.dynamic_rotate %347 by %c16_i32_131 dim 1 : vector<16x128xf32>, i32 -> vector<16x128xf32>
    %c49 = arith.constant 49 : index
    %c0_132 = arith.constant 0 : index
    %384 = vector.load %arg2[%c49, %c0_132] : memref<63x128xf32, #tpu.memory_space<vmem>>, vector<1x128xf32>
    %385 = vector.broadcast %384 : vector<1x128xf32> to vector<16x128xf32>
    %386 = arith.mulf %385, %383 : vector<16x128xf32>
    %387 = arith.addf %382, %386 : vector<16x128xf32>
    %c15_i32_133 = arith.constant 15 : i32
    %388 = tpu.dynamic_rotate %347 by %c15_i32_133 dim 1 : vector<16x128xf32>, i32 -> vector<16x128xf32>
    %c50 = arith.constant 50 : index
    %c0_134 = arith.constant 0 : index
    %389 = vector.load %arg2[%c50, %c0_134] : memref<63x128xf32, #tpu.memory_space<vmem>>, vector<1x128xf32>
    %390 = vector.broadcast %389 : vector<1x128xf32> to vector<16x128xf32>
    %391 = arith.mulf %390, %388 : vector<16x128xf32>
    %392 = arith.addf %387, %391 : vector<16x128xf32>
    %c1_i32_135 = arith.constant 1 : i32
    %393 = tpu.dynamic_rotate %347 by %c1_i32_135 dim 1 : vector<16x128xf32>, i32 -> vector<16x128xf32>
    %c51 = arith.constant 51 : index
    %c0_136 = arith.constant 0 : index
    %394 = vector.load %arg2[%c51, %c0_136] : memref<63x128xf32, #tpu.memory_space<vmem>>, vector<1x128xf32>
    %395 = vector.broadcast %394 : vector<1x128xf32> to vector<16x128xf32>
    %396 = arith.mulf %395, %393 : vector<16x128xf32>
    %397 = arith.addf %392, %396 : vector<16x128xf32>
    %c52 = arith.constant 52 : index
    %c0_137 = arith.constant 0 : index
    %398 = vector.load %arg2[%c52, %c0_137] : memref<63x128xf32, #tpu.memory_space<vmem>>, vector<1x128xf32>
    %399 = vector.broadcast %398 : vector<1x128xf32> to vector<16x128xf32>
    %400 = arith.mulf %399, %347 : vector<16x128xf32>
    %401 = arith.addf %397, %400 : vector<16x128xf32>
    %c127_i32_138 = arith.constant 127 : i32
    %402 = tpu.dynamic_rotate %347 by %c127_i32_138 dim 1 : vector<16x128xf32>, i32 -> vector<16x128xf32>
    %c53 = arith.constant 53 : index
    %c0_139 = arith.constant 0 : index
    %403 = vector.load %arg2[%c53, %c0_139] : memref<63x128xf32, #tpu.memory_space<vmem>>, vector<1x128xf32>
    %404 = vector.broadcast %403 : vector<1x128xf32> to vector<16x128xf32>
    %405 = arith.mulf %404, %402 : vector<16x128xf32>
    %406 = arith.addf %401, %405 : vector<16x128xf32>
    %c113_i32_140 = arith.constant 113 : i32
    %407 = tpu.dynamic_rotate %347 by %c113_i32_140 dim 1 : vector<16x128xf32>, i32 -> vector<16x128xf32>
    %c54 = arith.constant 54 : index
    %c0_141 = arith.constant 0 : index
    %408 = vector.load %arg2[%c54, %c0_141] : memref<63x128xf32, #tpu.memory_space<vmem>>, vector<1x128xf32>
    %409 = vector.broadcast %408 : vector<1x128xf32> to vector<16x128xf32>
    %410 = arith.mulf %409, %407 : vector<16x128xf32>
    %411 = arith.addf %406, %410 : vector<16x128xf32>
    %c112_i32_142 = arith.constant 112 : i32
    %412 = tpu.dynamic_rotate %347 by %c112_i32_142 dim 1 : vector<16x128xf32>, i32 -> vector<16x128xf32>
    %c55 = arith.constant 55 : index
    %c0_143 = arith.constant 0 : index
    %413 = vector.load %arg2[%c55, %c0_143] : memref<63x128xf32, #tpu.memory_space<vmem>>, vector<1x128xf32>
    %414 = vector.broadcast %413 : vector<1x128xf32> to vector<16x128xf32>
    %415 = arith.mulf %414, %412 : vector<16x128xf32>
    %416 = arith.addf %411, %415 : vector<16x128xf32>
    %c111_i32_144 = arith.constant 111 : i32
    %417 = tpu.dynamic_rotate %347 by %c111_i32_144 dim 1 : vector<16x128xf32>, i32 -> vector<16x128xf32>
    %c56 = arith.constant 56 : index
    %c0_145 = arith.constant 0 : index
    %418 = vector.load %arg2[%c56, %c0_145] : memref<63x128xf32, #tpu.memory_space<vmem>>, vector<1x128xf32>
    %419 = vector.broadcast %418 : vector<1x128xf32> to vector<16x128xf32>
    %420 = arith.mulf %419, %417 : vector<16x128xf32>
    %421 = arith.addf %416, %420 : vector<16x128xf32>
    %c97_i32_146 = arith.constant 97 : i32
    %422 = tpu.dynamic_rotate %347 by %c97_i32_146 dim 1 : vector<16x128xf32>, i32 -> vector<16x128xf32>
    %c57 = arith.constant 57 : index
    %c0_147 = arith.constant 0 : index
    %423 = vector.load %arg2[%c57, %c0_147] : memref<63x128xf32, #tpu.memory_space<vmem>>, vector<1x128xf32>
    %424 = vector.broadcast %423 : vector<1x128xf32> to vector<16x128xf32>
    %425 = arith.mulf %424, %422 : vector<16x128xf32>
    %426 = arith.addf %421, %425 : vector<16x128xf32>
    %c96_i32_148 = arith.constant 96 : i32
    %427 = tpu.dynamic_rotate %347 by %c96_i32_148 dim 1 : vector<16x128xf32>, i32 -> vector<16x128xf32>
    %c58 = arith.constant 58 : index
    %c0_149 = arith.constant 0 : index
    %428 = vector.load %arg2[%c58, %c0_149] : memref<63x128xf32, #tpu.memory_space<vmem>>, vector<1x128xf32>
    %429 = vector.broadcast %428 : vector<1x128xf32> to vector<16x128xf32>
    %430 = arith.mulf %429, %427 : vector<16x128xf32>
    %431 = arith.addf %426, %430 : vector<16x128xf32>
    %c95_i32_150 = arith.constant 95 : i32
    %432 = tpu.dynamic_rotate %347 by %c95_i32_150 dim 1 : vector<16x128xf32>, i32 -> vector<16x128xf32>
    %c59 = arith.constant 59 : index
    %c0_151 = arith.constant 0 : index
    %433 = vector.load %arg2[%c59, %c0_151] : memref<63x128xf32, #tpu.memory_space<vmem>>, vector<1x128xf32>
    %434 = vector.broadcast %433 : vector<1x128xf32> to vector<16x128xf32>
    %435 = arith.mulf %434, %432 : vector<16x128xf32>
    %436 = arith.addf %431, %435 : vector<16x128xf32>
    %c81_i32_152 = arith.constant 81 : i32
    %437 = tpu.dynamic_rotate %347 by %c81_i32_152 dim 1 : vector<16x128xf32>, i32 -> vector<16x128xf32>
    %c60 = arith.constant 60 : index
    %c0_153 = arith.constant 0 : index
    %438 = vector.load %arg2[%c60, %c0_153] : memref<63x128xf32, #tpu.memory_space<vmem>>, vector<1x128xf32>
    %439 = vector.broadcast %438 : vector<1x128xf32> to vector<16x128xf32>
    %440 = arith.mulf %439, %437 : vector<16x128xf32>
    %441 = arith.addf %436, %440 : vector<16x128xf32>
    %c80_i32_154 = arith.constant 80 : i32
    %442 = tpu.dynamic_rotate %347 by %c80_i32_154 dim 1 : vector<16x128xf32>, i32 -> vector<16x128xf32>
    %c61 = arith.constant 61 : index
    %c0_155 = arith.constant 0 : index
    %443 = vector.load %arg2[%c61, %c0_155] : memref<63x128xf32, #tpu.memory_space<vmem>>, vector<1x128xf32>
    %444 = vector.broadcast %443 : vector<1x128xf32> to vector<16x128xf32>
    %445 = arith.mulf %444, %442 : vector<16x128xf32>
    %446 = arith.addf %441, %445 : vector<16x128xf32>
    %c79_i32_156 = arith.constant 79 : i32
    %447 = tpu.dynamic_rotate %347 by %c79_i32_156 dim 1 : vector<16x128xf32>, i32 -> vector<16x128xf32>
    %c62 = arith.constant 62 : index
    %c0_157 = arith.constant 0 : index
    %448 = vector.load %arg2[%c62, %c0_157] : memref<63x128xf32, #tpu.memory_space<vmem>>, vector<1x128xf32>
    %449 = vector.broadcast %448 : vector<1x128xf32> to vector<16x128xf32>
    %450 = arith.mulf %449, %447 : vector<16x128xf32>
    %451 = arith.addf %446, %450 : vector<16x128xf32>
    %c127_i32_158 = arith.constant 127 : i32
    %452 = tpu.dynamic_rotate %451 by %c127_i32_158 dim 1 : vector<16x128xf32>, i32 -> vector<16x128xf32>
    %c1_i32_159 = arith.constant 1 : i32
    %453 = tpu.dynamic_rotate %451 by %c1_i32_159 dim 1 : vector<16x128xf32>, i32 -> vector<16x128xf32>
    %454 = arith.select %5, %452, %453 : vector<16x128xi1>, vector<16x128xf32>
    %455 = arith.addf %451, %454 : vector<16x128xf32>
    %c126_i32_160 = arith.constant 126 : i32
    %456 = tpu.dynamic_rotate %455 by %c126_i32_160 dim 1 : vector<16x128xf32>, i32 -> vector<16x128xf32>
    %c2_i32_161 = arith.constant 2 : i32
    %457 = tpu.dynamic_rotate %455 by %c2_i32_161 dim 1 : vector<16x128xf32>, i32 -> vector<16x128xf32>
    %458 = arith.select %9, %456, %457 : vector<16x128xi1>, vector<16x128xf32>
    %459 = arith.addf %455, %458 : vector<16x128xf32>
    %c124_i32_162 = arith.constant 124 : i32
    %460 = tpu.dynamic_rotate %459 by %c124_i32_162 dim 1 : vector<16x128xf32>, i32 -> vector<16x128xf32>
    %c4_i32_163 = arith.constant 4 : i32
    %461 = tpu.dynamic_rotate %459 by %c4_i32_163 dim 1 : vector<16x128xf32>, i32 -> vector<16x128xf32>
    %462 = arith.select %13, %460, %461 : vector<16x128xi1>, vector<16x128xf32>
    %463 = arith.addf %459, %462 : vector<16x128xf32>
    %c120_i32_164 = arith.constant 120 : i32
    %464 = tpu.dynamic_rotate %463 by %c120_i32_164 dim 1 : vector<16x128xf32>, i32 -> vector<16x128xf32>
    %c8_i32_165 = arith.constant 8 : i32
    %465 = tpu.dynamic_rotate %463 by %c8_i32_165 dim 1 : vector<16x128xf32>, i32 -> vector<16x128xf32>
    %466 = arith.select %17, %464, %465 : vector<16x128xi1>, vector<16x128xf32>
    %467 = arith.addf %463, %466 : vector<16x128xf32>
    %cst_166 = arith.constant 6.250000e-02 : f32
    %468 = vector.broadcast %cst_166 : f32 to vector<16x128xf32>
    %469 = arith.mulf %467, %468 : vector<16x128xf32>
    %470 = arith.subf %451, %469 : vector<16x128xf32>
    %471 = arith.mulf %470, %470 : vector<16x128xf32>
    %c127_i32_167 = arith.constant 127 : i32
    %472 = tpu.dynamic_rotate %471 by %c127_i32_167 dim 1 : vector<16x128xf32>, i32 -> vector<16x128xf32>
    %c1_i32_168 = arith.constant 1 : i32
    %473 = tpu.dynamic_rotate %471 by %c1_i32_168 dim 1 : vector<16x128xf32>, i32 -> vector<16x128xf32>
    %474 = arith.select %5, %472, %473 : vector<16x128xi1>, vector<16x128xf32>
    %475 = arith.addf %471, %474 : vector<16x128xf32>
    %c126_i32_169 = arith.constant 126 : i32
    %476 = tpu.dynamic_rotate %475 by %c126_i32_169 dim 1 : vector<16x128xf32>, i32 -> vector<16x128xf32>
    %c2_i32_170 = arith.constant 2 : i32
    %477 = tpu.dynamic_rotate %475 by %c2_i32_170 dim 1 : vector<16x128xf32>, i32 -> vector<16x128xf32>
    %478 = arith.select %9, %476, %477 : vector<16x128xi1>, vector<16x128xf32>
    %479 = arith.addf %475, %478 : vector<16x128xf32>
    %c124_i32_171 = arith.constant 124 : i32
    %480 = tpu.dynamic_rotate %479 by %c124_i32_171 dim 1 : vector<16x128xf32>, i32 -> vector<16x128xf32>
    %c4_i32_172 = arith.constant 4 : i32
    %481 = tpu.dynamic_rotate %479 by %c4_i32_172 dim 1 : vector<16x128xf32>, i32 -> vector<16x128xf32>
    %482 = arith.select %13, %480, %481 : vector<16x128xi1>, vector<16x128xf32>
    %483 = arith.addf %479, %482 : vector<16x128xf32>
    %c120_i32_173 = arith.constant 120 : i32
    %484 = tpu.dynamic_rotate %483 by %c120_i32_173 dim 1 : vector<16x128xf32>, i32 -> vector<16x128xf32>
    %c8_i32_174 = arith.constant 8 : i32
    %485 = tpu.dynamic_rotate %483 by %c8_i32_174 dim 1 : vector<16x128xf32>, i32 -> vector<16x128xf32>
    %486 = arith.select %17, %484, %485 : vector<16x128xi1>, vector<16x128xf32>
    %487 = arith.addf %483, %486 : vector<16x128xf32>
    %cst_175 = arith.constant 6.250000e-02 : f32
    %488 = vector.broadcast %cst_175 : f32 to vector<16x128xf32>
    %489 = arith.mulf %487, %488 : vector<16x128xf32>
    %cst_176 = arith.constant 9.99999974E-6 : f32
    %490 = vector.broadcast %cst_176 : f32 to vector<16x128xf32>
    %491 = arith.addf %489, %490 : vector<16x128xf32>
    %492 = math.rsqrt %491 : vector<16x128xf32>
    %493 = arith.mulf %470, %492 : vector<16x128xf32>
    %c0_177 = arith.constant 0 : index
    %c0_178 = arith.constant 0 : index
    %494 = vector.load %arg8[%c0_177, %c0_178] : memref<1x128xf32, #tpu.memory_space<vmem>>, vector<1x128xf32>
    %495 = vector.broadcast %494 : vector<1x128xf32> to vector<16x128xf32>
    %496 = arith.mulf %493, %495 : vector<16x128xf32>
    %c0_179 = arith.constant 0 : index
    %c0_180 = arith.constant 0 : index
    %497 = vector.load %arg9[%c0_179, %c0_180] : memref<1x128xf32, #tpu.memory_space<vmem>>, vector<1x128xf32>
    %498 = vector.broadcast %497 : vector<1x128xf32> to vector<16x128xf32>
    %499 = arith.addf %496, %498 : vector<16x128xf32>
    %cst_181 = arith.constant 5.000000e-01 : f32
    %500 = vector.broadcast %cst_181 : f32 to vector<16x128xf32>
    %501 = arith.mulf %500, %499 : vector<16x128xf32>
    %cst_182 = arith.constant 0.707106769 : f32
    %502 = vector.broadcast %cst_182 : f32 to vector<16x128xf32>
    %503 = arith.mulf %499, %502 : vector<16x128xf32>
    %cst_183 = arith.constant 0.000000e+00 : f32
    %504 = vector.broadcast %cst_183 : f32 to vector<16x128xf32>
    %505 = arith.cmpf oge, %503, %504 : vector<16x128xf32>
    %cst_184 = arith.constant 1.000000e+00 : f32
    %cst_185 = arith.constant -1.000000e+00 : f32
    %506 = vector.broadcast %cst_184 : f32 to vector<16x128xf32>
    %507 = vector.broadcast %cst_185 : f32 to vector<16x128xf32>
    %508 = arith.select %505, %506, %507 : vector<16x128xi1>, vector<16x128xf32>
    %509 = math.absf %503 : vector<16x128xf32>
    %cst_186 = arith.constant 0.327591091 : f32
    %510 = vector.broadcast %cst_186 : f32 to vector<16x128xf32>
    %511 = arith.mulf %510, %509 : vector<16x128xf32>
    %cst_187 = arith.constant 1.000000e+00 : f32
    %512 = vector.broadcast %cst_187 : f32 to vector<16x128xf32>
    %513 = arith.addf %512, %511 : vector<16x128xf32>
    %cst_188 = arith.constant 1.000000e+00 : f32
    %514 = vector.broadcast %cst_188 : f32 to vector<16x128xf32>
    %515 = arith.divf %514, %513 : vector<16x128xf32>
    %cst_189 = arith.constant 1.06140542 : f32
    %516 = vector.broadcast %cst_189 : f32 to vector<16x128xf32>
    %517 = arith.mulf %516, %515 : vector<16x128xf32>
    %cst_190 = arith.constant -1.45315206 : f32
    %518 = vector.broadcast %cst_190 : f32 to vector<16x128xf32>
    %519 = arith.addf %517, %518 : vector<16x128xf32>
    %520 = arith.mulf %519, %515 : vector<16x128xf32>
    %cst_191 = arith.constant 1.42141378 : f32
    %521 = vector.broadcast %cst_191 : f32 to vector<16x128xf32>
    %522 = arith.addf %520, %521 : vector<16x128xf32>
    %523 = arith.mulf %522, %515 : vector<16x128xf32>
    %cst_192 = arith.constant -0.284496725 : f32
    %524 = vector.broadcast %cst_192 : f32 to vector<16x128xf32>
    %525 = arith.addf %523, %524 : vector<16x128xf32>
    %526 = arith.mulf %525, %515 : vector<16x128xf32>
    %cst_193 = arith.constant 0.254829586 : f32
    %527 = vector.broadcast %cst_193 : f32 to vector<16x128xf32>
    %528 = arith.addf %526, %527 : vector<16x128xf32>
    %529 = arith.mulf %528, %515 : vector<16x128xf32>
    %cst_194 = arith.constant 0.000000e+00 : f32
    %530 = vector.broadcast %cst_194 : f32 to vector<16x128xf32>
    %531 = arith.subf %530, %509 : vector<16x128xf32>
    %532 = arith.mulf %531, %509 : vector<16x128xf32>
    %533 = math.exp %532 : vector<16x128xf32>
    %534 = arith.mulf %529, %533 : vector<16x128xf32>
    %cst_195 = arith.constant 1.000000e+00 : f32
    %535 = vector.broadcast %cst_195 : f32 to vector<16x128xf32>
    %536 = arith.subf %535, %534 : vector<16x128xf32>
    %537 = arith.mulf %508, %536 : vector<16x128xf32>
    %cst_196 = arith.constant 1.000000e+00 : f32
    %538 = vector.broadcast %cst_196 : f32 to vector<16x128xf32>
    %539 = arith.addf %538, %537 : vector<16x128xf32>
    %540 = arith.mulf %501, %539 : vector<16x128xf32>
    %cst_197 = arith.constant 0.000000e+00 : f32
    %541 = vector.broadcast %cst_197 : f32 to vector<16x128xf32>
    %c0_198 = arith.constant 0 : index
    %c0_199 = arith.constant 0 : index
    %542 = vector.load %arg7[%c0_198, %c0_199] : memref<1x128xf32, #tpu.memory_space<vmem>>, vector<1x128xf32>
    %543 = vector.broadcast %542 : vector<1x128xf32> to vector<16x128xf32>
    %544 = arith.addf %541, %543 : vector<16x128xf32>
    %c1_i32_200 = arith.constant 1 : i32
    %545 = tpu.dynamic_rotate %540 by %c1_i32_200 dim 0 : vector<16x128xf32>, i32 -> vector<16x128xf32>
    %cst_201 = arith.constant 0.000000e+00 : f32
    %546 = vector.shape_cast %27 : vector<16x1xi1> to vector<16x1xi1>
    %547 = vector.broadcast %546 : vector<16x1xi1> to vector<16x128xi1>
    %548 = vector.broadcast %cst_201 : f32 to vector<16x128xf32>
    %549 = arith.select %547, %545, %548 : vector<16x128xi1>, vector<16x128xf32>
    %c49_i32_202 = arith.constant 49 : i32
    %550 = tpu.dynamic_rotate %549 by %c49_i32_202 dim 1 : vector<16x128xf32>, i32 -> vector<16x128xf32>
    %c0_203 = arith.constant 0 : index
    %c0_204 = arith.constant 0 : index
    %551 = vector.load %arg6[%c0_203, %c0_204] : memref<63x128xf32, #tpu.memory_space<vmem>>, vector<1x128xf32>
    %552 = vector.broadcast %551 : vector<1x128xf32> to vector<16x128xf32>
    %553 = arith.mulf %552, %550 : vector<16x128xf32>
    %554 = arith.addf %544, %553 : vector<16x128xf32>
    %c48_i32_205 = arith.constant 48 : i32
    %555 = tpu.dynamic_rotate %549 by %c48_i32_205 dim 1 : vector<16x128xf32>, i32 -> vector<16x128xf32>
    %c1_206 = arith.constant 1 : index
    %c0_207 = arith.constant 0 : index
    %556 = vector.load %arg6[%c1_206, %c0_207] : memref<63x128xf32, #tpu.memory_space<vmem>>, vector<1x128xf32>
    %557 = vector.broadcast %556 : vector<1x128xf32> to vector<16x128xf32>
    %558 = arith.mulf %557, %555 : vector<16x128xf32>
    %559 = arith.addf %554, %558 : vector<16x128xf32>
    %c47_i32_208 = arith.constant 47 : i32
    %560 = tpu.dynamic_rotate %549 by %c47_i32_208 dim 1 : vector<16x128xf32>, i32 -> vector<16x128xf32>
    %c2_209 = arith.constant 2 : index
    %c0_210 = arith.constant 0 : index
    %561 = vector.load %arg6[%c2_209, %c0_210] : memref<63x128xf32, #tpu.memory_space<vmem>>, vector<1x128xf32>
    %562 = vector.broadcast %561 : vector<1x128xf32> to vector<16x128xf32>
    %563 = arith.mulf %562, %560 : vector<16x128xf32>
    %564 = arith.addf %559, %563 : vector<16x128xf32>
    %c33_i32_211 = arith.constant 33 : i32
    %565 = tpu.dynamic_rotate %549 by %c33_i32_211 dim 1 : vector<16x128xf32>, i32 -> vector<16x128xf32>
    %c3_212 = arith.constant 3 : index
    %c0_213 = arith.constant 0 : index
    %566 = vector.load %arg6[%c3_212, %c0_213] : memref<63x128xf32, #tpu.memory_space<vmem>>, vector<1x128xf32>
    %567 = vector.broadcast %566 : vector<1x128xf32> to vector<16x128xf32>
    %568 = arith.mulf %567, %565 : vector<16x128xf32>
    %569 = arith.addf %564, %568 : vector<16x128xf32>
    %c32_i32_214 = arith.constant 32 : i32
    %570 = tpu.dynamic_rotate %549 by %c32_i32_214 dim 1 : vector<16x128xf32>, i32 -> vector<16x128xf32>
    %c4_215 = arith.constant 4 : index
    %c0_216 = arith.constant 0 : index
    %571 = vector.load %arg6[%c4_215, %c0_216] : memref<63x128xf32, #tpu.memory_space<vmem>>, vector<1x128xf32>
    %572 = vector.broadcast %571 : vector<1x128xf32> to vector<16x128xf32>
    %573 = arith.mulf %572, %570 : vector<16x128xf32>
    %574 = arith.addf %569, %573 : vector<16x128xf32>
    %c31_i32_217 = arith.constant 31 : i32
    %575 = tpu.dynamic_rotate %549 by %c31_i32_217 dim 1 : vector<16x128xf32>, i32 -> vector<16x128xf32>
    %c5_218 = arith.constant 5 : index
    %c0_219 = arith.constant 0 : index
    %576 = vector.load %arg6[%c5_218, %c0_219] : memref<63x128xf32, #tpu.memory_space<vmem>>, vector<1x128xf32>
    %577 = vector.broadcast %576 : vector<1x128xf32> to vector<16x128xf32>
    %578 = arith.mulf %577, %575 : vector<16x128xf32>
    %579 = arith.addf %574, %578 : vector<16x128xf32>
    %c17_i32_220 = arith.constant 17 : i32
    %580 = tpu.dynamic_rotate %549 by %c17_i32_220 dim 1 : vector<16x128xf32>, i32 -> vector<16x128xf32>
    %c6_221 = arith.constant 6 : index
    %c0_222 = arith.constant 0 : index
    %581 = vector.load %arg6[%c6_221, %c0_222] : memref<63x128xf32, #tpu.memory_space<vmem>>, vector<1x128xf32>
    %582 = vector.broadcast %581 : vector<1x128xf32> to vector<16x128xf32>
    %583 = arith.mulf %582, %580 : vector<16x128xf32>
    %584 = arith.addf %579, %583 : vector<16x128xf32>
    %c16_i32_223 = arith.constant 16 : i32
    %585 = tpu.dynamic_rotate %549 by %c16_i32_223 dim 1 : vector<16x128xf32>, i32 -> vector<16x128xf32>
    %c7_224 = arith.constant 7 : index
    %c0_225 = arith.constant 0 : index
    %586 = vector.load %arg6[%c7_224, %c0_225] : memref<63x128xf32, #tpu.memory_space<vmem>>, vector<1x128xf32>
    %587 = vector.broadcast %586 : vector<1x128xf32> to vector<16x128xf32>
    %588 = arith.mulf %587, %585 : vector<16x128xf32>
    %589 = arith.addf %584, %588 : vector<16x128xf32>
    %c15_i32_226 = arith.constant 15 : i32
    %590 = tpu.dynamic_rotate %549 by %c15_i32_226 dim 1 : vector<16x128xf32>, i32 -> vector<16x128xf32>
    %c8_227 = arith.constant 8 : index
    %c0_228 = arith.constant 0 : index
    %591 = vector.load %arg6[%c8_227, %c0_228] : memref<63x128xf32, #tpu.memory_space<vmem>>, vector<1x128xf32>
    %592 = vector.broadcast %591 : vector<1x128xf32> to vector<16x128xf32>
    %593 = arith.mulf %592, %590 : vector<16x128xf32>
    %594 = arith.addf %589, %593 : vector<16x128xf32>
    %c1_i32_229 = arith.constant 1 : i32
    %595 = tpu.dynamic_rotate %549 by %c1_i32_229 dim 1 : vector<16x128xf32>, i32 -> vector<16x128xf32>
    %c9_230 = arith.constant 9 : index
    %c0_231 = arith.constant 0 : index
    %596 = vector.load %arg6[%c9_230, %c0_231] : memref<63x128xf32, #tpu.memory_space<vmem>>, vector<1x128xf32>
    %597 = vector.broadcast %596 : vector<1x128xf32> to vector<16x128xf32>
    %598 = arith.mulf %597, %595 : vector<16x128xf32>
    %599 = arith.addf %594, %598 : vector<16x128xf32>
    %c10_232 = arith.constant 10 : index
    %c0_233 = arith.constant 0 : index
    %600 = vector.load %arg6[%c10_232, %c0_233] : memref<63x128xf32, #tpu.memory_space<vmem>>, vector<1x128xf32>
    %601 = vector.broadcast %600 : vector<1x128xf32> to vector<16x128xf32>
    %602 = arith.mulf %601, %549 : vector<16x128xf32>
    %603 = arith.addf %599, %602 : vector<16x128xf32>
    %c127_i32_234 = arith.constant 127 : i32
    %604 = tpu.dynamic_rotate %549 by %c127_i32_234 dim 1 : vector<16x128xf32>, i32 -> vector<16x128xf32>
    %c11_235 = arith.constant 11 : index
    %c0_236 = arith.constant 0 : index
    %605 = vector.load %arg6[%c11_235, %c0_236] : memref<63x128xf32, #tpu.memory_space<vmem>>, vector<1x128xf32>
    %606 = vector.broadcast %605 : vector<1x128xf32> to vector<16x128xf32>
    %607 = arith.mulf %606, %604 : vector<16x128xf32>
    %608 = arith.addf %603, %607 : vector<16x128xf32>
    %c113_i32_237 = arith.constant 113 : i32
    %609 = tpu.dynamic_rotate %549 by %c113_i32_237 dim 1 : vector<16x128xf32>, i32 -> vector<16x128xf32>
    %c12_238 = arith.constant 12 : index
    %c0_239 = arith.constant 0 : index
    %610 = vector.load %arg6[%c12_238, %c0_239] : memref<63x128xf32, #tpu.memory_space<vmem>>, vector<1x128xf32>
    %611 = vector.broadcast %610 : vector<1x128xf32> to vector<16x128xf32>
    %612 = arith.mulf %611, %609 : vector<16x128xf32>
    %613 = arith.addf %608, %612 : vector<16x128xf32>
    %c112_i32_240 = arith.constant 112 : i32
    %614 = tpu.dynamic_rotate %549 by %c112_i32_240 dim 1 : vector<16x128xf32>, i32 -> vector<16x128xf32>
    %c13_241 = arith.constant 13 : index
    %c0_242 = arith.constant 0 : index
    %615 = vector.load %arg6[%c13_241, %c0_242] : memref<63x128xf32, #tpu.memory_space<vmem>>, vector<1x128xf32>
    %616 = vector.broadcast %615 : vector<1x128xf32> to vector<16x128xf32>
    %617 = arith.mulf %616, %614 : vector<16x128xf32>
    %618 = arith.addf %613, %617 : vector<16x128xf32>
    %c111_i32_243 = arith.constant 111 : i32
    %619 = tpu.dynamic_rotate %549 by %c111_i32_243 dim 1 : vector<16x128xf32>, i32 -> vector<16x128xf32>
    %c14_244 = arith.constant 14 : index
    %c0_245 = arith.constant 0 : index
    %620 = vector.load %arg6[%c14_244, %c0_245] : memref<63x128xf32, #tpu.memory_space<vmem>>, vector<1x128xf32>
    %621 = vector.broadcast %620 : vector<1x128xf32> to vector<16x128xf32>
    %622 = arith.mulf %621, %619 : vector<16x128xf32>
    %623 = arith.addf %618, %622 : vector<16x128xf32>
    %c97_i32_246 = arith.constant 97 : i32
    %624 = tpu.dynamic_rotate %549 by %c97_i32_246 dim 1 : vector<16x128xf32>, i32 -> vector<16x128xf32>
    %c15_247 = arith.constant 15 : index
    %c0_248 = arith.constant 0 : index
    %625 = vector.load %arg6[%c15_247, %c0_248] : memref<63x128xf32, #tpu.memory_space<vmem>>, vector<1x128xf32>
    %626 = vector.broadcast %625 : vector<1x128xf32> to vector<16x128xf32>
    %627 = arith.mulf %626, %624 : vector<16x128xf32>
    %628 = arith.addf %623, %627 : vector<16x128xf32>
    %c96_i32_249 = arith.constant 96 : i32
    %629 = tpu.dynamic_rotate %549 by %c96_i32_249 dim 1 : vector<16x128xf32>, i32 -> vector<16x128xf32>
    %c16_250 = arith.constant 16 : index
    %c0_251 = arith.constant 0 : index
    %630 = vector.load %arg6[%c16_250, %c0_251] : memref<63x128xf32, #tpu.memory_space<vmem>>, vector<1x128xf32>
    %631 = vector.broadcast %630 : vector<1x128xf32> to vector<16x128xf32>
    %632 = arith.mulf %631, %629 : vector<16x128xf32>
    %633 = arith.addf %628, %632 : vector<16x128xf32>
    %c95_i32_252 = arith.constant 95 : i32
    %634 = tpu.dynamic_rotate %549 by %c95_i32_252 dim 1 : vector<16x128xf32>, i32 -> vector<16x128xf32>
    %c17_253 = arith.constant 17 : index
    %c0_254 = arith.constant 0 : index
    %635 = vector.load %arg6[%c17_253, %c0_254] : memref<63x128xf32, #tpu.memory_space<vmem>>, vector<1x128xf32>
    %636 = vector.broadcast %635 : vector<1x128xf32> to vector<16x128xf32>
    %637 = arith.mulf %636, %634 : vector<16x128xf32>
    %638 = arith.addf %633, %637 : vector<16x128xf32>
    %c81_i32_255 = arith.constant 81 : i32
    %639 = tpu.dynamic_rotate %549 by %c81_i32_255 dim 1 : vector<16x128xf32>, i32 -> vector<16x128xf32>
    %c18_256 = arith.constant 18 : index
    %c0_257 = arith.constant 0 : index
    %640 = vector.load %arg6[%c18_256, %c0_257] : memref<63x128xf32, #tpu.memory_space<vmem>>, vector<1x128xf32>
    %641 = vector.broadcast %640 : vector<1x128xf32> to vector<16x128xf32>
    %642 = arith.mulf %641, %639 : vector<16x128xf32>
    %643 = arith.addf %638, %642 : vector<16x128xf32>
    %c80_i32_258 = arith.constant 80 : i32
    %644 = tpu.dynamic_rotate %549 by %c80_i32_258 dim 1 : vector<16x128xf32>, i32 -> vector<16x128xf32>
    %c19_259 = arith.constant 19 : index
    %c0_260 = arith.constant 0 : index
    %645 = vector.load %arg6[%c19_259, %c0_260] : memref<63x128xf32, #tpu.memory_space<vmem>>, vector<1x128xf32>
    %646 = vector.broadcast %645 : vector<1x128xf32> to vector<16x128xf32>
    %647 = arith.mulf %646, %644 : vector<16x128xf32>
    %648 = arith.addf %643, %647 : vector<16x128xf32>
    %c79_i32_261 = arith.constant 79 : i32
    %649 = tpu.dynamic_rotate %549 by %c79_i32_261 dim 1 : vector<16x128xf32>, i32 -> vector<16x128xf32>
    %c20_262 = arith.constant 20 : index
    %c0_263 = arith.constant 0 : index
    %650 = vector.load %arg6[%c20_262, %c0_263] : memref<63x128xf32, #tpu.memory_space<vmem>>, vector<1x128xf32>
    %651 = vector.broadcast %650 : vector<1x128xf32> to vector<16x128xf32>
    %652 = arith.mulf %651, %649 : vector<16x128xf32>
    %653 = arith.addf %648, %652 : vector<16x128xf32>
    %c49_i32_264 = arith.constant 49 : i32
    %654 = tpu.dynamic_rotate %540 by %c49_i32_264 dim 1 : vector<16x128xf32>, i32 -> vector<16x128xf32>
    %c21_265 = arith.constant 21 : index
    %c0_266 = arith.constant 0 : index
    %655 = vector.load %arg6[%c21_265, %c0_266] : memref<63x128xf32, #tpu.memory_space<vmem>>, vector<1x128xf32>
    %656 = vector.broadcast %655 : vector<1x128xf32> to vector<16x128xf32>
    %657 = arith.mulf %656, %654 : vector<16x128xf32>
    %658 = arith.addf %653, %657 : vector<16x128xf32>
    %c48_i32_267 = arith.constant 48 : i32
    %659 = tpu.dynamic_rotate %540 by %c48_i32_267 dim 1 : vector<16x128xf32>, i32 -> vector<16x128xf32>
    %c22_268 = arith.constant 22 : index
    %c0_269 = arith.constant 0 : index
    %660 = vector.load %arg6[%c22_268, %c0_269] : memref<63x128xf32, #tpu.memory_space<vmem>>, vector<1x128xf32>
    %661 = vector.broadcast %660 : vector<1x128xf32> to vector<16x128xf32>
    %662 = arith.mulf %661, %659 : vector<16x128xf32>
    %663 = arith.addf %658, %662 : vector<16x128xf32>
    %c47_i32_270 = arith.constant 47 : i32
    %664 = tpu.dynamic_rotate %540 by %c47_i32_270 dim 1 : vector<16x128xf32>, i32 -> vector<16x128xf32>
    %c23_271 = arith.constant 23 : index
    %c0_272 = arith.constant 0 : index
    %665 = vector.load %arg6[%c23_271, %c0_272] : memref<63x128xf32, #tpu.memory_space<vmem>>, vector<1x128xf32>
    %666 = vector.broadcast %665 : vector<1x128xf32> to vector<16x128xf32>
    %667 = arith.mulf %666, %664 : vector<16x128xf32>
    %668 = arith.addf %663, %667 : vector<16x128xf32>
    %c33_i32_273 = arith.constant 33 : i32
    %669 = tpu.dynamic_rotate %540 by %c33_i32_273 dim 1 : vector<16x128xf32>, i32 -> vector<16x128xf32>
    %c24_274 = arith.constant 24 : index
    %c0_275 = arith.constant 0 : index
    %670 = vector.load %arg6[%c24_274, %c0_275] : memref<63x128xf32, #tpu.memory_space<vmem>>, vector<1x128xf32>
    %671 = vector.broadcast %670 : vector<1x128xf32> to vector<16x128xf32>
    %672 = arith.mulf %671, %669 : vector<16x128xf32>
    %673 = arith.addf %668, %672 : vector<16x128xf32>
    %c32_i32_276 = arith.constant 32 : i32
    %674 = tpu.dynamic_rotate %540 by %c32_i32_276 dim 1 : vector<16x128xf32>, i32 -> vector<16x128xf32>
    %c25_277 = arith.constant 25 : index
    %c0_278 = arith.constant 0 : index
    %675 = vector.load %arg6[%c25_277, %c0_278] : memref<63x128xf32, #tpu.memory_space<vmem>>, vector<1x128xf32>
    %676 = vector.broadcast %675 : vector<1x128xf32> to vector<16x128xf32>
    %677 = arith.mulf %676, %674 : vector<16x128xf32>
    %678 = arith.addf %673, %677 : vector<16x128xf32>
    %c31_i32_279 = arith.constant 31 : i32
    %679 = tpu.dynamic_rotate %540 by %c31_i32_279 dim 1 : vector<16x128xf32>, i32 -> vector<16x128xf32>
    %c26_280 = arith.constant 26 : index
    %c0_281 = arith.constant 0 : index
    %680 = vector.load %arg6[%c26_280, %c0_281] : memref<63x128xf32, #tpu.memory_space<vmem>>, vector<1x128xf32>
    %681 = vector.broadcast %680 : vector<1x128xf32> to vector<16x128xf32>
    %682 = arith.mulf %681, %679 : vector<16x128xf32>
    %683 = arith.addf %678, %682 : vector<16x128xf32>
    %c17_i32_282 = arith.constant 17 : i32
    %684 = tpu.dynamic_rotate %540 by %c17_i32_282 dim 1 : vector<16x128xf32>, i32 -> vector<16x128xf32>
    %c27_283 = arith.constant 27 : index
    %c0_284 = arith.constant 0 : index
    %685 = vector.load %arg6[%c27_283, %c0_284] : memref<63x128xf32, #tpu.memory_space<vmem>>, vector<1x128xf32>
    %686 = vector.broadcast %685 : vector<1x128xf32> to vector<16x128xf32>
    %687 = arith.mulf %686, %684 : vector<16x128xf32>
    %688 = arith.addf %683, %687 : vector<16x128xf32>
    %c16_i32_285 = arith.constant 16 : i32
    %689 = tpu.dynamic_rotate %540 by %c16_i32_285 dim 1 : vector<16x128xf32>, i32 -> vector<16x128xf32>
    %c28_286 = arith.constant 28 : index
    %c0_287 = arith.constant 0 : index
    %690 = vector.load %arg6[%c28_286, %c0_287] : memref<63x128xf32, #tpu.memory_space<vmem>>, vector<1x128xf32>
    %691 = vector.broadcast %690 : vector<1x128xf32> to vector<16x128xf32>
    %692 = arith.mulf %691, %689 : vector<16x128xf32>
    %693 = arith.addf %688, %692 : vector<16x128xf32>
    %c15_i32_288 = arith.constant 15 : i32
    %694 = tpu.dynamic_rotate %540 by %c15_i32_288 dim 1 : vector<16x128xf32>, i32 -> vector<16x128xf32>
    %c29_289 = arith.constant 29 : index
    %c0_290 = arith.constant 0 : index
    %695 = vector.load %arg6[%c29_289, %c0_290] : memref<63x128xf32, #tpu.memory_space<vmem>>, vector<1x128xf32>
    %696 = vector.broadcast %695 : vector<1x128xf32> to vector<16x128xf32>
    %697 = arith.mulf %696, %694 : vector<16x128xf32>
    %698 = arith.addf %693, %697 : vector<16x128xf32>
    %c1_i32_291 = arith.constant 1 : i32
    %699 = tpu.dynamic_rotate %540 by %c1_i32_291 dim 1 : vector<16x128xf32>, i32 -> vector<16x128xf32>
    %c30_292 = arith.constant 30 : index
    %c0_293 = arith.constant 0 : index
    %700 = vector.load %arg6[%c30_292, %c0_293] : memref<63x128xf32, #tpu.memory_space<vmem>>, vector<1x128xf32>
    %701 = vector.broadcast %700 : vector<1x128xf32> to vector<16x128xf32>
    %702 = arith.mulf %701, %699 : vector<16x128xf32>
    %703 = arith.addf %698, %702 : vector<16x128xf32>
    %c31_294 = arith.constant 31 : index
    %c0_295 = arith.constant 0 : index
    %704 = vector.load %arg6[%c31_294, %c0_295] : memref<63x128xf32, #tpu.memory_space<vmem>>, vector<1x128xf32>
    %705 = vector.broadcast %704 : vector<1x128xf32> to vector<16x128xf32>
    %706 = arith.mulf %705, %540 : vector<16x128xf32>
    %707 = arith.addf %703, %706 : vector<16x128xf32>
    %c127_i32_296 = arith.constant 127 : i32
    %708 = tpu.dynamic_rotate %540 by %c127_i32_296 dim 1 : vector<16x128xf32>, i32 -> vector<16x128xf32>
    %c32_297 = arith.constant 32 : index
    %c0_298 = arith.constant 0 : index
    %709 = vector.load %arg6[%c32_297, %c0_298] : memref<63x128xf32, #tpu.memory_space<vmem>>, vector<1x128xf32>
    %710 = vector.broadcast %709 : vector<1x128xf32> to vector<16x128xf32>
    %711 = arith.mulf %710, %708 : vector<16x128xf32>
    %712 = arith.addf %707, %711 : vector<16x128xf32>
    %c113_i32_299 = arith.constant 113 : i32
    %713 = tpu.dynamic_rotate %540 by %c113_i32_299 dim 1 : vector<16x128xf32>, i32 -> vector<16x128xf32>
    %c33_300 = arith.constant 33 : index
    %c0_301 = arith.constant 0 : index
    %714 = vector.load %arg6[%c33_300, %c0_301] : memref<63x128xf32, #tpu.memory_space<vmem>>, vector<1x128xf32>
    %715 = vector.broadcast %714 : vector<1x128xf32> to vector<16x128xf32>
    %716 = arith.mulf %715, %713 : vector<16x128xf32>
    %717 = arith.addf %712, %716 : vector<16x128xf32>
    %c112_i32_302 = arith.constant 112 : i32
    %718 = tpu.dynamic_rotate %540 by %c112_i32_302 dim 1 : vector<16x128xf32>, i32 -> vector<16x128xf32>
    %c34_303 = arith.constant 34 : index
    %c0_304 = arith.constant 0 : index
    %719 = vector.load %arg6[%c34_303, %c0_304] : memref<63x128xf32, #tpu.memory_space<vmem>>, vector<1x128xf32>
    %720 = vector.broadcast %719 : vector<1x128xf32> to vector<16x128xf32>
    %721 = arith.mulf %720, %718 : vector<16x128xf32>
    %722 = arith.addf %717, %721 : vector<16x128xf32>
    %c111_i32_305 = arith.constant 111 : i32
    %723 = tpu.dynamic_rotate %540 by %c111_i32_305 dim 1 : vector<16x128xf32>, i32 -> vector<16x128xf32>
    %c35_306 = arith.constant 35 : index
    %c0_307 = arith.constant 0 : index
    %724 = vector.load %arg6[%c35_306, %c0_307] : memref<63x128xf32, #tpu.memory_space<vmem>>, vector<1x128xf32>
    %725 = vector.broadcast %724 : vector<1x128xf32> to vector<16x128xf32>
    %726 = arith.mulf %725, %723 : vector<16x128xf32>
    %727 = arith.addf %722, %726 : vector<16x128xf32>
    %c97_i32_308 = arith.constant 97 : i32
    %728 = tpu.dynamic_rotate %540 by %c97_i32_308 dim 1 : vector<16x128xf32>, i32 -> vector<16x128xf32>
    %c36_309 = arith.constant 36 : index
    %c0_310 = arith.constant 0 : index
    %729 = vector.load %arg6[%c36_309, %c0_310] : memref<63x128xf32, #tpu.memory_space<vmem>>, vector<1x128xf32>
    %730 = vector.broadcast %729 : vector<1x128xf32> to vector<16x128xf32>
    %731 = arith.mulf %730, %728 : vector<16x128xf32>
    %732 = arith.addf %727, %731 : vector<16x128xf32>
    %c96_i32_311 = arith.constant 96 : i32
    %733 = tpu.dynamic_rotate %540 by %c96_i32_311 dim 1 : vector<16x128xf32>, i32 -> vector<16x128xf32>
    %c37_312 = arith.constant 37 : index
    %c0_313 = arith.constant 0 : index
    %734 = vector.load %arg6[%c37_312, %c0_313] : memref<63x128xf32, #tpu.memory_space<vmem>>, vector<1x128xf32>
    %735 = vector.broadcast %734 : vector<1x128xf32> to vector<16x128xf32>
    %736 = arith.mulf %735, %733 : vector<16x128xf32>
    %737 = arith.addf %732, %736 : vector<16x128xf32>
    %c95_i32_314 = arith.constant 95 : i32
    %738 = tpu.dynamic_rotate %540 by %c95_i32_314 dim 1 : vector<16x128xf32>, i32 -> vector<16x128xf32>
    %c38_315 = arith.constant 38 : index
    %c0_316 = arith.constant 0 : index
    %739 = vector.load %arg6[%c38_315, %c0_316] : memref<63x128xf32, #tpu.memory_space<vmem>>, vector<1x128xf32>
    %740 = vector.broadcast %739 : vector<1x128xf32> to vector<16x128xf32>
    %741 = arith.mulf %740, %738 : vector<16x128xf32>
    %742 = arith.addf %737, %741 : vector<16x128xf32>
    %c81_i32_317 = arith.constant 81 : i32
    %743 = tpu.dynamic_rotate %540 by %c81_i32_317 dim 1 : vector<16x128xf32>, i32 -> vector<16x128xf32>
    %c39_318 = arith.constant 39 : index
    %c0_319 = arith.constant 0 : index
    %744 = vector.load %arg6[%c39_318, %c0_319] : memref<63x128xf32, #tpu.memory_space<vmem>>, vector<1x128xf32>
    %745 = vector.broadcast %744 : vector<1x128xf32> to vector<16x128xf32>
    %746 = arith.mulf %745, %743 : vector<16x128xf32>
    %747 = arith.addf %742, %746 : vector<16x128xf32>
    %c80_i32_320 = arith.constant 80 : i32
    %748 = tpu.dynamic_rotate %540 by %c80_i32_320 dim 1 : vector<16x128xf32>, i32 -> vector<16x128xf32>
    %c40_321 = arith.constant 40 : index
    %c0_322 = arith.constant 0 : index
    %749 = vector.load %arg6[%c40_321, %c0_322] : memref<63x128xf32, #tpu.memory_space<vmem>>, vector<1x128xf32>
    %750 = vector.broadcast %749 : vector<1x128xf32> to vector<16x128xf32>
    %751 = arith.mulf %750, %748 : vector<16x128xf32>
    %752 = arith.addf %747, %751 : vector<16x128xf32>
    %c79_i32_323 = arith.constant 79 : i32
    %753 = tpu.dynamic_rotate %540 by %c79_i32_323 dim 1 : vector<16x128xf32>, i32 -> vector<16x128xf32>
    %c41_324 = arith.constant 41 : index
    %c0_325 = arith.constant 0 : index
    %754 = vector.load %arg6[%c41_324, %c0_325] : memref<63x128xf32, #tpu.memory_space<vmem>>, vector<1x128xf32>
    %755 = vector.broadcast %754 : vector<1x128xf32> to vector<16x128xf32>
    %756 = arith.mulf %755, %753 : vector<16x128xf32>
    %757 = arith.addf %752, %756 : vector<16x128xf32>
    %c15_i32_326 = arith.constant 15 : i32
    %758 = tpu.dynamic_rotate %540 by %c15_i32_326 dim 0 : vector<16x128xf32>, i32 -> vector<16x128xf32>
    %cst_327 = arith.constant 0.000000e+00 : f32
    %759 = vector.shape_cast %36 : vector<16x1xi1> to vector<16x1xi1>
    %760 = vector.broadcast %759 : vector<16x1xi1> to vector<16x128xi1>
    %761 = vector.broadcast %cst_327 : f32 to vector<16x128xf32>
    %762 = arith.select %760, %758, %761 : vector<16x128xi1>, vector<16x128xf32>
    %c49_i32_328 = arith.constant 49 : i32
    %763 = tpu.dynamic_rotate %762 by %c49_i32_328 dim 1 : vector<16x128xf32>, i32 -> vector<16x128xf32>
    %c42_329 = arith.constant 42 : index
    %c0_330 = arith.constant 0 : index
    %764 = vector.load %arg6[%c42_329, %c0_330] : memref<63x128xf32, #tpu.memory_space<vmem>>, vector<1x128xf32>
    %765 = vector.broadcast %764 : vector<1x128xf32> to vector<16x128xf32>
    %766 = arith.mulf %765, %763 : vector<16x128xf32>
    %767 = arith.addf %757, %766 : vector<16x128xf32>
    %c48_i32_331 = arith.constant 48 : i32
    %768 = tpu.dynamic_rotate %762 by %c48_i32_331 dim 1 : vector<16x128xf32>, i32 -> vector<16x128xf32>
    %c43_332 = arith.constant 43 : index
    %c0_333 = arith.constant 0 : index
    %769 = vector.load %arg6[%c43_332, %c0_333] : memref<63x128xf32, #tpu.memory_space<vmem>>, vector<1x128xf32>
    %770 = vector.broadcast %769 : vector<1x128xf32> to vector<16x128xf32>
    %771 = arith.mulf %770, %768 : vector<16x128xf32>
    %772 = arith.addf %767, %771 : vector<16x128xf32>
    %c47_i32_334 = arith.constant 47 : i32
    %773 = tpu.dynamic_rotate %762 by %c47_i32_334 dim 1 : vector<16x128xf32>, i32 -> vector<16x128xf32>
    %c44_335 = arith.constant 44 : index
    %c0_336 = arith.constant 0 : index
    %774 = vector.load %arg6[%c44_335, %c0_336] : memref<63x128xf32, #tpu.memory_space<vmem>>, vector<1x128xf32>
    %775 = vector.broadcast %774 : vector<1x128xf32> to vector<16x128xf32>
    %776 = arith.mulf %775, %773 : vector<16x128xf32>
    %777 = arith.addf %772, %776 : vector<16x128xf32>
    %c33_i32_337 = arith.constant 33 : i32
    %778 = tpu.dynamic_rotate %762 by %c33_i32_337 dim 1 : vector<16x128xf32>, i32 -> vector<16x128xf32>
    %c45_338 = arith.constant 45 : index
    %c0_339 = arith.constant 0 : index
    %779 = vector.load %arg6[%c45_338, %c0_339] : memref<63x128xf32, #tpu.memory_space<vmem>>, vector<1x128xf32>
    %780 = vector.broadcast %779 : vector<1x128xf32> to vector<16x128xf32>
    %781 = arith.mulf %780, %778 : vector<16x128xf32>
    %782 = arith.addf %777, %781 : vector<16x128xf32>
    %c32_i32_340 = arith.constant 32 : i32
    %783 = tpu.dynamic_rotate %762 by %c32_i32_340 dim 1 : vector<16x128xf32>, i32 -> vector<16x128xf32>
    %c46_341 = arith.constant 46 : index
    %c0_342 = arith.constant 0 : index
    %784 = vector.load %arg6[%c46_341, %c0_342] : memref<63x128xf32, #tpu.memory_space<vmem>>, vector<1x128xf32>
    %785 = vector.broadcast %784 : vector<1x128xf32> to vector<16x128xf32>
    %786 = arith.mulf %785, %783 : vector<16x128xf32>
    %787 = arith.addf %782, %786 : vector<16x128xf32>
    %c31_i32_343 = arith.constant 31 : i32
    %788 = tpu.dynamic_rotate %762 by %c31_i32_343 dim 1 : vector<16x128xf32>, i32 -> vector<16x128xf32>
    %c47_344 = arith.constant 47 : index
    %c0_345 = arith.constant 0 : index
    %789 = vector.load %arg6[%c47_344, %c0_345] : memref<63x128xf32, #tpu.memory_space<vmem>>, vector<1x128xf32>
    %790 = vector.broadcast %789 : vector<1x128xf32> to vector<16x128xf32>
    %791 = arith.mulf %790, %788 : vector<16x128xf32>
    %792 = arith.addf %787, %791 : vector<16x128xf32>
    %c17_i32_346 = arith.constant 17 : i32
    %793 = tpu.dynamic_rotate %762 by %c17_i32_346 dim 1 : vector<16x128xf32>, i32 -> vector<16x128xf32>
    %c48_347 = arith.constant 48 : index
    %c0_348 = arith.constant 0 : index
    %794 = vector.load %arg6[%c48_347, %c0_348] : memref<63x128xf32, #tpu.memory_space<vmem>>, vector<1x128xf32>
    %795 = vector.broadcast %794 : vector<1x128xf32> to vector<16x128xf32>
    %796 = arith.mulf %795, %793 : vector<16x128xf32>
    %797 = arith.addf %792, %796 : vector<16x128xf32>
    %c16_i32_349 = arith.constant 16 : i32
    %798 = tpu.dynamic_rotate %762 by %c16_i32_349 dim 1 : vector<16x128xf32>, i32 -> vector<16x128xf32>
    %c49_350 = arith.constant 49 : index
    %c0_351 = arith.constant 0 : index
    %799 = vector.load %arg6[%c49_350, %c0_351] : memref<63x128xf32, #tpu.memory_space<vmem>>, vector<1x128xf32>
    %800 = vector.broadcast %799 : vector<1x128xf32> to vector<16x128xf32>
    %801 = arith.mulf %800, %798 : vector<16x128xf32>
    %802 = arith.addf %797, %801 : vector<16x128xf32>
    %c15_i32_352 = arith.constant 15 : i32
    %803 = tpu.dynamic_rotate %762 by %c15_i32_352 dim 1 : vector<16x128xf32>, i32 -> vector<16x128xf32>
    %c50_353 = arith.constant 50 : index
    %c0_354 = arith.constant 0 : index
    %804 = vector.load %arg6[%c50_353, %c0_354] : memref<63x128xf32, #tpu.memory_space<vmem>>, vector<1x128xf32>
    %805 = vector.broadcast %804 : vector<1x128xf32> to vector<16x128xf32>
    %806 = arith.mulf %805, %803 : vector<16x128xf32>
    %807 = arith.addf %802, %806 : vector<16x128xf32>
    %c1_i32_355 = arith.constant 1 : i32
    %808 = tpu.dynamic_rotate %762 by %c1_i32_355 dim 1 : vector<16x128xf32>, i32 -> vector<16x128xf32>
    %c51_356 = arith.constant 51 : index
    %c0_357 = arith.constant 0 : index
    %809 = vector.load %arg6[%c51_356, %c0_357] : memref<63x128xf32, #tpu.memory_space<vmem>>, vector<1x128xf32>
    %810 = vector.broadcast %809 : vector<1x128xf32> to vector<16x128xf32>
    %811 = arith.mulf %810, %808 : vector<16x128xf32>
    %812 = arith.addf %807, %811 : vector<16x128xf32>
    %c52_358 = arith.constant 52 : index
    %c0_359 = arith.constant 0 : index
    %813 = vector.load %arg6[%c52_358, %c0_359] : memref<63x128xf32, #tpu.memory_space<vmem>>, vector<1x128xf32>
    %814 = vector.broadcast %813 : vector<1x128xf32> to vector<16x128xf32>
    %815 = arith.mulf %814, %762 : vector<16x128xf32>
    %816 = arith.addf %812, %815 : vector<16x128xf32>
    %c127_i32_360 = arith.constant 127 : i32
    %817 = tpu.dynamic_rotate %762 by %c127_i32_360 dim 1 : vector<16x128xf32>, i32 -> vector<16x128xf32>
    %c53_361 = arith.constant 53 : index
    %c0_362 = arith.constant 0 : index
    %818 = vector.load %arg6[%c53_361, %c0_362] : memref<63x128xf32, #tpu.memory_space<vmem>>, vector<1x128xf32>
    %819 = vector.broadcast %818 : vector<1x128xf32> to vector<16x128xf32>
    %820 = arith.mulf %819, %817 : vector<16x128xf32>
    %821 = arith.addf %816, %820 : vector<16x128xf32>
    %c113_i32_363 = arith.constant 113 : i32
    %822 = tpu.dynamic_rotate %762 by %c113_i32_363 dim 1 : vector<16x128xf32>, i32 -> vector<16x128xf32>
    %c54_364 = arith.constant 54 : index
    %c0_365 = arith.constant 0 : index
    %823 = vector.load %arg6[%c54_364, %c0_365] : memref<63x128xf32, #tpu.memory_space<vmem>>, vector<1x128xf32>
    %824 = vector.broadcast %823 : vector<1x128xf32> to vector<16x128xf32>
    %825 = arith.mulf %824, %822 : vector<16x128xf32>
    %826 = arith.addf %821, %825 : vector<16x128xf32>
    %c112_i32_366 = arith.constant 112 : i32
    %827 = tpu.dynamic_rotate %762 by %c112_i32_366 dim 1 : vector<16x128xf32>, i32 -> vector<16x128xf32>
    %c55_367 = arith.constant 55 : index
    %c0_368 = arith.constant 0 : index
    %828 = vector.load %arg6[%c55_367, %c0_368] : memref<63x128xf32, #tpu.memory_space<vmem>>, vector<1x128xf32>
    %829 = vector.broadcast %828 : vector<1x128xf32> to vector<16x128xf32>
    %830 = arith.mulf %829, %827 : vector<16x128xf32>
    %831 = arith.addf %826, %830 : vector<16x128xf32>
    %c111_i32_369 = arith.constant 111 : i32
    %832 = tpu.dynamic_rotate %762 by %c111_i32_369 dim 1 : vector<16x128xf32>, i32 -> vector<16x128xf32>
    %c56_370 = arith.constant 56 : index
    %c0_371 = arith.constant 0 : index
    %833 = vector.load %arg6[%c56_370, %c0_371] : memref<63x128xf32, #tpu.memory_space<vmem>>, vector<1x128xf32>
    %834 = vector.broadcast %833 : vector<1x128xf32> to vector<16x128xf32>
    %835 = arith.mulf %834, %832 : vector<16x128xf32>
    %836 = arith.addf %831, %835 : vector<16x128xf32>
    %c97_i32_372 = arith.constant 97 : i32
    %837 = tpu.dynamic_rotate %762 by %c97_i32_372 dim 1 : vector<16x128xf32>, i32 -> vector<16x128xf32>
    %c57_373 = arith.constant 57 : index
    %c0_374 = arith.constant 0 : index
    %838 = vector.load %arg6[%c57_373, %c0_374] : memref<63x128xf32, #tpu.memory_space<vmem>>, vector<1x128xf32>
    %839 = vector.broadcast %838 : vector<1x128xf32> to vector<16x128xf32>
    %840 = arith.mulf %839, %837 : vector<16x128xf32>
    %841 = arith.addf %836, %840 : vector<16x128xf32>
    %c96_i32_375 = arith.constant 96 : i32
    %842 = tpu.dynamic_rotate %762 by %c96_i32_375 dim 1 : vector<16x128xf32>, i32 -> vector<16x128xf32>
    %c58_376 = arith.constant 58 : index
    %c0_377 = arith.constant 0 : index
    %843 = vector.load %arg6[%c58_376, %c0_377] : memref<63x128xf32, #tpu.memory_space<vmem>>, vector<1x128xf32>
    %844 = vector.broadcast %843 : vector<1x128xf32> to vector<16x128xf32>
    %845 = arith.mulf %844, %842 : vector<16x128xf32>
    %846 = arith.addf %841, %845 : vector<16x128xf32>
    %c95_i32_378 = arith.constant 95 : i32
    %847 = tpu.dynamic_rotate %762 by %c95_i32_378 dim 1 : vector<16x128xf32>, i32 -> vector<16x128xf32>
    %c59_379 = arith.constant 59 : index
    %c0_380 = arith.constant 0 : index
    %848 = vector.load %arg6[%c59_379, %c0_380] : memref<63x128xf32, #tpu.memory_space<vmem>>, vector<1x128xf32>
    %849 = vector.broadcast %848 : vector<1x128xf32> to vector<16x128xf32>
    %850 = arith.mulf %849, %847 : vector<16x128xf32>
    %851 = arith.addf %846, %850 : vector<16x128xf32>
    %c81_i32_381 = arith.constant 81 : i32
    %852 = tpu.dynamic_rotate %762 by %c81_i32_381 dim 1 : vector<16x128xf32>, i32 -> vector<16x128xf32>
    %c60_382 = arith.constant 60 : index
    %c0_383 = arith.constant 0 : index
    %853 = vector.load %arg6[%c60_382, %c0_383] : memref<63x128xf32, #tpu.memory_space<vmem>>, vector<1x128xf32>
    %854 = vector.broadcast %853 : vector<1x128xf32> to vector<16x128xf32>
    %855 = arith.mulf %854, %852 : vector<16x128xf32>
    %856 = arith.addf %851, %855 : vector<16x128xf32>
    %c80_i32_384 = arith.constant 80 : i32
    %857 = tpu.dynamic_rotate %762 by %c80_i32_384 dim 1 : vector<16x128xf32>, i32 -> vector<16x128xf32>
    %c61_385 = arith.constant 61 : index
    %c0_386 = arith.constant 0 : index
    %858 = vector.load %arg6[%c61_385, %c0_386] : memref<63x128xf32, #tpu.memory_space<vmem>>, vector<1x128xf32>
    %859 = vector.broadcast %858 : vector<1x128xf32> to vector<16x128xf32>
    %860 = arith.mulf %859, %857 : vector<16x128xf32>
    %861 = arith.addf %856, %860 : vector<16x128xf32>
    %c79_i32_387 = arith.constant 79 : i32
    %862 = tpu.dynamic_rotate %762 by %c79_i32_387 dim 1 : vector<16x128xf32>, i32 -> vector<16x128xf32>
    %c62_388 = arith.constant 62 : index
    %c0_389 = arith.constant 0 : index
    %863 = vector.load %arg6[%c62_388, %c0_389] : memref<63x128xf32, #tpu.memory_space<vmem>>, vector<1x128xf32>
    %864 = vector.broadcast %863 : vector<1x128xf32> to vector<16x128xf32>
    %865 = arith.mulf %864, %862 : vector<16x128xf32>
    %866 = arith.addf %861, %865 : vector<16x128xf32>
    %867 = arith.addf %0, %866 : vector<16x128xf32>
    %c0_390 = arith.constant 0 : index
    %c0_391 = arith.constant 0 : index
    %868 = vector.load %arg10[%c0_390, %c0_391] : memref<16x128xf32, #tpu.memory_space<vmem>>, vector<16x128xf32>
    tpu.vector_store %arg10[%c0_390, %c0_391], %867 {strides = array<i32>} : memref<16x128xf32, #tpu.memory_space<vmem>>, vector<16x128xf32>,
    return
  }
  func.func @transform_0(%arg0: i32) -> (i32, i32) {
    %c0_i32 = arith.constant 0 : i32
    %c0_i32_0 = arith.constant 0 : i32
    %c0_i32_1 = arith.constant 0 : i32
    return %c0_i32, %c0_i32_0 : i32, i32
  }
  func.func @transform_1(%arg0: i32) -> (i32, i32) {
    %c0_i32 = arith.constant 0 : i32
    %c0_i32_0 = arith.constant 0 : i32
    %c0_i32_1 = arith.constant 0 : i32
    return %c0_i32, %c0_i32_0 : i32, i32
  }
  func.func @transform_2(%arg0: i32) -> (i32, i32) {
    %c0_i32 = arith.constant 0 : i32
    %c0_i32_0 = arith.constant 0 : i32
    %c0_i32_1 = arith.constant 0 : i32
    return %c0_i32, %c0_i32_0 : i32, i32
  }
  func.func @transform_3(%arg0: i32) -> (i32, i32) {
    %c0_i32 = arith.constant 0 : i32
    %c0_i32_0 = arith.constant 0 : i32
    %c0_i32_1 = arith.constant 0 : i32
    return %c0_i32, %c0_i32_0 : i32, i32
  }
  func.func @transform_4(%arg0: i32) -> (i32, i32) {
    %c0_i32 = arith.constant 0 : i32
    %c0_i32_0 = arith.constant 0 : i32
    %c0_i32_1 = arith.constant 0 : i32
    return %c0_i32, %c0_i32_0 : i32, i32
  }
  func.func @transform_5(%arg0: i32) -> (i32, i32) {
    %c0_i32 = arith.constant 0 : i32
    %c0_i32_0 = arith.constant 0 : i32
    %c0_i32_1 = arith.constant 0 : i32
    return %c0_i32, %c0_i32_0 : i32, i32
  }
  func.func @transform_6(%arg0: i32) -> (i32, i32) {
    %c0_i32 = arith.constant 0 : i32
    %c0_i32_0 = arith.constant 0 : i32
    %c0_i32_1 = arith.constant 0 : i32
    return %c0_i32, %c0_i32_0 : i32, i32
  }
  func.func @transform_7(%arg0: i32) -> (i32, i32) {
    %c0_i32 = arith.constant 0 : i32
    %c0_i32_0 = arith.constant 0 : i32
    %c0_i32_1 = arith.constant 0 : i32
    return %c0_i32, %c0_i32_0 : i32, i32
  }
  func.func @transform_8(%arg0: i32) -> (i32, i32) {
    %c0_i32 = arith.constant 0 : i32
    %c0_i32_0 = arith.constant 0 : i32
    %c0_i32_1 = arith.constant 0 : i32
    return %c0_i32, %c0_i32_0 : i32, i32
  }
  func.func @transform_9(%arg0: i32) -> (i32, i32) {
    %c0_i32 = arith.constant 0 : i32
    %c0_i32_0 = arith.constant 0 : i32
    %c0_i32_1 = arith.constant 0 : i32
    return %c0_i32, %c0_i32_0 : i32, i32
  }
}

</mosaic_0001>

<bundles_post_ra>
// kernel: tpu_custom_call.1
= control target key start
LH: loop header
LB: loop body
LE: loop exit
PB: predicated region body
PF: predicated region fallthrough
CT: control target
= control target key end

     0   :  { %14 = vsyncpa [#allocation3], 0  ;;  %s3686_s0 = inlined_call_operand.hbm [shape: f32[16,128], index: 0, kind: input, shape index: {}]   ;;  %s3687_s1 = inlined_call_operand.hbm [shape: f32[63,128], index: 1, kind: input, shape index: {}]   ;;  %s3688_s2 = inlined_call_operand.vmem [shape: f32[1,128], index: 2, kind: input, shape index: {}]   ;;  %s3689_s3 = inlined_call_operand.vmem [shape: f32[1,128], index: 3, kind: input, shape index: {}]   ;;  %s3690_s4 = inlined_call_operand.vmem [shape: f32[1,128], index: 4, kind: input, shape index: {}]   ;;  %s3691_s5 = inlined_call_operand.hbm [shape: f32[63,128], index: 5, kind: input, shape index: {}]   ;;  %s3692_s6 = inlined_call_operand.vmem [shape: f32[1,128], index: 6, kind: input, shape index: {}]   ;;  %s3693_s7 = inlined_call_operand.vmem [shape: f32[1,128], index: 7, kind: input, shape index: {}]   ;;  %s3694_s8 = inlined_call_operand.vmem [shape: f32[1,128], index: 8, kind: input, shape index: {}]   ;;  %s3695_s9 = inlined_call_operand.hbm [shape: f32[16,128], index: 9, kind: output, shape index: {}]  }
   0x1   :  { %15 = vsyncpa [#allocation6], 0 }
   0x2   :  { %16 = vsyncpa [#allocation4], 0  ;;  %s2439_s30 = smov [#allocation5]   ;;  %s2440_s11 = smov [#allocation2]  }
   0x3   :  { %s34_s10 = sshll.u32 %s2439_s30, 4  ;;  %s22_s12 = sshll.u32 %s2440_s11, 4  ;;  %s35_s10 = int_to_ptr.vmem [resolvable:$true] %s34_s10  ;;  %s2521_s12 = int_to_ptr.vmem [resolvable:$true] %s22_s12 }
   0x4   :  { %s2345_s15 = scalar_lea.hbm %s3687_s1, 1024 }
   0x5   :  { %p2346_p0 = scmp.ne.s32.totalorder %s3687_s1, %s2345_s15  ;;  %p2349_p1 = scmp.lt.u32.totalorder %s2345_s15, %s3687_s1 }
   0x7   :  { %p2351_p2 = pnand %p2349_p1, %p2346_p0 }
   0x9   :  { %2354 = shalt.err (!%p2351_p2)
}
   0xa   :  { %s2355_s20 = scalar_lea.vmem %s35_s10, 1024  ;;  %p2360_p4 = scmp.lt.s32.totalorder %s35_s10, %s35_s10 }
   0xb   :  { %p2356_p3 = scmp.ne.s32.totalorder %s35_s10, %s2355_s20  ;;  %p2361_p5 = scmp.lt.s32.totalorder %s2355_s20, %s2355_s20 }
   0xd   :  { %p2362_p6 = por %p2361_p5, %p2360_p4 }
   0xf   :  { %p2363_p7 = pnand %p2362_p6, %p2356_p3 }
  0x11   :  { %2366 = shalt.err (!%p2363_p7)
}
  0x12   :  { %s3696_s21 = smov 128   ;;  %s2442_s22 = smov 8  }
  0x13   :  { %40 = dma.hbm_to_vmem [thread:$0]  %s3687_s1, 1024, %s35_s10, [#allocation6], %s3696_s21, %s3696_s21, %s2442_s22  }
  0x14   :  { %s2367_s27 = scalar_lea.hbm %s3686_s0, 256 }
  0x15   :  { %p2368_p8 = scmp.ne.s32.totalorder %s3686_s0, %s2367_s27  ;;  %p2371_p9 = scmp.lt.u32.totalorder %s2367_s27, %s3686_s0 }
  0x17   :  { %p2373_p10 = pnand %p2371_p9, %p2368_p8 }
  0x19   :  { %2376 = shalt.err (!%p2373_p10)
}
  0x1a   :  { %s2377_s13 = scalar_lea.vmem %s2521_s12, 256  ;;  %p2382_p12 = scmp.lt.s32.totalorder %s2521_s12, %s2521_s12 }
  0x1b   :  { %p2378_p11 = scmp.ne.s32.totalorder %s2521_s12, %s2377_s13  ;;  %p2383_p13 = scmp.lt.s32.totalorder %s2377_s13, %s2377_s13 }
  0x1d   :  { %p2384_p0 = por %p2383_p13, %p2382_p12 }
  0x1f   :  { %p2385_p1 = pnand %p2384_p0, %p2378_p11 }
  0x21   :  { %2388 = shalt.err (!%p2385_p1)
}
  0x22   :  { %28 = dma.hbm_to_vmem [thread:$0]  %s3686_s0, 256, %s2521_s12, [#allocation3], %s3696_s21, %s3696_s21, %s2442_s22  }
  0x23   :  { %s2443_s14 = smov [#allocation7]   ;;  %s2389_s18 = scalar_lea.hbm %s3691_s5, 1024 }
  0x24   :  { %s52_s15 = sshll.u32 %s2443_s14, 4  ;;  %p2390_p2 = scmp.ne.s32.totalorder %s3691_s5, %s2389_s18  ;;  %s53_s15 = int_to_ptr.vmem [resolvable:$true] %s52_s15 }
  0x25   :  { %p2393_p3 = scmp.lt.u32.totalorder %s2389_s18, %s3691_s5 }
  0x27   :  { %p2395_p4 = pnand %p2393_p3, %p2390_p2 }
  0x29   :  { %2398 = shalt.err (!%p2395_p4)
}
  0x2a   :  { %s2399_s25 = scalar_lea.vmem %s53_s15, 1024  ;;  %p2404_p6 = scmp.lt.s32.totalorder %s53_s15, %s53_s15 }
  0x2b   :  { %p2400_p5 = scmp.ne.s32.totalorder %s53_s15, %s2399_s25  ;;  %p2405_p7 = scmp.lt.s32.totalorder %s2399_s25, %s2399_s25 }
  0x2d   :  { %p2406_p8 = por %p2405_p7, %p2404_p6 }
  0x2f   :  { %p2407_p9 = pnand %p2406_p8, %p2400_p5 }
  0x31   :  { %2410 = shalt.err (!%p2407_p9)
}
  0x32   :  { %58 = dma.hbm_to_vmem [thread:$0]  %s3691_s5, 1024, %s53_s15, [#allocation6], %s3696_s21, %s3696_s21, %s2442_s22  }
  0x33   :  { %2433 = dma.done.wait [#allocation3], 256  }
  0x34   :  { %2434 = vsyncadd [#allocation3], 4294967040 }
  0x35   :  { %2435 = dma.done.wait [#allocation6], 2048  }
  0x36   :  { %2436 = vsyncadd [#allocation6], 4294965248  ;;  %v2573_v0 = vld [vmem:[#allocation2] sm:$0xff]  ;;  %s2444_s26 = smov 1   ;;  %s2445_s27 = smov 127   ;;  %v2579_v1 = vld [vmem:[#allocation2 + $0x8] sm:$0xff]  ;;  %v76_v2 = vlaneseq }
  0x37   :  { %109 = vrot.lane.b32.xlu1 %v2573_v0, %s2444_s26  ;;  %105 = vrot.lane.b32.xlu0 %v2573_v0, %s2445_s27  ;;  %v3717_v5 = vmov 0  ;;  %s2446_s5 = smov 126   ;;  %s2447_s28 = smov 2   ;;  %v3720_v16 = vmov 0  ;;  %v3723_v26 = vmov 0  ;;  %v3726_v36 = vmov 0 }
  0x38   :  { %v77_v3 = vand.u32 127, %v76_v2  ;;  %s2448_s29 = smov 124   ;;  %s2449_s30 = smov 4  }
  0x39   :  { %s2450_s11 = smov 120   ;;  %s2454_s15 = smov 47  }
  0x3a   :  { %v78_v4 = vand.u32 1, %v77_v3  ;;  %v80_v14 = vand.u32 2, %v77_v3  ;;  %v82_v24 = vand.u32 4, %v77_v3  ;;  %v84_v34 = vand.u32 8, %v77_v3  ;;  %s2455_s16 = smov 33   ;;  %s2456_s17 = smov 32  }
  0x3b   :  { %111 = vrot.lane.b32.xlu1 %v2579_v1, %s2444_s26  ;;  %107 = vrot.lane.b32.xlu0 %v2579_v1, %s2445_s27  ;;  %s2457_s18 = smov 31   ;;  %s2458_s19 = smov 17  }
  0x3c   :  { %vm2586_vm0 = vcmp.eq.s32.totalorder %v78_v4, 0  ;;  %vm2600_vm1 = vcmp.eq.s32.totalorder %v80_v14, 0  ;;  %vm2612_vm2 = vcmp.eq.s32.totalorder %v82_v24, 0  ;;  %vm2624_vm3 = vcmp.eq.s32.totalorder %v84_v34, 0  ;;  %s2459_s20 = smov 16   ;;  %s2460_s23 = smov 15  }
  0x3d   :  { %v3718_v5 = vsel %vm2586_vm0, 4294967295, %v3717_v5  ;;  %v3721_v16 = vsel %vm2600_vm1, 4294967295, %v3720_v16  ;;  %v3724_v26 = vsel %vm2612_vm2, 4294967295, %v3723_v26  ;;  %v3727_v36 = vsel %vm2624_vm3, 4294967295, %v3726_v36  ;;  %s3709_s24 = smov 113   ;;  %s3707_s25 = smov 112  }
  0x3e   :  { %3719 = vst [vmem:[#allocation12_spill] sm:$0xff] %v3718_v5  ;;  %3722 = vst [vmem:[#allocation13_spill] sm:$0xff] %v3721_v16  ;;  %s2463_s0 = smov 111   ;;  %s2464_s12 = smov 97   ;;  %v2157_v16 = vld [vmem:[%s3688_s2] ss:$0 sm:$0xff] }
  0x3f   :  { %3725 = vst [vmem:[#allocation14_spill] sm:$0xff] %v3724_v26  ;;  %3728 = vst [vmem:[#allocation15_spill] sm:$0xff] %v3727_v36  ;;  %s2465_s13 = smov 96   ;;  %s2466_s1 = smov 95   ;;  %v2159_v36 = vld [vmem:[#allocation5 + $0x1] ss:$0 sm:$0xff] }
  0x40   :  { %s2467_s10 = smov 81   ;;  %s2468_s14 = smov 80   ;;  %v2160_v5 = vld [vmem:[#allocation5 + $0x2] ss:$0 sm:$0xff] }
  0x41   :  { %s2469_s21 = smov 79  }
  0xa9   :  { %v110_v6 = vpop.permute.xlu1 %109  ;;  %v106_v7 = vpop.permute.xlu0 %105 }
  0xaa   :  { %v113_v8 = vsel %vm2586_vm0, %v106_v7, %v110_v6 }
  0xab   :  { %v115_v9 = vadd.f32 %v113_v8, %v2573_v0 }
  0xad   :  { %v112_v10 = vpop.permute.xlu1 %111  ;;  %117 = vrot.lane.b32.xlu0 %v115_v9, %s2446_s5  ;;  %v108_v11 = vpop.permute.xlu0 %107 }
  0xae   :  { %v114_v12 = vsel %vm2586_vm0, %v108_v11, %v112_v10 }
  0xaf   :  { %v116_v13 = vadd.f32 %v114_v12, %v2579_v1 }
  0xb1   :  { %121 = vrot.lane.b32.xlu0 %v115_v9, %s2447_s28  ;;  %119 = vrot.lane.b32.xlu1 %v116_v13, %s2446_s5 }
  0xb5   :  { %123 = vrot.lane.b32.xlu1 %v116_v13, %s2447_s28 }
 0x11f   :  { %v118_v15 = vpop.permute.xlu0 %117 }
 0x123   :  { %v120_v17 = vpop.permute.xlu1 %119  ;;  %v122_v18 = vpop.permute.xlu0 %121 }
 0x124   :  { %v125_v19 = vsel %vm2600_vm1, %v118_v15, %v122_v18 }
 0x125   :  { %v127_v20 = vadd.f32 %v125_v19, %v115_v9 }
 0x127   :  { %v124_v21 = vpop.permute.xlu1 %123  ;;  %129 = vrot.lane.b32.xlu0 %v127_v20, %s2448_s29 }
 0x128   :  { %v126_v22 = vsel %vm2600_vm1, %v120_v17, %v124_v21 }
 0x129   :  { %v128_v23 = vadd.f32 %v126_v22, %v116_v13 }
 0x12b   :  { %131 = vrot.lane.b32.xlu1 %v128_v23, %s2448_s29  ;;  %133 = vrot.lane.b32.xlu0 %v127_v20, %s2449_s30 }
 0x12f   :  { %135 = vrot.lane.b32.xlu1 %v128_v23, %s2449_s30 }
 0x199   :  { %v130_v25 = vpop.permute.xlu0 %129 }
 0x19d   :  { %v132_v27 = vpop.permute.xlu1 %131  ;;  %v134_v28 = vpop.permute.xlu0 %133 }
 0x19e   :  { %v137_v29 = vsel %vm2612_vm2, %v130_v25, %v134_v28 }
 0x19f   :  { %v139_v30 = vadd.f32 %v137_v29, %v127_v20  ;;  %v2156_v29 = vld [vmem:[%s3690_s4] ss:$0 sm:$0xff]  ;;  %s2453_s4 = smov 48  }
 0x1a1   :  { %v136_v31 = vpop.permute.xlu1 %135  ;;  %141 = vrot.lane.b32.xlu0 %v139_v30, %s2450_s11 }
 0x1a2   :  { %v138_v32 = vsel %vm2612_vm2, %v132_v27, %v136_v31  ;;  %v2155_v27 = vld [vmem:[%s3689_s3] ss:$0 sm:$0xff]  ;;  %s2452_s3 = smov 49  }
 0x1a3   :  { %v140_v33 = vadd.f32 %v138_v32, %v128_v23 }
 0x1a5   :  { %143 = vrot.lane.b32.xlu1 %v140_v33, %s2450_s11  ;;  %145 = vrot.lane.b32.xlu0 %v139_v30, %s2442_s22 }
 0x1a9   :  { %147 = vrot.lane.b32.xlu1 %v140_v33, %s2442_s22 }
 0x213   :  { %v142_v35 = vpop.permute.xlu0 %141 }
 0x217   :  { %v144_v37 = vpop.permute.xlu1 %143  ;;  %v146_v38 = vpop.permute.xlu0 %145 }
 0x218   :  { %v149_v39 = vsel %vm2624_vm3, %v142_v35, %v146_v38 }
 0x219   :  { %v151_v40 = vadd.f32 %v149_v39, %v139_v30 }
 0x21b   :  { %v153_v41 = vmul.f32 0.0625, %v151_v40  ;;  %v148_v42 = vpop.permute.xlu1 %147 }
 0x21c   :  { %v150_v43 = vsel %vm2624_vm3, %v144_v37, %v148_v42 }
 0x21d   :  { %v155_v44 = vsub.f32 %v2573_v0, %v153_v41  ;;  %v152_v45 = vadd.f32 %v150_v43, %v140_v33 }
 0x21f   :  { %v154_v46 = vmul.f32 0.0625, %v152_v45  ;;  %v157_v47 = vmul.f32 %v155_v44, %v155_v44 }
 0x221   :  { %v2634_v48 = vsub.f32 %v2579_v1, %v154_v46  ;;  %159 = vrot.lane.b32.xlu0 %v157_v47, %s2445_s27 }
 0x223   :  { %v158_v49 = vmul.f32 %v2634_v48, %v2634_v48 }
 0x225   :  { %161 = vrot.lane.b32.xlu1 %v158_v49, %s2445_s27  ;;  %163 = vrot.lane.b32.xlu0 %v157_v47, %s2444_s26 }
 0x229   :  { %165 = vrot.lane.b32.xlu1 %v158_v49, %s2444_s26 }
 0x293   :  { %v160_v50 = vpop.permute.xlu0 %159 }
 0x297   :  { %v162_v51 = vpop.permute.xlu1 %161  ;;  %v164_v52 = vpop.permute.xlu0 %163 }
 0x298   :  { %v167_v53 = vsel %vm2586_vm0, %v160_v50, %v164_v52 }
 0x299   :  { %v169_v54 = vadd.f32 %v167_v53, %v157_v47 }
 0x29b   :  { %v166_v55 = vpop.permute.xlu1 %165  ;;  %171 = vrot.lane.b32.xlu0 %v169_v54, %s2446_s5 }
 0x29c   :  { %v168_v56 = vsel %vm2586_vm0, %v162_v51, %v166_v55 }
 0x29d   :  { %v170_v57 = vadd.f32 %v168_v56, %v158_v49 }
 0x29f   :  { %173 = vrot.lane.b32.xlu1 %v170_v57, %s2446_s5  ;;  %175 = vrot.lane.b32.xlu0 %v169_v54, %s2447_s28 }
 0x2a3   :  { %177 = vrot.lane.b32.xlu1 %v170_v57, %s2447_s28 }
 0x30d   :  { %v172_v58 = vpop.permute.xlu0 %171 }
 0x311   :  { %v174_v59 = vpop.permute.xlu1 %173  ;;  %v176_v60 = vpop.permute.xlu0 %175 }
 0x312   :  { %v179_v61 = vsel %vm2600_vm1, %v172_v58, %v176_v60 }
 0x313   :  { %v181_v62 = vadd.f32 %v179_v61, %v169_v54 }
 0x315   :  { %v178_v63 = vpop.permute.xlu1 %177  ;;  %183 = vrot.lane.b32.xlu0 %v181_v62, %s2448_s29 }
 0x316   :  { %v180_v0 = vsel %vm2600_vm1, %v174_v59, %v178_v63 }
 0x317   :  { %v182_v1 = vadd.f32 %v180_v0, %v170_v57 }
 0x319   :  { %185 = vrot.lane.b32.xlu1 %v182_v1, %s2448_s29  ;;  %187 = vrot.lane.b32.xlu0 %v181_v62, %s2449_s30 }
 0x31d   :  { %189 = vrot.lane.b32.xlu1 %v182_v1, %s2449_s30 }
 0x387   :  { %v184_v3 = vpop.permute.xlu0 %183 }
 0x38b   :  { %v186_v4 = vpop.permute.xlu1 %185  ;;  %v188_v6 = vpop.permute.xlu0 %187 }
 0x38c   :  { %v191_v7 = vsel %vm2612_vm2, %v184_v3, %v188_v6 }
 0x38d   :  { %v193_v8 = vadd.f32 %v191_v7, %v181_v62 }
 0x38f   :  { %v190_v9 = vpop.permute.xlu1 %189  ;;  %195 = vrot.lane.b32.xlu0 %v193_v8, %s2450_s11 }
 0x390   :  { %v192_v10 = vsel %vm2612_vm2, %v186_v4, %v190_v9 }
 0x391   :  { %v194_v11 = vadd.f32 %v192_v10, %v182_v1 }
 0x393   :  { %197 = vrot.lane.b32.xlu1 %v194_v11, %s2450_s11  ;;  %199 = vrot.lane.b32.xlu0 %v193_v8, %s2442_s22 }
 0x397   :  { %201 = vrot.lane.b32.xlu1 %v194_v11, %s2442_s22 }
 0x401   :  { %v196_v12 = vpop.permute.xlu0 %195 }
 0x405   :  { %v198_v13 = vpop.permute.xlu1 %197  ;;  %v200_v14 = vpop.permute.xlu0 %199 }
 0x406   :  { %v203_v15 = vsel %vm2624_vm3, %v196_v12, %v200_v14 }
 0x407   :  { %v205_v17 = vadd.f32 %v203_v15, %v193_v8 }
 0x409   :  { %v207_v18 = vmul.f32 0.0625, %v205_v17  ;;  %v202_v19 = vpop.permute.xlu1 %201 }
 0x40a   :  { %v204_v20 = vsel %vm2624_vm3, %v198_v13, %v202_v19  ;;  %v3697_v13 = vmov -1.0  }
 0x40b   :  { %v209_v21 = vadd.f32 1e-05, %v207_v18  ;;  %v206_v22 = vadd.f32 %v204_v20, %v194_v11 }
 0x40d   :  { %2319 = vrsqrt.f32 %v209_v21  ;;  %v208_v23 = vmul.f32 0.0625, %v206_v22 }
 0x40f   :  { %v210_v24 = vadd.f32 1e-05, %v208_v23 }
 0x411   :  { %2321 = vrsqrt.f32 %v210_v24 }
 0x417   :  { %v2320_v25 = vpop.eup %2319 }
 0x418   :  { %v213_v28 = vmul.f32 %v2320_v25, %v155_v44 }
 0x41a   :  { %v222_v30 = vmul.f32 %v2155_v27, %v213_v28  ;;  %v2750_v28 = vshrl.u32 %v76_v2, 7 }
 0x41b   :  { %v2322_v31 = vpop.eup %2321 }
 0x41c   :  { %v231_v32 = vadd.f32 %v2156_v29, %v222_v30  ;;  %v214_v33 = vmul.f32 %v2322_v31, %v2634_v48  ;;  %3730 = vst [vmem:[#allocation17_spill] sm:$0xff] %v2750_v28  ;;  %vm297_vm6 = vcmp.lt.s32.totalorder %v2750_v28, 1  ;;  %vm846_vm8 = vcmp.lt.s32.totalorder %v2750_v28, 7 }
 0x41e   :  { %v235_v34 = vmul.f32 0.70710677, %v231_v32  ;;  %v223_v35 = vmul.f32 %v2155_v27, %v214_v33  ;;  %v233_v18 = vmul.f32 0.5, %v231_v32 }
 0x420   :  { %v241_v37 = vand.u32 2147483647, %v235_v34  ;;  %v232_v38 = vadd.f32 %v2156_v29, %v223_v35  ;;  %vm237_vm4 = vcmp.ge.f32.partialorder %v235_v34, 0.0  ;;  %v2753_v29 = vadd.s32 4294967295, %v2750_v28 }
 0x421   :  { %v239_v14 = vsel %vm237_vm4, 1.0, %v3697_v13 }
 0x422   :  { %v243_v39 = vmul.f32 0.3275911, %v241_v37  ;;  %v236_v40 = vmul.f32 0.70710677, %v232_v38  ;;  %v269_v45 = vsub.f32 0.0, %v241_v37  ;;  %v234_v24 = vmul.f32 0.5, %v232_v38 }
 0x423   :  { %3731 = vst [vmem:[#allocation18_spill] sm:$0xff] %v2753_v29  ;;  %vm91_vm7 = vcmp.ge.s32.totalorder %v2753_v29, 0 }
 0x424   :  { %v245_v41 = vadd.f32 1.0, %v243_v39  ;;  %v242_v42 = vand.u32 2147483647, %v236_v40  ;;  %v271_v47 = vmul.f32 %v269_v45, %v241_v37  ;;  %vm238_vm5 = vcmp.ge.f32.partialorder %v236_v40, 0.0 }
 0x425   :  { %v240_v21 = vsel %vm238_vm5, 1.0, %v3697_v13 }
 0x426   :  { %2323 = vrcp.f32 %v245_v41  ;;  %v244_v43 = vmul.f32 0.3275911, %v242_v42  ;;  %v270_v49 = vsub.f32 0.0, %v242_v42  ;;  %v273_v48 = vmul.f32 1.442695, %v271_v47 }
 0x428   :  { %v246_v44 = vadd.f32 1.0, %v244_v43  ;;  %v272_v53 = vmul.f32 %v270_v49, %v242_v42 }
 0x42a   :  { %2325 = vrcp.f32 %v246_v44  ;;  %v275_v58 = vmul.f32 1.442695, %v272_v53 }
 0x42b   :  { %2327 = vpow2.f32 %v273_v48 }
 0x42c   :  { %2329 = vpow2.f32 %v275_v58 }
 0x430   :  { %v2324_v46 = vpop.eup %2323 }
 0x431   :  { %v251_v50 = vmul.f32 1.0614054, %v2324_v46 }
 0x433   :  { %v253_v51 = vadd.f32 -1.4531521, %v251_v50 }
 0x434   :  { %v2326_v52 = vpop.eup %2325 }
 0x435   :  { %v255_v54 = vmul.f32 %v2324_v46, %v253_v51  ;;  %v252_v55 = vmul.f32 1.0614054, %v2326_v52  ;;  %v2328_v7 = vpop.eup %2327 }
 0x436   :  { %v2330_v12 = vpop.eup %2329 }
 0x437   :  { %v257_v56 = vadd.f32 1.4214138, %v255_v54  ;;  %v254_v57 = vadd.f32 -1.4531521, %v252_v55  ;;  %v88_v54 = vadd.s32 8, %v2750_v28 }
 0x439   :  { %v259_v59 = vmul.f32 %v2324_v46, %v257_v56  ;;  %v256_v60 = vmul.f32 %v2326_v52, %v254_v57  ;;  %v2901_v58 = vadd.s32 1, %v88_v54 }
 0x43b   :  { %v261_v61 = vadd.f32 -0.28449672, %v259_v59  ;;  %v258_v62 = vadd.f32 1.4214138, %v256_v60  ;;  %3732 = vst [vmem:[#allocation19_spill] sm:$0xff] %v2901_v58  ;;  %vm102_vm9 = vcmp.lt.s32.totalorder %v2901_v58, 16 }
 0x43c   :  { %v2158_v58 = vld [vmem:[#allocation5] ss:$0 sm:$0xff] }
 0x43d   :  { %v263_v63 = vmul.f32 %v2324_v46, %v261_v61  ;;  %v260_v0 = vmul.f32 %v2326_v52, %v258_v62 }
 0x43f   :  { %v265_v1 = vadd.f32 0.2548296, %v263_v63  ;;  %v262_v3 = vadd.f32 -0.28449672, %v260_v0 }
 0x441   :  { %v267_v4 = vmul.f32 %v2324_v46, %v265_v1  ;;  %v264_v6 = vmul.f32 %v2326_v52, %v262_v3 }
 0x443   :  { %v277_v8 = vmul.f32 %v2328_v7, %v267_v4  ;;  %v266_v9 = vadd.f32 0.2548296, %v264_v6 }
 0x445   :  { %v279_v10 = vsub.f32 1.0, %v277_v8  ;;  %v268_v11 = vmul.f32 %v2326_v52, %v266_v9 }
 0x447   :  { %v281_v15 = vmul.f32 %v279_v10, %v239_v14  ;;  %v278_v17 = vmul.f32 %v2330_v12, %v268_v11 }
 0x449   :  { %v283_v19 = vadd.f32 1.0, %v281_v15  ;;  %v280_v20 = vsub.f32 1.0, %v278_v17 }
 0x44b   :  { %v2679_v22 = vmul.f32 %v283_v19, %v233_v18  ;;  %v282_v23 = vmul.f32 %v280_v20, %v240_v21 }
 0x44d   :  { %v284_v25 = vadd.f32 1.0, %v282_v23  ;;  %575 = vrot.lane.b32.xlu0 %v2679_v22, %s2452_s3  ;;  %v295_v31 = vrot.slane %v2679_v22, 7  ;;  %v844_v59 = vrot.slane %v2679_v22, 1 }
 0x44f   :  { %v2683_v27 = vmul.f32 %v284_v25, %v234_v24 }
 0x451   :  { %3729 = vst [vmem:[#allocation16_spill] sm:$0xff] %v2683_v27  ;;  %577 = vrot.lane.b32.xlu1 %v2683_v27, %s2452_s3  ;;  %588 = vrot.lane.b32.xlu0 %v2679_v22, %s2453_s4  ;;  %v296_v30 = vrot.slane %v2683_v27, 7  ;;  %v845_v57 = vrot.slane %v2683_v27, 1 }
 0x453   :  { %v299_v2 = vsel %vm297_vm6, %v296_v30, %v295_v31  ;;  %v2779_v33 = vsel %vm297_vm6, %v295_v31, %v296_v30  ;;  %v2915_v62 = vsel %vm846_vm8, %v844_v59, %v845_v57  ;;  %v848_v63 = vsel %vm846_vm8, %v845_v57, %v844_v59 }
 0x454   :  { %v2771_v32 = vsel %vm91_vm7, %v299_v2, 0.0  ;;  %v2930_v3 = vsel %vm102_vm9, %v848_v63, 0.0 }
 0x455   :  { %590 = vrot.lane.b32.xlu1 %v2683_v27, %s2453_s4  ;;  %601 = vrot.lane.b32.xlu0 %v2679_v22, %s2454_s15 }
 0x459   :  { %603 = vrot.lane.b32.xlu1 %v2683_v27, %s2454_s15  ;;  %614 = vrot.lane.b32.xlu0 %v2679_v22, %s2455_s16 }
 0x45d   :  { %616 = vrot.lane.b32.xlu1 %v2683_v27, %s2455_s16  ;;  %627 = vrot.lane.b32.xlu0 %v2679_v22, %s2456_s17 }
 0x461   :  { %629 = vrot.lane.b32.xlu1 %v2683_v27, %s2456_s17  ;;  %640 = vrot.lane.b32.xlu0 %v2679_v22, %s2457_s18 }
 0x465   :  { %642 = vrot.lane.b32.xlu1 %v2683_v27, %s2457_s18  ;;  %653 = vrot.lane.b32.xlu0 %v2679_v22, %s2458_s19 }
 0x469   :  { %655 = vrot.lane.b32.xlu1 %v2683_v27, %s2458_s19  ;;  %666 = vrot.lane.b32.xlu0 %v2679_v22, %s2459_s20 }
 0x46d   :  { %668 = vrot.lane.b32.xlu1 %v2683_v27, %s2459_s20  ;;  %679 = vrot.lane.b32.xlu0 %v2679_v22, %s2460_s23 }
 0x471   :  { %681 = vrot.lane.b32.xlu1 %v2683_v27, %s2460_s23  ;;  %692 = vrot.lane.b32.xlu0 %v2679_v22, %s2444_s26 }
 0x475   :  { %694 = vrot.lane.b32.xlu1 %v2683_v27, %s2444_s26  ;;  %714 = vrot.lane.b32.xlu0 %v2679_v22, %s2445_s27 }
 0x479   :  { %716 = vrot.lane.b32.xlu1 %v2683_v27, %s2445_s27  ;;  %727 = vrot.lane.b32.xlu0 %v2679_v22, %s3709_s24 }
 0x47d   :  { %729 = vrot.lane.b32.xlu1 %v2683_v27, %s3709_s24  ;;  %740 = vrot.lane.b32.xlu0 %v2679_v22, %s3707_s25 }
 0x481   :  { %742 = vrot.lane.b32.xlu1 %v2683_v27, %s3707_s25  ;;  %753 = vrot.lane.b32.xlu0 %v2679_v22, %s2463_s0 }
 0x485   :  { %755 = vrot.lane.b32.xlu1 %v2683_v27, %s2463_s0  ;;  %766 = vrot.lane.b32.xlu0 %v2679_v22, %s2464_s12 }
 0x489   :  { %768 = vrot.lane.b32.xlu1 %v2683_v27, %s2464_s12  ;;  %779 = vrot.lane.b32.xlu0 %v2679_v22, %s2465_s13 }
 0x48d   :  { %781 = vrot.lane.b32.xlu1 %v2683_v27, %s2465_s13  ;;  %792 = vrot.lane.b32.xlu0 %v2679_v22, %s2466_s1 }
 0x491   :  { %794 = vrot.lane.b32.xlu1 %v2683_v27, %s2466_s1  ;;  %805 = vrot.lane.b32.xlu0 %v2679_v22, %s2467_s10 }
 0x495   :  { %807 = vrot.lane.b32.xlu1 %v2683_v27, %s2467_s10  ;;  %818 = vrot.lane.b32.xlu0 %v2679_v22, %s2468_s14 }
 0x499   :  { %820 = vrot.lane.b32.xlu1 %v2683_v27, %s2468_s14  ;;  %306 = vrot.lane.b32.xlu0 %v2771_v32, %s2452_s3 }
 0x49d   :  { %319 = vrot.lane.b32.xlu0 %v2771_v32, %s2453_s4  ;;  %308 = vrot.lane.b32.xlu1 %v2779_v33, %s2452_s3 }
 0x4a1   :  { %332 = vrot.lane.b32.xlu0 %v2771_v32, %s2454_s15  ;;  %321 = vrot.lane.b32.xlu1 %v2779_v33, %s2453_s4 }
 0x4a5   :  { %345 = vrot.lane.b32.xlu0 %v2771_v32, %s2455_s16  ;;  %334 = vrot.lane.b32.xlu1 %v2779_v33, %s2454_s15 }
 0x4a9   :  { %358 = vrot.lane.b32.xlu0 %v2771_v32, %s2456_s17  ;;  %347 = vrot.lane.b32.xlu1 %v2779_v33, %s2455_s16 }
 0x4ad   :  { %371 = vrot.lane.b32.xlu0 %v2771_v32, %s2457_s18  ;;  %360 = vrot.lane.b32.xlu1 %v2779_v33, %s2456_s17 }
 0x4b1   :  { %384 = vrot.lane.b32.xlu0 %v2771_v32, %s2458_s19  ;;  %373 = vrot.lane.b32.xlu1 %v2779_v33, %s2457_s18 }
 0x4b5   :  { %397 = vrot.lane.b32.xlu0 %v2771_v32, %s2459_s20  ;;  %386 = vrot.lane.b32.xlu1 %v2779_v33, %s2458_s19 }
 0x4b9   :  { %410 = vrot.lane.b32.xlu0 %v2771_v32, %s2460_s23  ;;  %399 = vrot.lane.b32.xlu1 %v2779_v33, %s2459_s20 }
 0x4bd   :  { %423 = vrot.lane.b32.xlu0 %v2771_v32, %s2444_s26  ;;  %412 = vrot.lane.b32.xlu1 %v2779_v33, %s2460_s23 }
 0x4bf   :  { %v2817_v34 = vpop.permute.xlu0 %575 }
 0x4c1   :  { %445 = vrot.lane.b32.xlu0 %v2771_v32, %s2445_s27  ;;  %425 = vrot.lane.b32.xlu1 %v2779_v33, %s2444_s26 }
 0x4c3   :  { %v2823_v35 = vpop.permute.xlu1 %577  ;;  %v2825_v37 = vpop.permute.xlu0 %588 }
 0x4c5   :  { %458 = vrot.lane.b32.xlu0 %v2771_v32, %s3709_s24  ;;  %447 = vrot.lane.b32.xlu1 %v2779_v33, %s2445_s27 }
 0x4c7   :  { %v2831_v38 = vpop.permute.xlu1 %590  ;;  %v2833_v39 = vpop.permute.xlu0 %601 }
 0x4c9   :  { %471 = vrot.lane.b32.xlu0 %v2771_v32, %s3707_s25  ;;  %460 = vrot.lane.b32.xlu1 %v2779_v33, %s3709_s24 }
 0x4cb   :  { %v2839_v40 = vpop.permute.xlu1 %603  ;;  %v2841_v41 = vpop.permute.xlu0 %614 }
 0x4cd   :  { %484 = vrot.lane.b32.xlu0 %v2771_v32, %s2463_s0  ;;  %473 = vrot.lane.b32.xlu1 %v2779_v33, %s3707_s25 }
 0x4cf   :  { %v2847_v42 = vpop.permute.xlu1 %616  ;;  %v2849_v43 = vpop.permute.xlu0 %627 }
 0x4d1   :  { %497 = vrot.lane.b32.xlu0 %v2771_v32, %s2464_s12  ;;  %486 = vrot.lane.b32.xlu1 %v2779_v33, %s2463_s0 }
 0x4d3   :  { %v2855_v44 = vpop.permute.xlu1 %629  ;;  %v2857_v45 = vpop.permute.xlu0 %640 }
 0x4d5   :  { %510 = vrot.lane.b32.xlu0 %v2771_v32, %s2465_s13  ;;  %499 = vrot.lane.b32.xlu1 %v2779_v33, %s2464_s12 }
 0x4d7   :  { %v2863_v46 = vpop.permute.xlu1 %642  ;;  %v2865_v47 = vpop.permute.xlu0 %653 }
 0x4d9   :  { %523 = vrot.lane.b32.xlu0 %v2771_v32, %s2466_s1  ;;  %512 = vrot.lane.b32.xlu1 %v2779_v33, %s2465_s13 }
 0x4db   :  { %v2871_v49 = vpop.permute.xlu1 %655  ;;  %v2873_v50 = vpop.permute.xlu0 %666 }
 0x4dd   :  { %536 = vrot.lane.b32.xlu0 %v2771_v32, %s2467_s10  ;;  %525 = vrot.lane.b32.xlu1 %v2779_v33, %s2466_s1 }
 0x4df   :  { %v2879_v51 = vpop.permute.xlu1 %668  ;;  %v2881_v52 = vpop.permute.xlu0 %679 }
 0x4e1   :  { %549 = vrot.lane.b32.xlu0 %v2771_v32, %s2468_s14  ;;  %538 = vrot.lane.b32.xlu1 %v2779_v33, %s2467_s10 }
 0x4e3   :  { %v2887_v48 = vpop.permute.xlu1 %681  ;;  %v2889_v53 = vpop.permute.xlu0 %692 }
 0x4e5   :  { %562 = vrot.lane.b32.xlu0 %v2771_v32, %s2469_s21  ;;  %551 = vrot.lane.b32.xlu1 %v2779_v33, %s2468_s14 }
 0x4e7   :  { %v2896_v55 = vpop.permute.xlu1 %694  ;;  %v2898_v56 = vpop.permute.xlu0 %714 }
 0x4e9   :  { %831 = vrot.lane.b32.xlu0 %v2679_v22, %s2469_s21  ;;  %564 = vrot.lane.b32.xlu1 %v2779_v33, %s2469_s21 }
 0x4eb   :  { %v2909_v60 = vpop.permute.xlu1 %716  ;;  %v2911_v61 = vpop.permute.xlu0 %727 }
 0x4ec   :  { %3733 = vst [vmem:[#allocation20_spill] sm:$0xff] %v2909_v60  ;;  %3734 = vst [vmem:[#allocation21_spill] sm:$0xff] %v2911_v61 }
 0x4ed   :  { %855 = vrot.lane.b32.xlu0 %v2915_v62, %s2452_s3  ;;  %833 = vrot.lane.b32.xlu1 %v2683_v27, %s2469_s21 }
 0x4ef   :  { %v2924_v0 = vpop.permute.xlu1 %729  ;;  %v2926_v1 = vpop.permute.xlu0 %740 }
 0x4f0   :  { %3735 = vst [vmem:[#allocation22_spill] sm:$0xff] %v2924_v0  ;;  %3736 = vst [vmem:[#allocation23_spill] sm:$0xff] %v2926_v1 }
 0x4f1   :  { %868 = vrot.lane.b32.xlu0 %v2915_v62, %s2453_s4  ;;  %857 = vrot.lane.b32.xlu1 %v2930_v3, %s2452_s3 }
 0x4f3   :  { %v2936_v4 = vpop.permute.xlu1 %742  ;;  %v2938_v6 = vpop.permute.xlu0 %753 }
 0x4f4   :  { %3737 = vst [vmem:[#allocation24_spill] sm:$0xff] %v2936_v4  ;;  %3738 = vst [vmem:[#allocation25_spill] sm:$0xff] %v2938_v6  ;;  %v2163_v6 = vld [vmem:[#allocation5 + $0x5] ss:$0 sm:$0xff] }
 0x4f5   :  { %881 = vrot.lane.b32.xlu0 %v2915_v62, %s2454_s15  ;;  %870 = vrot.lane.b32.xlu1 %v2930_v3, %s2453_s4 }
 0x4f7   :  { %v2944_v7 = vpop.permute.xlu1 %755  ;;  %v2946_v8 = vpop.permute.xlu0 %766 }
 0x4f8   :  { %3739 = vst [vmem:[#allocation26_spill] sm:$0xff] %v2944_v7  ;;  %3740 = vst [vmem:[#allocation27_spill] sm:$0xff] %v2946_v8 }
 0x4f9   :  { %894 = vrot.lane.b32.xlu0 %v2915_v62, %s2455_s16  ;;  %883 = vrot.lane.b32.xlu1 %v2930_v3, %s2454_s15 }
 0x4fb   :  { %v2952_v9 = vpop.permute.xlu1 %768  ;;  %v2954_v10 = vpop.permute.xlu0 %779 }
 0x4fc   :  { %3741 = vst [vmem:[#allocation28_spill] sm:$0xff] %v2952_v9  ;;  %3742 = vst [vmem:[#allocation29_spill] sm:$0xff] %v2954_v10  ;;  %v2162_v9 = vld [vmem:[#allocation5 + $0x4] ss:$0 sm:$0xff] }
 0x4fd   :  { %907 = vrot.lane.b32.xlu0 %v2915_v62, %s2456_s17  ;;  %896 = vrot.lane.b32.xlu1 %v2930_v3, %s2455_s16 }
 0x4ff   :  { %v2960_v11 = vpop.permute.xlu1 %781  ;;  %v2962_v12 = vpop.permute.xlu0 %792 }
 0x500   :  { %3743 = vst [vmem:[#allocation30_spill] sm:$0xff] %v2960_v11  ;;  %3744 = vst [vmem:[#allocation31_spill] sm:$0xff] %v2962_v12 }
 0x501   :  { %920 = vrot.lane.b32.xlu0 %v2915_v62, %s2457_s18  ;;  %909 = vrot.lane.b32.xlu1 %v2930_v3, %s2456_s17 }
 0x503   :  { %v2968_v14 = vpop.permute.xlu1 %794  ;;  %v2970_v15 = vpop.permute.xlu0 %805 }
 0x504   :  { %3745 = vst [vmem:[#allocation32_spill] sm:$0xff] %v2968_v14  ;;  %3746 = vst [vmem:[#allocation33_spill] sm:$0xff] %v2970_v15  ;;  %v2161_v14 = vld [vmem:[#allocation5 + $0x3] ss:$0 sm:$0xff] }
 0x505   :  { %933 = vrot.lane.b32.xlu0 %v2915_v62, %s2458_s19  ;;  %922 = vrot.lane.b32.xlu1 %v2930_v3, %s2457_s18 }
 0x507   :  { %v2976_v17 = vpop.permute.xlu1 %807  ;;  %v2978_v18 = vpop.permute.xlu0 %818 }
 0x508   :  { %3747 = vst [vmem:[#allocation34_spill] sm:$0xff] %v2976_v17  ;;  %3748 = vst [vmem:[#allocation35_spill] sm:$0xff] %v2978_v18 }
 0x509   :  { %946 = vrot.lane.b32.xlu0 %v2915_v62, %s2459_s20  ;;  %935 = vrot.lane.b32.xlu1 %v2930_v3, %s2458_s19 }
 0x50b   :  { %v2984_v19 = vpop.permute.xlu1 %820  ;;  %v307_v20 = vpop.permute.xlu0 %306 }
 0x50c   :  { %3749 = vst [vmem:[#allocation36_spill] sm:$0xff] %v2984_v19  ;;  %v315_v26 = vmul.f32 %v2158_v58, %v307_v20 }
 0x50d   :  { %959 = vrot.lane.b32.xlu0 %v2915_v62, %s2460_s23  ;;  %948 = vrot.lane.b32.xlu1 %v2930_v3, %s2459_s20 }
 0x50e   :  { %v317_v15 = vadd.f32 %v2157_v16, %v315_v26  ;;  %v2164_v26 = vld [vmem:[#allocation5 + $0x6] ss:$0 sm:$0xff] }
 0x50f   :  { %v320_v21 = vpop.permute.xlu0 %319  ;;  %v309_v23 = vpop.permute.xlu1 %308 }
 0x510   :  { %v328_v18 = vmul.f32 %v2159_v36, %v320_v21  ;;  %v316_v11 = vmul.f32 %v2158_v58, %v309_v23 }
 0x511   :  { %972 = vrot.lane.b32.xlu0 %v2915_v62, %s2444_s26  ;;  %961 = vrot.lane.b32.xlu1 %v2930_v3, %s2460_s23 }
 0x512   :  { %v330_v7 = vadd.f32 %v328_v18, %v317_v15  ;;  %v318_v21 = vadd.f32 %v2157_v16, %v316_v11 }
 0x513   :  { %v333_v24 = vpop.permute.xlu0 %332  ;;  %v322_v25 = vpop.permute.xlu1 %321 }
 0x514   :  { %v341_v12 = vmul.f32 %v2160_v5, %v333_v24  ;;  %v329_v8 = vmul.f32 %v2159_v36, %v322_v25  ;;  %v2165_v36 = vld [vmem:[#allocation5 + $0x7] ss:$0 sm:$0xff] }
 0x515   :  { %994 = vrot.lane.b32.xlu0 %v2915_v62, %s2445_s27  ;;  %974 = vrot.lane.b32.xlu1 %v2930_v3, %s2444_s26 }
 0x516   :  { %v343_v0 = vadd.f32 %v341_v12, %v330_v7  ;;  %v331_v24 = vadd.f32 %v329_v8, %v318_v21 }
 0x517   :  { %v346_v30 = vpop.permute.xlu0 %345  ;;  %v335_v31 = vpop.permute.xlu1 %334 }
 0x518   :  { %v354_v4 = vmul.f32 %v2161_v14, %v346_v30  ;;  %v342_v1 = vmul.f32 %v2160_v5, %v335_v31  ;;  %v2166_v5 = vld [vmem:[#allocation5 + $0x8] ss:$0 sm:$0xff] }
 0x519   :  { %1007 = vrot.lane.b32.xlu0 %v2915_v62, %s3709_s24  ;;  %996 = vrot.lane.b32.xlu1 %v2930_v3, %s2445_s27 }
 0x51a   :  { %v356_v27 = vadd.f32 %v354_v4, %v343_v0  ;;  %v344_v18 = vadd.f32 %v342_v1, %v331_v24  ;;  %v2167_v4 = vld [vmem:[#allocation5 + $0x9] ss:$0 sm:$0xff] }
 0x51b   :  { %v359_v2 = vpop.permute.xlu0 %358  ;;  %v348_v54 = vpop.permute.xlu1 %347 }
 0x51c   :  { %v367_v60 = vmul.f32 %v2162_v9, %v359_v2  ;;  %v355_v61 = vmul.f32 %v2161_v14, %v348_v54 }
 0x51d   :  { %1020 = vrot.lane.b32.xlu0 %v2915_v62, %s3707_s25  ;;  %1009 = vrot.lane.b32.xlu1 %v2930_v3, %s3709_s24 }
 0x51e   :  { %v369_v25 = vadd.f32 %v367_v60, %v356_v27  ;;  %v357_v30 = vadd.f32 %v355_v61, %v344_v18 }
 0x51f   :  { %v372_v57 = vpop.permute.xlu0 %371  ;;  %v361_v59 = vpop.permute.xlu1 %360 }
 0x520   :  { %v380_v15 = vmul.f32 %v2163_v6, %v372_v57  ;;  %v368_v16 = vmul.f32 %v2162_v9, %v361_v59 }
 0x521   :  { %1033 = vrot.lane.b32.xlu0 %v2915_v62, %s2463_s0  ;;  %1022 = vrot.lane.b32.xlu1 %v2930_v3, %s3707_s25 }
 0x522   :  { %v382_v31 = vadd.f32 %v380_v15, %v369_v25  ;;  %v370_v14 = vadd.f32 %v368_v16, %v357_v30  ;;  %v2170_v16 = vld [vmem:[#allocation5 + $0xc] ss:$0 sm:$0xff] }
 0x523   :  { %v385_v63 = vpop.permute.xlu0 %384  ;;  %v374_v13 = vpop.permute.xlu1 %373 }
 0x524   :  { %v393_v7 = vmul.f32 %v2164_v26, %v385_v63  ;;  %v381_v8 = vmul.f32 %v2163_v6, %v374_v13  ;;  %v2168_v63 = vld [vmem:[#allocation5 + $0xa] ss:$0 sm:$0xff] }
 0x525   :  { %1046 = vrot.lane.b32.xlu0 %v2915_v62, %s2464_s12  ;;  %1035 = vrot.lane.b32.xlu1 %v2930_v3, %s2463_s0 }
 0x526   :  { %v395_v2 = vadd.f32 %v393_v7, %v382_v31  ;;  %v383_v54 = vadd.f32 %v381_v8, %v370_v14  ;;  %v2171_v31 = vld [vmem:[#allocation5 + $0xd] ss:$0 sm:$0xff]  ;;  %v442_v8 = vmul.f32 %v2168_v63, %v2779_v33  ;;  %v2175_v33 = vld [vmem:[#allocation5 + $0x11] ss:$0 sm:$0xff] }
 0x527   :  { %v398_v29 = vpop.permute.xlu0 %397  ;;  %v387_v28 = vpop.permute.xlu1 %386 }
 0x528   :  { %v406_v0 = vmul.f32 %v2165_v36, %v398_v29  ;;  %v394_v1 = vmul.f32 %v2164_v26, %v387_v28  ;;  %v2169_v28 = vld [vmem:[#allocation5 + $0xb] ss:$0 sm:$0xff] }
 0x529   :  { %1059 = vrot.lane.b32.xlu0 %v2915_v62, %s2465_s13  ;;  %1048 = vrot.lane.b32.xlu1 %v2930_v3, %s2464_s12 }
 0x52a   :  { %v408_v57 = vadd.f32 %v406_v0, %v395_v2  ;;  %v396_v13 = vadd.f32 %v394_v1, %v383_v54 }
 0x52b   :  { %v411_v19 = vpop.permute.xlu0 %410  ;;  %v400_v17 = vpop.permute.xlu1 %399 }
 0x52c   :  { %v419_v27 = vmul.f32 %v2166_v5, %v411_v19  ;;  %v407_v59 = vmul.f32 %v2165_v36, %v400_v17  ;;  %v441_v19 = vmul.f32 %v2168_v63, %v2771_v32 }
 0x52d   :  { %1072 = vrot.lane.b32.xlu0 %v2915_v62, %s2466_s1  ;;  %1061 = vrot.lane.b32.xlu1 %v2930_v3, %s2465_s13 }
 0x52e   :  { %v421_v29 = vadd.f32 %v419_v27, %v408_v57  ;;  %v409_v15 = vadd.f32 %v407_v59, %v396_v13  ;;  %v2173_v27 = vld [vmem:[#allocation5 + $0xf] ss:$0 sm:$0xff]  ;;  %v2174_v59 = vld [vmem:[#allocation5 + $0x10] ss:$0 sm:$0xff] }
 0x52f   :  { %v424_v20 = vpop.permute.xlu0 %423  ;;  %v413_v10 = vpop.permute.xlu1 %412 }
 0x530   :  { %v432_v61 = vmul.f32 %v2167_v4, %v424_v20  ;;  %v420_v6 = vmul.f32 %v2166_v5, %v413_v10  ;;  %v2172_v5 = vld [vmem:[#allocation5 + $0xe] ss:$0 sm:$0xff] }
 0x531   :  { %1085 = vrot.lane.b32.xlu0 %v2915_v62, %s2467_s10  ;;  %1074 = vrot.lane.b32.xlu1 %v2930_v3, %s2466_s1 }
 0x532   :  { %v434_v18 = vadd.f32 %v432_v61, %v421_v29  ;;  %v422_v26 = vadd.f32 %v420_v6, %v409_v15 }
 0x533   :  { %v446_v58 = vpop.permute.xlu0 %445  ;;  %v426_v23 = vpop.permute.xlu1 %425 }
 0x534   :  { %v433_v25 = vmul.f32 %v2167_v4, %v426_v23  ;;  %v443_v20 = vadd.f32 %v441_v19, %v434_v18  ;;  %v454_v36 = vmul.f32 %v2169_v28, %v446_v58  ;;  %v2176_v19 = vld [vmem:[#allocation5 + $0x12] ss:$0 sm:$0xff] }
 0x535   :  { %1098 = vrot.lane.b32.xlu0 %v2915_v62, %s2468_s14  ;;  %1087 = vrot.lane.b32.xlu1 %v2930_v3, %s2467_s10 }
 0x536   :  { %v435_v30 = vadd.f32 %v433_v25, %v422_v26  ;;  %v456_v2 = vadd.f32 %v454_v36, %v443_v20 }
 0x537   :  { %v459_v11 = vpop.permute.xlu0 %458  ;;  %v448_v12 = vpop.permute.xlu1 %447 }
 0x538   :  { %v467_v10 = vmul.f32 %v2170_v16, %v459_v11  ;;  %v444_v1 = vadd.f32 %v442_v8, %v435_v30  ;;  %v455_v23 = vmul.f32 %v2169_v28, %v448_v12 }
 0x539   :  { %1111 = vrot.lane.b32.xlu0 %v2915_v62, %s2469_s21  ;;  %1100 = vrot.lane.b32.xlu1 %v2930_v3, %s2468_s14 }
 0x53a   :  { %v469_v32 = vadd.f32 %v467_v10, %v456_v2  ;;  %v457_v58 = vadd.f32 %v455_v23, %v444_v1 }
 0x53b   :  { %v472_v60 = vpop.permute.xlu0 %471  ;;  %v461_v9 = vpop.permute.xlu1 %460 }
 0x53c   :  { %v480_v4 = vmul.f32 %v2171_v31, %v472_v60  ;;  %v468_v54 = vmul.f32 %v2170_v16, %v461_v9 }
 0x53d   :  { %1113 = vrot.lane.b32.xlu1 %v2930_v3, %s2469_s21 }
 0x53e   :  { %v482_v29 = vadd.f32 %v480_v4, %v469_v32  ;;  %v470_v11 = vadd.f32 %v468_v54, %v457_v58  ;;  %v2179_v4 = vld [vmem:[#allocation5 + $0x15] ss:$0 sm:$0xff]  ;;  %v2180_v58 = vld [vmem:[#allocation5 + $0x16] ss:$0 sm:$0xff] }
 0x53f   :  { %v485_v21 = vpop.permute.xlu0 %484  ;;  %v474_v24 = vpop.permute.xlu1 %473 }
 0x540   :  { %v493_v57 = vmul.f32 %v2172_v5, %v485_v21  ;;  %v481_v6 = vmul.f32 %v2171_v31, %v474_v24  ;;  %v2177_v21 = vld [vmem:[#allocation5 + $0x13] ss:$0 sm:$0xff] }
 0x542   :  { %v495_v63 = vadd.f32 %v493_v57, %v482_v29  ;;  %v483_v60 = vadd.f32 %v481_v6, %v470_v11  ;;  %v2181_v6 = vld [vmem:[#allocation5 + $0x17] ss:$0 sm:$0xff]  ;;  %v597_v11 = vmul.f32 %v2180_v58, %v2825_v37 }
 0x543   :  { %v498_v7 = vpop.permute.xlu0 %497  ;;  %v487_v17 = vpop.permute.xlu1 %486 }
 0x544   :  { %v506_v15 = vmul.f32 %v2173_v27, %v498_v7  ;;  %v494_v18 = vmul.f32 %v2172_v5, %v487_v17  ;;  %v2178_v17 = vld [vmem:[#allocation5 + $0x14] ss:$0 sm:$0xff] }
 0x546   :  { %v508_v28 = vadd.f32 %v506_v15, %v495_v63  ;;  %v496_v16 = vadd.f32 %v494_v18, %v483_v60 }
 0x547   :  { %v511_v0 = vpop.permute.xlu0 %510  ;;  %v500_v14 = vpop.permute.xlu1 %499 }
 0x548   :  { %v519_v25 = vmul.f32 %v2174_v59, %v511_v0  ;;  %v507_v20 = vmul.f32 %v2173_v27, %v500_v14 }
 0x54a   :  { %v521_v36 = vadd.f32 %v519_v25, %v508_v28  ;;  %v509_v7 = vadd.f32 %v507_v20, %v496_v16  ;;  %v2183_v20 = vld [vmem:[#allocation5 + $0x19] ss:$0 sm:$0xff] }
 0x54b   :  { %v524_v61 = vpop.permute.xlu0 %523  ;;  %v513_v13 = vpop.permute.xlu1 %512 }
 0x54c   :  { %v532_v9 = vmul.f32 %v2175_v33, %v524_v61  ;;  %v520_v30 = vmul.f32 %v2174_v59, %v513_v13  ;;  %v584_v59 = vmul.f32 %v2179_v4, %v2817_v34 }
 0x54e   :  { %v534_v31 = vadd.f32 %v532_v9, %v521_v36  ;;  %v522_v5 = vadd.f32 %v520_v30, %v509_v7  ;;  %v2184_v30 = vld [vmem:[#allocation5 + $0x1a] ss:$0 sm:$0xff] }
 0x54f   :  { %v537_v26 = vpop.permute.xlu0 %536  ;;  %v526_v12 = vpop.permute.xlu1 %525 }
 0x550   :  { %v545_v8 = vmul.f32 %v2176_v19, %v537_v26  ;;  %v533_v2 = vmul.f32 %v2175_v33, %v526_v12  ;;  %v585_v26 = vmul.f32 %v2179_v4, %v2823_v35  ;;  %v610_v12 = vmul.f32 %v2181_v6, %v2833_v39 }
 0x551   :  { %v636_v35 = vmul.f32 %v2183_v20, %v2849_v43 }
 0x552   :  { %v547_v0 = vadd.f32 %v545_v8, %v534_v31  ;;  %v535_v14 = vadd.f32 %v533_v2, %v522_v5  ;;  %v611_v8 = vmul.f32 %v2181_v6, %v2839_v40  ;;  %v637_v5 = vmul.f32 %v2183_v20, %v2855_v44 }
 0x553   :  { %v550_v10 = vpop.permute.xlu0 %549  ;;  %v539_v24 = vpop.permute.xlu1 %538 }
 0x554   :  { %v558_v1 = vmul.f32 %v2177_v21, %v550_v10  ;;  %v546_v23 = vmul.f32 %v2176_v19, %v539_v24  ;;  %v2182_v19 = vld [vmem:[#allocation5 + $0x18] ss:$0 sm:$0xff]  ;;  %v2185_v24 = vld [vmem:[#allocation5 + $0x1b] ss:$0 sm:$0xff] }
 0x555   :  { %v623_v16 = vmul.f32 %v2182_v19, %v2841_v41  ;;  %v624_v2 = vmul.f32 %v2182_v19, %v2847_v42  ;;  %v662_v40 = vmul.f32 %v2185_v24, %v2865_v47 }
 0x556   :  { %v560_v27 = vadd.f32 %v558_v1, %v547_v0  ;;  %v548_v13 = vadd.f32 %v546_v23, %v535_v14  ;;  %v2187_v23 = vld [vmem:[#allocation5 + $0x1d] ss:$0 sm:$0xff] }
 0x557   :  { %v563_v32 = vpop.permute.xlu0 %562  ;;  %v552_v54 = vpop.permute.xlu1 %551  ;;  %v688_v44 = vmul.f32 %v2187_v23, %v2881_v52 }
 0x558   :  { %v571_v57 = vmul.f32 %v2178_v17, %v563_v32  ;;  %v559_v61 = vmul.f32 %v2177_v21, %v552_v54  ;;  %v598_v21 = vmul.f32 %v2180_v58, %v2831_v38  ;;  %v649_v38 = vmul.f32 %v2184_v30, %v2857_v45  ;;  %v2189_v58 = vld [vmem:[#allocation5 + $0x1f] ss:$0 sm:$0xff] }
 0x559   :  { %v650_v54 = vmul.f32 %v2184_v30, %v2863_v46 }
 0x55a   :  { %v573_v29 = vadd.f32 %v571_v57, %v560_v27  ;;  %v561_v18 = vadd.f32 %v559_v61, %v548_v13  ;;  %v2188_v27 = vld [vmem:[#allocation5 + $0x1e] ss:$0 sm:$0xff]  ;;  %v663_v57 = vmul.f32 %v2185_v24, %v2871_v49  ;;  %v710_v49 = vmul.f32 %v2189_v58, %v2679_v22  ;;  %v2193_v22 = vld [vmem:[#allocation5 + $0x23] ss:$0 sm:$0xff]  ;;  %v2194_v24 = vld [vmem:[#allocation5 + $0x24] ss:$0 sm:$0xff] }
 0x55b   :  { %v3042_v15 = vpop.permute.xlu0 %831  ;;  %v565_v33 = vpop.permute.xlu1 %564  ;;  %v701_v46 = vmul.f32 %v2188_v27, %v2889_v53 }
 0x55c   :  { %v586_v63 = vadd.f32 %v584_v59, %v573_v29  ;;  %v572_v25 = vmul.f32 %v2178_v17, %v565_v33  ;;  %v2186_v17 = vld [vmem:[#allocation5 + $0x1c] ss:$0 sm:$0xff]  ;;  %v2190_v33 = vld [vmem:[#allocation5 + $0x20] ss:$0 sm:$0xff] }
 0x55d   :  { %v675_v42 = vmul.f32 %v2186_v17, %v2873_v50  ;;  %v676_v29 = vmul.f32 %v2186_v17, %v2879_v51  ;;  %v723_v51 = vmul.f32 %v2190_v33, %v2898_v56 }
 0x55e   :  { %v599_v60 = vadd.f32 %v597_v11, %v586_v63  ;;  %v574_v28 = vadd.f32 %v572_v25, %v561_v18  ;;  %v689_v11 = vmul.f32 %v2187_v23, %v2887_v48  ;;  %v2191_v18 = vld [vmem:[#allocation5 + $0x21] ss:$0 sm:$0xff]  ;;  %v3756_v23 = vld [vmem:[#allocation24_spill] sm:$0xff] }
 0x55f   :  { %v3047_v34 = vpop.permute.xlu0 %855  ;;  %v3049_v9 = vpop.permute.xlu1 %833 }
 0x560   :  { %v612_v37 = vadd.f32 %v610_v12, %v599_v60  ;;  %v587_v36 = vadd.f32 %v585_v26, %v574_v28  ;;  %v702_v26 = vmul.f32 %v2188_v27, %v2896_v55  ;;  %v2192_v60 = vld [vmem:[#allocation5 + $0x22] ss:$0 sm:$0xff]  ;;  %v3750_v28 = vld [vmem:[#allocation21_spill] sm:$0xff] }
 0x561   :  { %v736_v20 = vmul.f32 %v2191_v18, %v3750_v28 }
 0x562   :  { %v625_v10 = vadd.f32 %v623_v16, %v612_v37  ;;  %v600_v39 = vadd.f32 %v598_v21, %v587_v36  ;;  %v3751_v16 = vld [vmem:[#allocation16_spill] sm:$0xff] }
 0x563   :  { %v3055_v7 = vpop.permute.xlu0 %868  ;;  %v3057_v31 = vpop.permute.xlu1 %857  ;;  %v711_v37 = vmul.f32 %v2189_v58, %v3751_v16 }
 0x564   :  { %v638_v1 = vadd.f32 %v636_v35, %v625_v10  ;;  %v613_v41 = vadd.f32 %v611_v8, %v600_v39  ;;  %v3752_v8 = vld [vmem:[#allocation20_spill] sm:$0xff]  ;;  %v3753_v10 = vld [vmem:[#allocation23_spill] sm:$0xff] }
 0x565   :  { %v724_v35 = vmul.f32 %v2190_v33, %v3752_v8  ;;  %v749_v55 = vmul.f32 %v2192_v60, %v3753_v10 }
 0x566   :  { %v651_v0 = vadd.f32 %v649_v38, %v638_v1  ;;  %v626_v43 = vadd.f32 %v624_v2, %v613_v41  ;;  %v3754_v2 = vld [vmem:[#allocation22_spill] sm:$0xff]  ;;  %v3755_v1 = vld [vmem:[#allocation25_spill] sm:$0xff] }
 0x567   :  { %v3063_v4 = vpop.permute.xlu0 %881  ;;  %v3065_v32 = vpop.permute.xlu1 %870  ;;  %v737_v38 = vmul.f32 %v2191_v18, %v3754_v2  ;;  %v762_v41 = vmul.f32 %v2193_v22, %v3755_v1 }
 0x568   :  { %v664_v14 = vadd.f32 %v662_v40, %v651_v0  ;;  %v639_v45 = vadd.f32 %v637_v5, %v626_v43  ;;  %v2195_v40 = vld [vmem:[#allocation5 + $0x25] ss:$0 sm:$0xff] }
 0x56a   :  { %v677_v61 = vadd.f32 %v675_v42, %v664_v14  ;;  %v652_v47 = vadd.f32 %v650_v54, %v639_v45  ;;  %v750_v54 = vmul.f32 %v2192_v60, %v3756_v23  ;;  %v3757_v42 = vld [vmem:[#allocation27_spill] sm:$0xff]  ;;  %v3763_v60 = vld [vmem:[#allocation33_spill] sm:$0xff]  ;;  %v3767_v23 = vld [vmem:[#allocation36_spill] sm:$0xff] }
 0x56b   :  { %v3071_v59 = vpop.permute.xlu0 %894  ;;  %v3073_v13 = vpop.permute.xlu1 %883  ;;  %v775_v14 = vmul.f32 %v2194_v24, %v3757_v42 }
 0x56c   :  { %v690_v6 = vadd.f32 %v688_v44, %v677_v61  ;;  %v665_v50 = vadd.f32 %v663_v57, %v652_v47  ;;  %v2196_v57 = vld [vmem:[#allocation5 + $0x26] ss:$0 sm:$0xff]  ;;  %v3759_v47 = vld [vmem:[#allocation29_spill] sm:$0xff] }
 0x56d   :  { %v3758_v44 = vld [vmem:[#allocation26_spill] sm:$0xff]  ;;  %v788_v58 = vmul.f32 %v2195_v40, %v3759_v47 }
 0x56e   :  { %v703_v63 = vadd.f32 %v701_v46, %v690_v6  ;;  %v678_v52 = vadd.f32 %v676_v29, %v665_v50  ;;  %v763_v61 = vmul.f32 %v2193_v22, %v3758_v44  ;;  %v2197_v6 = vld [vmem:[#allocation5 + $0x27] ss:$0 sm:$0xff]  ;;  %v3764_v22 = vld [vmem:[#allocation32_spill] sm:$0xff] }
 0x56f   :  { %v3079_v25 = vpop.permute.xlu0 %907  ;;  %v3081_v19 = vpop.permute.xlu1 %896  ;;  %v814_v28 = vmul.f32 %v2197_v6, %v3763_v60  ;;  %v802_v8 = vmul.f32 %v2196_v57, %v3764_v22  ;;  %v2207_v22 = vld [vmem:[#allocation5 + $0x31] ss:$0 sm:$0xff] }
 0x570   :  { %v712_v12 = vadd.f32 %v710_v49, %v703_v63  ;;  %v691_v53 = vadd.f32 %v689_v11, %v678_v52  ;;  %v3760_v11 = vld [vmem:[#allocation28_spill] sm:$0xff]  ;;  %v3761_v49 = vld [vmem:[#allocation31_spill] sm:$0xff] }
 0x571   :  { %v776_v63 = vmul.f32 %v2194_v24, %v3760_v11  ;;  %v801_v52 = vmul.f32 %v2196_v57, %v3761_v49  ;;  %v3766_v24 = vld [vmem:[#allocation34_spill] sm:$0xff]  ;;  %v2204_v49 = vld [vmem:[#allocation5 + $0x2e] ss:$0 sm:$0xff] }
 0x572   :  { %v725_v21 = vadd.f32 %v723_v51, %v712_v12  ;;  %v704_v48 = vadd.f32 %v702_v26, %v691_v53  ;;  %v2198_v51 = vld [vmem:[#allocation5 + $0x28] ss:$0 sm:$0xff]  ;;  %v3762_v12 = vld [vmem:[#allocation30_spill] sm:$0xff]  ;;  %v815_v2 = vmul.f32 %v2197_v6, %v3766_v24 }
 0x573   :  { %v3087_v36 = vpop.permute.xlu0 %920  ;;  %v3089_v30 = vpop.permute.xlu1 %909  ;;  %v789_v53 = vmul.f32 %v2195_v40, %v3762_v12 }
 0x574   :  { %v738_v39 = vadd.f32 %v736_v20, %v725_v21  ;;  %v713_v56 = vadd.f32 %v711_v37, %v704_v48  ;;  %v2199_v48 = vld [vmem:[#allocation5 + $0x29] ss:$0 sm:$0xff] }
 0x575   :  { %v840_v1 = vmul.f32 %v2199_v48, %v3042_v15 }
 0x576   :  { %v751_v17 = vadd.f32 %v749_v55, %v738_v39  ;;  %v726_v5 = vadd.f32 %v724_v35, %v713_v56  ;;  %v3765_v35 = vld [vmem:[#allocation35_spill] sm:$0xff] }
 0x577   :  { %v3095_v0 = vpop.permute.xlu0 %933  ;;  %v3097_v43 = vpop.permute.xlu1 %922  ;;  %v827_v10 = vmul.f32 %v2198_v51, %v3765_v35  ;;  %v2200_v56 = vld [vmem:[#allocation5 + $0x2a] ss:$0 sm:$0xff] }
 0x578   :  { %v764_v45 = vadd.f32 %v762_v41, %v751_v17  ;;  %v739_v27 = vadd.f32 %v737_v38, %v726_v5  ;;  %v2201_v17 = vld [vmem:[#allocation5 + $0x2b] ss:$0 sm:$0xff]  ;;  %v865_v11 = vmul.f32 %v2200_v56, %v3057_v31 }
 0x579   :  { %v877_v47 = vmul.f32 %v2201_v17, %v3055_v7 }
 0x57a   :  { %v777_v29 = vadd.f32 %v775_v14, %v764_v45  ;;  %v752_v46 = vadd.f32 %v750_v54, %v739_v27  ;;  %v828_v54 = vmul.f32 %v2198_v51, %v3767_v23  ;;  %v864_v14 = vmul.f32 %v2200_v56, %v3047_v34  ;;  %v2202_v27 = vld [vmem:[#allocation5 + $0x2c] ss:$0 sm:$0xff]  ;;  %v2205_v51 = vld [vmem:[#allocation5 + $0x2f] ss:$0 sm:$0xff]  ;;  %v2210_v23 = vld [vmem:[#allocation5 + $0x34] ss:$0 sm:$0xff] }
 0x57b   :  { %v3103_v50 = vpop.permute.xlu0 %946  ;;  %v3105_v33 = vpop.permute.xlu1 %935  ;;  %v891_v60 = vmul.f32 %v2202_v27, %v3073_v13 }
 0x57c   :  { %v790_v18 = vadd.f32 %v788_v58, %v777_v29  ;;  %v765_v26 = vadd.f32 %v763_v61, %v752_v46  ;;  %v841_v61 = vmul.f32 %v2199_v48, %v3049_v9  ;;  %v2203_v58 = vld [vmem:[#allocation5 + $0x2d] ss:$0 sm:$0xff]  ;;  %v929_v48 = vmul.f32 %v2205_v51, %v3087_v36 }
 0x57d   :  { %v955_v24 = vmul.f32 %v2207_v22, %v3103_v50 }
 0x57e   :  { %v803_v20 = vadd.f32 %v801_v52, %v790_v18  ;;  %v778_v21 = vadd.f32 %v776_v63, %v765_v26  ;;  %v890_v63 = vmul.f32 %v2202_v27, %v3063_v4  ;;  %v878_v18 = vmul.f32 %v2201_v17, %v3065_v32 }
 0x57f   :  { %v3111_v16 = vpop.permute.xlu0 %959  ;;  %v3113_v37 = vpop.permute.xlu1 %948  ;;  %v903_v26 = vmul.f32 %v2203_v58, %v3071_v59  ;;  %v904_v4 = vmul.f32 %v2203_v58, %v3081_v19 }
 0x580   :  { %v816_v55 = vadd.f32 %v814_v28, %v803_v20  ;;  %v791_v39 = vadd.f32 %v789_v53, %v778_v21  ;;  %v916_v28 = vmul.f32 %v2204_v49, %v3079_v25  ;;  %v2206_v20 = vld [vmem:[#allocation5 + $0x30] ss:$0 sm:$0xff]  ;;  %v930_v25 = vmul.f32 %v2205_v51, %v3097_v43  ;;  %v2215_v51 = vld [vmem:[#allocation5 + $0x39] ss:$0 sm:$0xff] }
 0x582   :  { %v829_v38 = vadd.f32 %v827_v10, %v816_v55  ;;  %v804_v41 = vadd.f32 %v802_v8, %v791_v39  ;;  %v917_v10 = vmul.f32 %v2204_v49, %v3089_v30  ;;  %v942_v55 = vmul.f32 %v2206_v20, %v3095_v0  ;;  %v2208_v39 = vld [vmem:[#allocation5 + $0x32] ss:$0 sm:$0xff] }
 0x583   :  { %v973_v5 = vpop.permute.xlu0 %972  ;;  %v3119_v40 = vpop.permute.xlu1 %961  ;;  %v968_v17 = vmul.f32 %v2208_v39, %v3111_v16  ;;  %v956_v0 = vmul.f32 %v2207_v22, %v3113_v37  ;;  %v991_v49 = vmul.f32 %v2210_v23, %v2930_v3 }
 0x584   :  { %v842_v42 = vadd.f32 %v840_v1, %v829_v38  ;;  %v817_v45 = vadd.f32 %v815_v2, %v804_v41  ;;  %v2209_v2 = vld [vmem:[#allocation5 + $0x33] ss:$0 sm:$0xff]  ;;  %v943_v41 = vmul.f32 %v2206_v20, %v3105_v33 }
 0x586   :  { %v866_v57 = vadd.f32 %v864_v14, %v842_v42  ;;  %v830_v44 = vadd.f32 %v828_v54, %v817_v45  ;;  %v981_v42 = vmul.f32 %v2209_v2, %v973_v5  ;;  %v2211_v14 = vld [vmem:[#allocation5 + $0x35] ss:$0 sm:$0xff] }
 0x587   :  { %v995_v15 = vpop.permute.xlu0 %994  ;;  %v975_v29 = vpop.permute.xlu1 %974 }
 0x588   :  { %v843_v46 = vadd.f32 %v841_v61, %v830_v44  ;;  %v879_v6 = vadd.f32 %v877_v47, %v866_v57  ;;  %v969_v57 = vmul.f32 %v2208_v39, %v3119_v40  ;;  %v990_v44 = vmul.f32 %v2210_v23, %v2915_v62  ;;  %v2212_v61 = vld [vmem:[#allocation5 + $0x36] ss:$0 sm:$0xff] }
 0x589   :  { %v1003_v58 = vmul.f32 %v2211_v14, %v995_v15  ;;  %v982_v16 = vmul.f32 %v2209_v2, %v975_v29 }
 0x58a   :  { %v867_v52 = vadd.f32 %v865_v11, %v843_v46  ;;  %v892_v34 = vadd.f32 %v890_v63, %v879_v6  ;;  %v2213_v46 = vld [vmem:[#allocation5 + $0x37] ss:$0 sm:$0xff] }
 0x58b   :  { %v1008_v9 = vpop.permute.xlu0 %1007  ;;  %v997_v12 = vpop.permute.xlu1 %996 }
 0x58c   :  { %v880_v7 = vadd.f32 %v878_v18, %v867_v52  ;;  %v905_v53 = vadd.f32 %v903_v26, %v892_v34  ;;  %v1016_v5 = vmul.f32 %v2212_v61, %v1008_v9  ;;  %v2214_v52 = vld [vmem:[#allocation5 + $0x38] ss:$0 sm:$0xff]  ;;  %v1004_v26 = vmul.f32 %v2211_v14, %v997_v12  ;;  %v2217_v9 = vld [vmem:[#allocation5 + $0x3b] ss:$0 sm:$0xff] }
 0x58e   :  { %v893_v31 = vadd.f32 %v891_v60, %v880_v7  ;;  %v918_v21 = vadd.f32 %v916_v28, %v905_v53  ;;  %v2216_v28 = vld [vmem:[#allocation5 + $0x3a] ss:$0 sm:$0xff] }
 0x58f   :  { %v1021_v32 = vpop.permute.xlu0 %1020  ;;  %v1010_v8 = vpop.permute.xlu1 %1009 }
 0x590   :  { %v906_v59 = vadd.f32 %v904_v4, %v893_v31  ;;  %v931_v35 = vadd.f32 %v929_v48, %v918_v21  ;;  %v1029_v40 = vmul.f32 %v2213_v46, %v1021_v32  ;;  %v1017_v15 = vmul.f32 %v2212_v61, %v1010_v8  ;;  %v2218_v32 = vld [vmem:[#allocation5 + $0x3c] ss:$0 sm:$0xff] }
 0x592   :  { %v919_v13 = vadd.f32 %v917_v10, %v906_v59  ;;  %v944_v56 = vadd.f32 %v942_v55, %v931_v35 }
 0x593   :  { %v1034_v19 = vpop.permute.xlu0 %1033  ;;  %v1023_v38 = vpop.permute.xlu1 %1022 }
 0x594   :  { %v932_v36 = vadd.f32 %v930_v25, %v919_v13  ;;  %v957_v1 = vadd.f32 %v955_v24, %v944_v56  ;;  %v1042_v29 = vmul.f32 %v2214_v52, %v1034_v19  ;;  %v1030_v21 = vmul.f32 %v2213_v46, %v1023_v38  ;;  %v2219_v56 = vld [vmem:[#allocation5 + $0x3d] ss:$0 sm:$0xff] }
 0x596   :  { %v945_v30 = vadd.f32 %v943_v41, %v932_v36  ;;  %v970_v54 = vadd.f32 %v968_v17, %v957_v1  ;;  %v2220_v36 = vld [vmem:[#allocation5 + $0x3e] ss:$0 sm:$0xff] }
 0x597   :  { %v1047_v45 = vpop.permute.xlu0 %1046  ;;  %v1036_v43 = vpop.permute.xlu1 %1035 }
 0x598   :  { %v958_v27 = vadd.f32 %v956_v0, %v945_v30  ;;  %v983_v50 = vadd.f32 %v981_v42, %v970_v54  ;;  %v1055_v4 = vmul.f32 %v2215_v51, %v1047_v45  ;;  %v1043_v35 = vmul.f32 %v2214_v52, %v1036_v43 }
 0x59a   :  { %v971_v47 = vadd.f32 %v969_v57, %v958_v27  ;;  %v992_v33 = vadd.f32 %v990_v44, %v983_v50 }
 0x59b   :  { %v1060_v6 = vpop.permute.xlu0 %1059  ;;  %v1049_v11 = vpop.permute.xlu1 %1048 }
 0x59c   :  { %v1005_v63 = vadd.f32 %v1003_v58, %v992_v33  ;;  %v984_v37 = vadd.f32 %v982_v16, %v971_v47  ;;  %v1068_v12 = vmul.f32 %v2216_v28, %v1060_v6  ;;  %v1056_v39 = vmul.f32 %v2215_v51, %v1049_v11 }
 0x59e   :  { %v1018_v34 = vadd.f32 %v1016_v5, %v1005_v63  ;;  %v993_v18 = vadd.f32 %v991_v49, %v984_v37 }
 0x59f   :  { %v1073_v62 = vpop.permute.xlu0 %1072  ;;  %v1062_v7 = vpop.permute.xlu1 %1061 }
 0x5a0   :  { %v1006_v53 = vadd.f32 %v1004_v26, %v993_v18  ;;  %v1031_v60 = vadd.f32 %v1029_v40, %v1018_v34  ;;  %v1081_v13 = vmul.f32 %v2217_v9, %v1073_v62  ;;  %v1069_v19 = vmul.f32 %v2216_v28, %v1062_v7 }
 0x5a2   :  { %v1019_v20 = vadd.f32 %v1017_v15, %v1006_v53  ;;  %v1044_v31 = vadd.f32 %v1042_v29, %v1031_v60 }
 0x5a3   :  { %v1086_v48 = vpop.permute.xlu0 %1085  ;;  %v1075_v3 = vpop.permute.xlu1 %1074 }
 0x5a4   :  { %v1032_v22 = vadd.f32 %v1030_v21, %v1019_v20  ;;  %v1057_v59 = vadd.f32 %v1055_v4, %v1044_v31  ;;  %v1094_v38 = vmul.f32 %v2218_v32, %v1086_v48  ;;  %v1082_v17 = vmul.f32 %v2217_v9, %v1075_v3 }
 0x5a6   :  { %v1045_v10 = vadd.f32 %v1043_v35, %v1032_v22  ;;  %v1070_v55 = vadd.f32 %v1068_v12, %v1057_v59 }
 0x5a7   :  { %v1099_v8 = vpop.permute.xlu0 %1098  ;;  %v1088_v25 = vpop.permute.xlu1 %1087 }
 0x5a8   :  { %v1058_v24 = vadd.f32 %v1056_v39, %v1045_v10  ;;  %v1083_v2 = vadd.f32 %v1081_v13, %v1070_v55  ;;  %v1107_v23 = vmul.f32 %v2219_v56, %v1099_v8  ;;  %v1095_v14 = vmul.f32 %v2218_v32, %v1088_v25 }
 0x5aa   :  { %v1071_v1 = vadd.f32 %v1069_v19, %v1058_v24  ;;  %v1096_v41 = vadd.f32 %v1094_v38, %v1083_v2 }
 0x5ab   :  { %v1112_v30 = vpop.permute.xlu0 %1111  ;;  %v1101_v54 = vpop.permute.xlu1 %1100 }
 0x5ac   :  { %v1084_v0 = vadd.f32 %v1082_v17, %v1071_v1  ;;  %v1109_v42 = vadd.f32 %v1107_v23, %v1096_v41  ;;  %v1120_v45 = vmul.f32 %v2220_v36, %v1112_v30  ;;  %v1108_v50 = vmul.f32 %v2219_v56, %v1101_v54 }
 0x5ae   :  { %v1097_v43 = vadd.f32 %v1095_v14, %v1084_v0  ;;  %v1122_v27 = vadd.f32 %v1120_v45, %v1109_v42 }
 0x5af   :  { %v1114_v57 = vpop.permute.xlu1 %1113 }
 0x5b0   :  { %v1110_v44 = vadd.f32 %v1108_v50, %v1097_v43  ;;  %v1121_v61 = vmul.f32 %v2220_v36, %v1114_v57  ;;  %1124 = vrot.lane.b32.xlu0 %v1122_v27, %s2445_s27 }
 0x5b2   :  { %v1123_v47 = vadd.f32 %v1121_v61, %v1110_v44 }
 0x5b4   :  { %1128 = vrot.lane.b32.xlu0 %v1122_v27, %s2444_s26  ;;  %1126 = vrot.lane.b32.xlu1 %v1123_v47, %s2445_s27 }
 0x5b8   :  { %1130 = vrot.lane.b32.xlu1 %v1123_v47, %s2444_s26 }
 0x622   :  { %v1125_v33 = vpop.permute.xlu0 %1124 }
 0x626   :  { %v1129_v58 = vpop.permute.xlu0 %1128  ;;  %v1127_v16 = vpop.permute.xlu1 %1126 }
 0x627   :  { %v1132_v6 = vsel %vm2586_vm0, %v1125_v33, %v1129_v58 }
 0x628   :  { %v1134_v11 = vadd.f32 %v1132_v6, %v1122_v27 }
 0x62a   :  { %1136 = vrot.lane.b32.xlu0 %v1134_v11, %s2446_s5  ;;  %v1131_v63 = vpop.permute.xlu1 %1130 }
 0x62b   :  { %v1133_v37 = vsel %vm2586_vm0, %v1127_v16, %v1131_v63 }
 0x62c   :  { %v1135_v5 = vadd.f32 %v1133_v37, %v1123_v47 }
 0x62e   :  { %1140 = vrot.lane.b32.xlu0 %v1134_v11, %s2447_s28  ;;  %1138 = vrot.lane.b32.xlu1 %v1135_v5, %s2446_s5 }
 0x632   :  { %1142 = vrot.lane.b32.xlu1 %v1135_v5, %s2447_s28 }
 0x69c   :  { %v1137_v49 = vpop.permute.xlu0 %1136 }
 0x6a0   :  { %v1141_v52 = vpop.permute.xlu0 %1140  ;;  %v1139_v34 = vpop.permute.xlu1 %1138 }
 0x6a1   :  { %v1144_v26 = vsel %vm2600_vm1, %v1137_v49, %v1141_v52 }
 0x6a2   :  { %v1146_v40 = vadd.f32 %v1144_v26, %v1134_v11 }
 0x6a4   :  { %1148 = vrot.lane.b32.xlu0 %v1146_v40, %s2448_s29  ;;  %v1143_v51 = vpop.permute.xlu1 %1142 }
 0x6a5   :  { %v1145_v62 = vsel %vm2600_vm1, %v1139_v34, %v1143_v51  ;;  %v2221_v51 = vld [vmem:[%s3693_s7] ss:$0 sm:$0xff]  ;;  %s3774_s7 = smov 113  }
 0x6a6   :  { %v1147_v7 = vadd.f32 %v1145_v62, %v1135_v5 }
 0x6a8   :  { %1152 = vrot.lane.b32.xlu0 %v1146_v40, %s2449_s30  ;;  %1150 = vrot.lane.b32.xlu1 %v1147_v7, %s2448_s29 }
 0x6ac   :  { %1154 = vrot.lane.b32.xlu1 %v1147_v7, %s2449_s30 }
 0x716   :  { %v1149_v53 = vpop.permute.xlu0 %1148 }
 0x71a   :  { %v1153_v60 = vpop.permute.xlu0 %1152  ;;  %v1151_v15 = vpop.permute.xlu1 %1150 }
 0x71b   :  { %v1156_v28 = vsel %vm2612_vm2, %v1149_v53, %v1153_v60 }
 0x71c   :  { %v1158_v20 = vadd.f32 %v1156_v28, %v1146_v40 }
 0x71e   :  { %1160 = vrot.lane.b32.xlu0 %v1158_v20, %s2450_s11  ;;  %v1155_v31 = vpop.permute.xlu1 %1154 }
 0x71f   :  { %v1157_v21 = vsel %vm2612_vm2, %v1151_v15, %v1155_v31 }
 0x720   :  { %v1159_v4 = vadd.f32 %v1157_v21, %v1147_v7  ;;  %v2222_v7 = vld [vmem:[%s3694_s8] ss:$0 sm:$0xff]  ;;  %s3775_s8 = smov 112  }
 0x722   :  { %1164 = vrot.lane.b32.xlu0 %v1158_v20, %s2442_s22  ;;  %1162 = vrot.lane.b32.xlu1 %v1159_v4, %s2450_s11 }
 0x726   :  { %1166 = vrot.lane.b32.xlu1 %v1159_v4, %s2442_s22 }
 0x790   :  { %v1161_v9 = vpop.permute.xlu0 %1160 }
 0x794   :  { %v1165_v48 = vpop.permute.xlu0 %1164  ;;  %v1163_v3 = vpop.permute.xlu1 %1162 }
 0x795   :  { %v1168_v59 = vsel %vm2624_vm3, %v1161_v9, %v1165_v48 }
 0x796   :  { %v1170_v35 = vadd.f32 %v1168_v59, %v1158_v20 }
 0x798   :  { %v1172_v12 = vmul.f32 0.0625, %v1170_v35  ;;  %v1167_v32 = vpop.permute.xlu1 %1166 }
 0x799   :  { %v1169_v10 = vsel %vm2624_vm3, %v1163_v3, %v1167_v32 }
 0x79a   :  { %v1174_v55 = vsub.f32 %v1122_v27, %v1172_v12  ;;  %v1171_v39 = vadd.f32 %v1169_v10, %v1159_v4 }
 0x79c   :  { %v1176_v13 = vmul.f32 %v1174_v55, %v1174_v55  ;;  %v1173_v56 = vmul.f32 0.0625, %v1171_v39 }
 0x79e   :  { %v3175_v8 = vsub.f32 %v1123_v47, %v1173_v56  ;;  %1178 = vrot.lane.b32.xlu0 %v1176_v13, %s2445_s27 }
 0x7a0   :  { %v1177_v25 = vmul.f32 %v3175_v8, %v3175_v8 }
 0x7a2   :  { %1182 = vrot.lane.b32.xlu0 %v1176_v13, %s2444_s26  ;;  %1180 = vrot.lane.b32.xlu1 %v1177_v25, %s2445_s27 }
 0x7a6   :  { %1184 = vrot.lane.b32.xlu1 %v1177_v25, %s2444_s26 }
 0x810   :  { %v1179_v24 = vpop.permute.xlu0 %1178 }
 0x814   :  { %v1183_v2 = vpop.permute.xlu0 %1182  ;;  %v1181_v19 = vpop.permute.xlu1 %1180 }
 0x815   :  { %v1186_v38 = vsel %vm2586_vm0, %v1179_v24, %v1183_v2 }
 0x816   :  { %v1188_v36 = vadd.f32 %v1186_v38, %v1176_v13 }
 0x818   :  { %1190 = vrot.lane.b32.xlu0 %v1188_v36, %s2446_s5  ;;  %v1185_v1 = vpop.permute.xlu1 %1184 }
 0x819   :  { %v1187_v41 = vsel %vm2586_vm0, %v1181_v19, %v1185_v1 }
 0x81a   :  { %v1189_v17 = vadd.f32 %v1187_v41, %v1177_v25 }
 0x81c   :  { %1194 = vrot.lane.b32.xlu0 %v1188_v36, %s2447_s28  ;;  %1192 = vrot.lane.b32.xlu1 %v1189_v17, %s2446_s5 }
 0x820   :  { %1196 = vrot.lane.b32.xlu1 %v1189_v17, %s2447_s28 }
 0x88a   :  { %v1191_v23 = vpop.permute.xlu0 %1190 }
 0x88e   :  { %v1195_v30 = vpop.permute.xlu0 %1194  ;;  %v1193_v54 = vpop.permute.xlu1 %1192 }
 0x88f   :  { %v1198_v0 = vsel %vm2600_vm1, %v1191_v23, %v1195_v30 }
 0x890   :  { %v1200_v42 = vadd.f32 %v1198_v0, %v1188_v36 }
 0x892   :  { %1202 = vrot.lane.b32.xlu0 %v1200_v42, %s2448_s29  ;;  %v1197_v14 = vpop.permute.xlu1 %1196 }
 0x893   :  { %v1199_v45 = vsel %vm2600_vm1, %v1193_v54, %v1197_v14 }
 0x894   :  { %v1201_v43 = vadd.f32 %v1199_v45, %v1189_v17 }
 0x896   :  { %1206 = vrot.lane.b32.xlu0 %v1200_v42, %s2449_s30  ;;  %1204 = vrot.lane.b32.xlu1 %v1201_v43, %s2448_s29 }
 0x89a   :  { %1208 = vrot.lane.b32.xlu1 %v1201_v43, %s2449_s30 }
 0x904   :  { %v1203_v27 = vpop.permute.xlu0 %1202 }
 0x908   :  { %v1207_v50 = vpop.permute.xlu0 %1206  ;;  %v1205_v57 = vpop.permute.xlu1 %1204 }
 0x909   :  { %v1210_v44 = vsel %vm2612_vm2, %v1203_v27, %v1207_v50 }
 0x90a   :  { %v1212_v61 = vadd.f32 %v1210_v44, %v1200_v42 }
 0x90c   :  { %1214 = vrot.lane.b32.xlu0 %v1212_v61, %s2450_s11  ;;  %v1209_v47 = vpop.permute.xlu1 %1208 }
 0x90d   :  { %v1211_v33 = vsel %vm2612_vm2, %v1205_v57, %v1209_v47 }
 0x90e   :  { %v1213_v58 = vadd.f32 %v1211_v33, %v1201_v43 }
 0x910   :  { %1218 = vrot.lane.b32.xlu0 %v1212_v61, %s2442_s22  ;;  %1216 = vrot.lane.b32.xlu1 %v1213_v58, %s2450_s11 }
 0x914   :  { %1220 = vrot.lane.b32.xlu1 %v1213_v58, %s2442_s22 }
 0x97e   :  { %v1215_v16 = vpop.permute.xlu0 %1214 }
 0x982   :  { %v1219_v46 = vpop.permute.xlu0 %1218  ;;  %v1217_v6 = vpop.permute.xlu1 %1216 }
 0x983   :  { %v1222_v11 = vsel %vm2624_vm3, %v1215_v16, %v1219_v46 }
 0x984   :  { %v1224_v63 = vadd.f32 %v1222_v11, %v1212_v61  ;;  %v3772_v61 = vmov -1.0  }
 0x986   :  { %v1226_v37 = vmul.f32 0.0625, %v1224_v63  ;;  %v1221_v5 = vpop.permute.xlu1 %1220 }
 0x987   :  { %v1223_v49 = vsel %vm2624_vm3, %v1217_v6, %v1221_v5 }
 0x988   :  { %v1228_v52 = vadd.f32 1e-05, %v1226_v37  ;;  %v1225_v34 = vadd.f32 %v1223_v49, %v1213_v58 }
 0x98a   :  { %2331 = vrsqrt.f32 %v1228_v52  ;;  %v1227_v18 = vmul.f32 0.0625, %v1225_v34 }
 0x98c   :  { %v1229_v26 = vadd.f32 1e-05, %v1227_v18 }
 0x98e   :  { %2333 = vrsqrt.f32 %v1229_v26  ;;  %v2224_v26 = vld [vmem:[#allocation7] ss:$0 sm:$0xff] }
 0x994   :  { %v2332_v40 = vpop.eup %2331 }
 0x995   :  { %v1232_v62 = vmul.f32 %v2332_v40, %v1174_v55 }
 0x997   :  { %v1241_v53 = vmul.f32 %v2221_v51, %v1232_v62 }
 0x998   :  { %v2334_v60 = vpop.eup %2333 }
 0x999   :  { %v1250_v15 = vadd.f32 %v2222_v7, %v1241_v53  ;;  %v1233_v29 = vmul.f32 %v2334_v60, %v3175_v8 }
 0x99b   :  { %v1254_v28 = vmul.f32 0.70710677, %v1250_v15  ;;  %v1242_v20 = vmul.f32 %v2221_v51, %v1233_v29  ;;  %v1252_v16 = vmul.f32 0.5, %v1250_v15 }
 0x99d   :  { %v1260_v31 = vand.u32 2147483647, %v1254_v28  ;;  %v1251_v21 = vadd.f32 %v2222_v7, %v1242_v20  ;;  %vm1256_vm10 = vcmp.ge.f32.partialorder %v1254_v28, 0.0 }
 0x99e   :  { %v1258_v47 = vsel %vm1256_vm10, 1.0, %v3772_v61 }
 0x99f   :  { %v1262_v4 = vmul.f32 0.3275911, %v1260_v31  ;;  %v1255_v9 = vmul.f32 0.70710677, %v1251_v21  ;;  %v1288_v35 = vsub.f32 0.0, %v1260_v31  ;;  %v1253_v5 = vmul.f32 0.5, %v1251_v21 }
 0x9a1   :  { %v1264_v48 = vadd.f32 1.0, %v1262_v4  ;;  %v1261_v3 = vand.u32 2147483647, %v1255_v9  ;;  %v1290_v32 = vmul.f32 %v1288_v35, %v1260_v31  ;;  %vm1257_vm11 = vcmp.ge.f32.partialorder %v1255_v9, 0.0 }
 0x9a2   :  { %v1259_v11 = vsel %vm1257_vm11, 1.0, %v3772_v61 }
 0x9a3   :  { %2335 = vrcp.f32 %v1264_v48  ;;  %v1263_v22 = vmul.f32 0.3275911, %v1261_v3  ;;  %v1289_v10 = vsub.f32 0.0, %v1261_v3  ;;  %v1292_v56 = vmul.f32 1.442695, %v1290_v32 }
 0x9a5   :  { %v1265_v59 = vadd.f32 1.0, %v1263_v22  ;;  %v1291_v8 = vmul.f32 %v1289_v10, %v1261_v3 }
 0x9a7   :  { %2337 = vrcp.f32 %v1265_v59  ;;  %v1294_v38 = vmul.f32 1.442695, %v1291_v8 }
 0x9a8   :  { %2339 = vpow2.f32 %v1292_v56 }
 0x9a9   :  { %2341 = vpow2.f32 %v1294_v38 }
 0x9ad   :  { %v2336_v12 = vpop.eup %2335 }
 0x9ae   :  { %v1270_v55 = vmul.f32 1.0614054, %v2336_v12 }
 0x9b0   :  { %v1272_v39 = vadd.f32 -1.4531521, %v1270_v55 }
 0x9b1   :  { %v2338_v13 = vpop.eup %2337 }
 0x9b2   :  { %v1274_v25 = vmul.f32 %v2336_v12, %v1272_v39  ;;  %v1271_v24 = vmul.f32 1.0614054, %v2338_v13  ;;  %v2340_v45 = vpop.eup %2339 }
 0x9b3   :  { %v2342_v44 = vpop.eup %2341 }
 0x9b4   :  { %v1276_v2 = vadd.f32 1.4214138, %v1274_v25  ;;  %v1273_v19 = vadd.f32 -1.4531521, %v1271_v24 }
 0x9b6   :  { %v1278_v36 = vmul.f32 %v2336_v12, %v1276_v2  ;;  %v1275_v1 = vmul.f32 %v2338_v13, %v1273_v19 }
 0x9b8   :  { %v1280_v41 = vadd.f32 -0.28449672, %v1278_v36  ;;  %v1277_v17 = vadd.f32 1.4214138, %v1275_v1  ;;  %v2226_v1 = vld [vmem:[#allocation7 + $0x2] ss:$0 sm:$0xff] }
 0x9ba   :  { %v1282_v23 = vmul.f32 %v2336_v12, %v1280_v41  ;;  %v1279_v30 = vmul.f32 %v2338_v13, %v1277_v17 }
 0x9bc   :  { %v1284_v54 = vadd.f32 0.2548296, %v1282_v23  ;;  %v1281_v0 = vadd.f32 -0.28449672, %v1279_v30 }
 0x9be   :  { %v1286_v42 = vmul.f32 %v2336_v12, %v1284_v54  ;;  %v1283_v14 = vmul.f32 %v2338_v13, %v1281_v0 }
 0x9c0   :  { %v1296_v43 = vmul.f32 %v2340_v45, %v1286_v42  ;;  %v1285_v27 = vadd.f32 0.2548296, %v1283_v14 }
 0x9c2   :  { %v1298_v50 = vsub.f32 1.0, %v1296_v43  ;;  %v1287_v57 = vmul.f32 %v2338_v13, %v1285_v27 }
 0x9c4   :  { %v1300_v33 = vmul.f32 %v1298_v50, %v1258_v47  ;;  %v1297_v58 = vmul.f32 %v2342_v44, %v1287_v57 }
 0x9c6   :  { %v1302_v46 = vadd.f32 1.0, %v1300_v33  ;;  %v1299_v6 = vsub.f32 1.0, %v1297_v58 }
 0x9c8   :  { %v3220_v63 = vmul.f32 %v1302_v46, %v1252_v16  ;;  %v1301_v37 = vmul.f32 %v1299_v6, %v1259_v11 }
 0x9ca   :  { %v1303_v49 = vadd.f32 1.0, %v1301_v37  ;;  %1589 = vrot.lane.b32.xlu0 %v3220_v63, %s2452_s3  ;;  %v1314_v18 = vrot.slane %v3220_v63, 7  ;;  %v1858_v8 = vrot.slane %v3220_v63, 1 }
 0x9cc   :  { %v3224_v52 = vmul.f32 %v1303_v49, %v1253_v5 }
 0x9ce   :  { %3773 = vst [vmem:[#allocation21_spill] sm:$0xff] %v3224_v52  ;;  %1602 = vrot.lane.b32.xlu0 %v3220_v63, %s2453_s4  ;;  %1591 = vrot.lane.b32.xlu1 %v3224_v52, %s2452_s3  ;;  %v1315_v34 = vrot.slane %v3224_v52, 7  ;;  %v1859_v56 = vrot.slane %v3224_v52, 1 }
 0x9d0   :  { %v1317_v40 = vsel %vm297_vm6, %v1315_v34, %v1314_v18  ;;  %v3312_v7 = vsel %vm297_vm6, %v1314_v18, %v1315_v34  ;;  %v3444_v2 = vsel %vm846_vm8, %v1858_v8, %v1859_v56  ;;  %v1861_v19 = vsel %vm846_vm8, %v1859_v56, %v1858_v8  ;;  %v2225_v56 = vld [vmem:[#allocation7 + $0x1] ss:$0 sm:$0xff] }
 0x9d1   :  { %v3304_v62 = vsel %vm91_vm7, %v1317_v40, 0.0  ;;  %v3458_v41 = vsel %vm102_vm9, %v1861_v19, 0.0  ;;  %v2223_v19 = vld [vmem:[%s3692_s6] ss:$0 sm:$0xff]  ;;  %s2470_s6 = smov [#allocation8]  }
 0x9d2   :  { %1615 = vrot.lane.b32.xlu0 %v3220_v63, %s2454_s15  ;;  %1604 = vrot.lane.b32.xlu1 %v3224_v52, %s2453_s4 }
 0x9d6   :  { %1628 = vrot.lane.b32.xlu0 %v3220_v63, %s2455_s16  ;;  %1617 = vrot.lane.b32.xlu1 %v3224_v52, %s2454_s15 }
 0x9da   :  { %1641 = vrot.lane.b32.xlu0 %v3220_v63, %s2456_s17  ;;  %1630 = vrot.lane.b32.xlu1 %v3224_v52, %s2455_s16 }
 0x9de   :  { %1654 = vrot.lane.b32.xlu0 %v3220_v63, %s2457_s18  ;;  %1643 = vrot.lane.b32.xlu1 %v3224_v52, %s2456_s17 }
 0x9e2   :  { %1667 = vrot.lane.b32.xlu0 %v3220_v63, %s2458_s19  ;;  %1656 = vrot.lane.b32.xlu1 %v3224_v52, %s2457_s18 }
 0x9e6   :  { %1680 = vrot.lane.b32.xlu0 %v3220_v63, %s2459_s20  ;;  %1669 = vrot.lane.b32.xlu1 %v3224_v52, %s2458_s19 }
 0x9ea   :  { %1693 = vrot.lane.b32.xlu0 %v3220_v63, %s2460_s23  ;;  %1682 = vrot.lane.b32.xlu1 %v3224_v52, %s2459_s20 }
 0x9ee   :  { %1706 = vrot.lane.b32.xlu0 %v3220_v63, %s2444_s26  ;;  %1695 = vrot.lane.b32.xlu1 %v3224_v52, %s2460_s23 }
 0x9f2   :  { %1728 = vrot.lane.b32.xlu0 %v3220_v63, %s2445_s27  ;;  %1708 = vrot.lane.b32.xlu1 %v3224_v52, %s2444_s26 }
 0x9f6   :  { %1741 = vrot.lane.b32.xlu0 %v3220_v63, %s3774_s7  ;;  %1730 = vrot.lane.b32.xlu1 %v3224_v52, %s2445_s27 }
 0x9fa   :  { %1754 = vrot.lane.b32.xlu0 %v3220_v63, %s3775_s8  ;;  %1743 = vrot.lane.b32.xlu1 %v3224_v52, %s3774_s7 }
 0x9fe   :  { %1767 = vrot.lane.b32.xlu0 %v3220_v63, %s2463_s0  ;;  %1756 = vrot.lane.b32.xlu1 %v3224_v52, %s3775_s8 }
 0xa02   :  { %1780 = vrot.lane.b32.xlu0 %v3220_v63, %s2464_s12  ;;  %1769 = vrot.lane.b32.xlu1 %v3224_v52, %s2463_s0 }
 0xa06   :  { %1793 = vrot.lane.b32.xlu0 %v3220_v63, %s2465_s13  ;;  %1782 = vrot.lane.b32.xlu1 %v3224_v52, %s2464_s12 }
 0xa0a   :  { %1806 = vrot.lane.b32.xlu0 %v3220_v63, %s2466_s1  ;;  %1795 = vrot.lane.b32.xlu1 %v3224_v52, %s2465_s13 }
 0xa0e   :  { %1819 = vrot.lane.b32.xlu0 %v3220_v63, %s2467_s10  ;;  %1808 = vrot.lane.b32.xlu1 %v3224_v52, %s2466_s1 }
 0xa12   :  { %1832 = vrot.lane.b32.xlu0 %v3220_v63, %s2468_s14  ;;  %1821 = vrot.lane.b32.xlu1 %v3224_v52, %s2467_s10 }
 0xa16   :  { %1834 = vrot.lane.b32.xlu1 %v3224_v52, %s2468_s14  ;;  %1320 = vrot.lane.b32.xlu0 %v3304_v62, %s2452_s3 }
 0xa1a   :  { %1333 = vrot.lane.b32.xlu0 %v3304_v62, %s2453_s4  ;;  %1322 = vrot.lane.b32.xlu1 %v3312_v7, %s2452_s3 }
 0xa1e   :  { %1346 = vrot.lane.b32.xlu0 %v3304_v62, %s2454_s15  ;;  %1335 = vrot.lane.b32.xlu1 %v3312_v7, %s2453_s4 }
 0xa22   :  { %1359 = vrot.lane.b32.xlu0 %v3304_v62, %s2455_s16  ;;  %1348 = vrot.lane.b32.xlu1 %v3312_v7, %s2454_s15 }
 0xa26   :  { %1372 = vrot.lane.b32.xlu0 %v3304_v62, %s2456_s17  ;;  %1361 = vrot.lane.b32.xlu1 %v3312_v7, %s2455_s16 }
 0xa2a   :  { %1385 = vrot.lane.b32.xlu0 %v3304_v62, %s2457_s18  ;;  %1374 = vrot.lane.b32.xlu1 %v3312_v7, %s2456_s17 }
 0xa2e   :  { %1398 = vrot.lane.b32.xlu0 %v3304_v62, %s2458_s19  ;;  %1387 = vrot.lane.b32.xlu1 %v3312_v7, %s2457_s18 }
 0xa32   :  { %1411 = vrot.lane.b32.xlu0 %v3304_v62, %s2459_s20  ;;  %1400 = vrot.lane.b32.xlu1 %v3312_v7, %s2458_s19 }
 0xa36   :  { %1424 = vrot.lane.b32.xlu0 %v3304_v62, %s2460_s23  ;;  %1413 = vrot.lane.b32.xlu1 %v3312_v7, %s2459_s20 }
 0xa3a   :  { %1437 = vrot.lane.b32.xlu0 %v3304_v62, %s2444_s26  ;;  %1426 = vrot.lane.b32.xlu1 %v3312_v7, %s2460_s23 }
 0xa3c   :  { %v3350_v53 = vpop.permute.xlu0 %1589 }
 0xa3e   :  { %1459 = vrot.lane.b32.xlu0 %v3304_v62, %s2445_s27  ;;  %1439 = vrot.lane.b32.xlu1 %v3312_v7, %s2444_s26 }
 0xa40   :  { %v3356_v60 = vpop.permute.xlu0 %1602  ;;  %v3358_v15 = vpop.permute.xlu1 %1591 }
 0xa42   :  { %1472 = vrot.lane.b32.xlu0 %v3304_v62, %s3774_s7  ;;  %1461 = vrot.lane.b32.xlu1 %v3312_v7, %s2445_s27 }
 0xa44   :  { %v3364_v29 = vpop.permute.xlu0 %1615  ;;  %v3366_v28 = vpop.permute.xlu1 %1604 }
 0xa46   :  { %1485 = vrot.lane.b32.xlu0 %v3304_v62, %s3775_s8  ;;  %1474 = vrot.lane.b32.xlu1 %v3312_v7, %s3774_s7 }
 0xa48   :  { %v3372_v20 = vpop.permute.xlu0 %1628  ;;  %v3374_v31 = vpop.permute.xlu1 %1617 }
 0xa4a   :  { %1498 = vrot.lane.b32.xlu0 %v3304_v62, %s2463_s0  ;;  %1487 = vrot.lane.b32.xlu1 %v3312_v7, %s3775_s8 }
 0xa4c   :  { %v3380_v21 = vpop.permute.xlu0 %1641  ;;  %v3382_v4 = vpop.permute.xlu1 %1630 }
 0xa4e   :  { %1511 = vrot.lane.b32.xlu0 %v3304_v62, %s2464_s12  ;;  %1500 = vrot.lane.b32.xlu1 %v3312_v7, %s2463_s0 }
 0xa50   :  { %v3388_v9 = vpop.permute.xlu0 %1654  ;;  %v3390_v48 = vpop.permute.xlu1 %1643 }
 0xa52   :  { %1524 = vrot.lane.b32.xlu0 %v3304_v62, %s2465_s13  ;;  %1513 = vrot.lane.b32.xlu1 %v3312_v7, %s2464_s12 }
 0xa54   :  { %v3396_v3 = vpop.permute.xlu0 %1667  ;;  %v3398_v22 = vpop.permute.xlu1 %1656 }
 0xa56   :  { %1537 = vrot.lane.b32.xlu0 %v3304_v62, %s2466_s1  ;;  %1526 = vrot.lane.b32.xlu1 %v3312_v7, %s2465_s13 }
 0xa58   :  { %v3404_v59 = vpop.permute.xlu0 %1680  ;;  %v3406_v35 = vpop.permute.xlu1 %1669 }
 0xa5a   :  { %1550 = vrot.lane.b32.xlu0 %v3304_v62, %s2467_s10  ;;  %1539 = vrot.lane.b32.xlu1 %v3312_v7, %s2466_s1 }
 0xa5c   :  { %v3412_v12 = vpop.permute.xlu0 %1693  ;;  %v3414_v32 = vpop.permute.xlu1 %1682 }
 0xa5e   :  { %1563 = vrot.lane.b32.xlu0 %v3304_v62, %s2468_s14  ;;  %1552 = vrot.lane.b32.xlu1 %v3312_v7, %s2467_s10 }
 0xa60   :  { %v3420_v10 = vpop.permute.xlu0 %1706  ;;  %v3422_v55 = vpop.permute.xlu1 %1695 }
 0xa62   :  { %1576 = vrot.lane.b32.xlu0 %v3304_v62, %s2469_s21  ;;  %1565 = vrot.lane.b32.xlu1 %v3312_v7, %s2468_s14 }
 0xa64   :  { %v3428_v39 = vpop.permute.xlu0 %1728  ;;  %v3430_v13 = vpop.permute.xlu1 %1708 }
 0xa66   :  { %1845 = vrot.lane.b32.xlu0 %v3220_v63, %s2469_s21  ;;  %1578 = vrot.lane.b32.xlu1 %v3312_v7, %s2469_s21 }
 0xa68   :  { %v3438_v25 = vpop.permute.xlu0 %1741  ;;  %v3440_v24 = vpop.permute.xlu1 %1730 }
 0xa69   :  { %3778 = vst [vmem:[#allocation16_spill] sm:$0xff] %v3438_v25  ;;  %3779 = vst [vmem:[#allocation20_spill] sm:$0xff] %v3440_v24 }
 0xa6a   :  { %1864 = vrot.lane.b32.xlu0 %v3444_v2, %s2452_s3  ;;  %1847 = vrot.lane.b32.xlu1 %v3224_v52, %s2469_s21 }
 0xa6c   :  { %v3452_v38 = vpop.permute.xlu0 %1754  ;;  %v3454_v36 = vpop.permute.xlu1 %1743 }
 0xa6d   :  { %3780 = vst [vmem:[#allocation23_spill] sm:$0xff] %v3452_v38  ;;  %3781 = vst [vmem:[#allocation22_spill] sm:$0xff] %v3454_v36 }
 0xa6e   :  { %1877 = vrot.lane.b32.xlu0 %v3444_v2, %s2453_s4  ;;  %1866 = vrot.lane.b32.xlu1 %v3458_v41, %s2452_s3 }
 0xa70   :  { %v3464_v17 = vpop.permute.xlu0 %1767  ;;  %v3466_v23 = vpop.permute.xlu1 %1756 }
 0xa71   :  { %3783 = vst [vmem:[#allocation25_spill] sm:$0xff] %v3464_v17  ;;  %3784 = vst [vmem:[#allocation24_spill] sm:$0xff] %v3466_v23  ;;  %v2229_v17 = vld [vmem:[#allocation7 + $0x5] ss:$0 sm:$0xff] }
 0xa72   :  { %1890 = vrot.lane.b32.xlu0 %v3444_v2, %s2454_s15  ;;  %1879 = vrot.lane.b32.xlu1 %v3458_v41, %s2453_s4 }
 0xa74   :  { %v3472_v30 = vpop.permute.xlu0 %1780  ;;  %v3474_v54 = vpop.permute.xlu1 %1769 }
 0xa75   :  { %3785 = vst [vmem:[#allocation27_spill] sm:$0xff] %v3472_v30  ;;  %3786 = vst [vmem:[#allocation26_spill] sm:$0xff] %v3474_v54 }
 0xa76   :  { %1903 = vrot.lane.b32.xlu0 %v3444_v2, %s2455_s16  ;;  %1892 = vrot.lane.b32.xlu1 %v3458_v41, %s2454_s15 }
 0xa78   :  { %v3480_v0 = vpop.permute.xlu0 %1793  ;;  %v3482_v42 = vpop.permute.xlu1 %1782 }
 0xa79   :  { %3787 = vst [vmem:[#allocation29_spill] sm:$0xff] %v3480_v0  ;;  %3788 = vst [vmem:[#allocation28_spill] sm:$0xff] %v3482_v42  ;;  %v2228_v42 = vld [vmem:[#allocation7 + $0x4] ss:$0 sm:$0xff] }
 0xa7a   :  { %1916 = vrot.lane.b32.xlu0 %v3444_v2, %s2456_s17  ;;  %1905 = vrot.lane.b32.xlu1 %v3458_v41, %s2455_s16 }
 0xa7c   :  { %v3488_v14 = vpop.permute.xlu0 %1806  ;;  %v3490_v45 = vpop.permute.xlu1 %1795 }
 0xa7d   :  { %3789 = vst [vmem:[#allocation31_spill] sm:$0xff] %v3488_v14  ;;  %3790 = vst [vmem:[#allocation30_spill] sm:$0xff] %v3490_v45 }
 0xa7e   :  { %1929 = vrot.lane.b32.xlu0 %v3444_v2, %s2457_s18  ;;  %1918 = vrot.lane.b32.xlu1 %v3458_v41, %s2456_s17 }
 0xa80   :  { %v3496_v43 = vpop.permute.xlu0 %1819  ;;  %v3498_v27 = vpop.permute.xlu1 %1808 }
 0xa81   :  { %3791 = vst [vmem:[#allocation33_spill] sm:$0xff] %v3496_v43  ;;  %3792 = vst [vmem:[#allocation32_spill] sm:$0xff] %v3498_v27  ;;  %v2227_v27 = vld [vmem:[#allocation7 + $0x3] ss:$0 sm:$0xff] }
 0xa82   :  { %1942 = vrot.lane.b32.xlu0 %v3444_v2, %s2458_s19  ;;  %1931 = vrot.lane.b32.xlu1 %v3458_v41, %s2457_s18 }
 0xa84   :  { %v3504_v50 = vpop.permute.xlu0 %1832  ;;  %v3506_v57 = vpop.permute.xlu1 %1821 }
 0xa85   :  { %3793 = vst [vmem:[#allocation35_spill] sm:$0xff] %v3504_v50  ;;  %3794 = vst [vmem:[#allocation34_spill] sm:$0xff] %v3506_v57 }
 0xa86   :  { %1955 = vrot.lane.b32.xlu0 %v3444_v2, %s2459_s20  ;;  %1944 = vrot.lane.b32.xlu1 %v3458_v41, %s2458_s19 }
 0xa88   :  { %v3512_v44 = vpop.permute.xlu1 %1834  ;;  %v1321_v61 = vpop.permute.xlu0 %1320 }
 0xa89   :  { %3795 = vst [vmem:[#allocation36_spill] sm:$0xff] %v3512_v44  ;;  %v1329_v8 = vmul.f32 %v2224_v26, %v1321_v61 }
 0xa8a   :  { %1968 = vrot.lane.b32.xlu0 %v3444_v2, %s2460_s23  ;;  %1957 = vrot.lane.b32.xlu1 %v3458_v41, %s2459_s20 }
 0xa8b   :  { %v1331_v43 = vadd.f32 %v2223_v19, %v1329_v8  ;;  %v2230_v8 = vld [vmem:[#allocation7 + $0x6] ss:$0 sm:$0xff] }
 0xa8c   :  { %v1334_v47 = vpop.permute.xlu0 %1333  ;;  %v1323_v33 = vpop.permute.xlu1 %1322 }
 0xa8d   :  { %v1342_v50 = vmul.f32 %v2225_v56, %v1334_v47  ;;  %v1330_v45 = vmul.f32 %v2224_v26, %v1323_v33 }
 0xa8e   :  { %1981 = vrot.lane.b32.xlu0 %v3444_v2, %s2444_s26  ;;  %1970 = vrot.lane.b32.xlu1 %v3458_v41, %s2460_s23 }
 0xa8f   :  { %v1344_v54 = vadd.f32 %v1342_v50, %v1331_v43  ;;  %v1332_v47 = vadd.f32 %v2223_v19, %v1330_v45  ;;  %v2231_v50 = vld [vmem:[#allocation7 + $0x7] ss:$0 sm:$0xff] }
 0xa90   :  { %v1347_v58 = vpop.permute.xlu0 %1346  ;;  %v1336_v16 = vpop.permute.xlu1 %1335 }
 0xa91   :  { %v1355_v14 = vmul.f32 %v2226_v1, %v1347_v58  ;;  %v1343_v30 = vmul.f32 %v2225_v56, %v1336_v16 }
 0xa92   :  { %2003 = vrot.lane.b32.xlu0 %v3444_v2, %s2445_s27  ;;  %1983 = vrot.lane.b32.xlu1 %v3458_v41, %s2444_s26 }
 0xa93   :  { %v1357_v36 = vadd.f32 %v1355_v14, %v1344_v54  ;;  %v1345_v26 = vadd.f32 %v1343_v30, %v1332_v47  ;;  %v2232_v14 = vld [vmem:[#allocation7 + $0x8] ss:$0 sm:$0xff] }
 0xa94   :  { %v1360_v46 = vpop.permute.xlu0 %1359  ;;  %v1349_v6 = vpop.permute.xlu1 %1348 }
 0xa95   :  { %v1368_v23 = vmul.f32 %v2227_v27, %v1360_v46  ;;  %v1356_v38 = vmul.f32 %v2226_v1, %v1349_v6  ;;  %v2234_v1 = vld [vmem:[#allocation7 + $0xa] ss:$0 sm:$0xff] }
 0xa96   :  { %2016 = vrot.lane.b32.xlu0 %v3444_v2, %s3774_s7  ;;  %2005 = vrot.lane.b32.xlu1 %v3458_v41, %s2445_s27 }
 0xa97   :  { %v1370_v52 = vadd.f32 %v1368_v23, %v1357_v36  ;;  %v1358_v16 = vadd.f32 %v1356_v38, %v1345_v26  ;;  %v2233_v23 = vld [vmem:[#allocation7 + $0x9] ss:$0 sm:$0xff] }
 0xa98   :  { %v1373_v11 = vpop.permute.xlu0 %1372  ;;  %v1362_v37 = vpop.permute.xlu1 %1361 }
 0xa99   :  { %v1381_v24 = vmul.f32 %v2228_v42, %v1373_v11  ;;  %v1369_v25 = vmul.f32 %v2227_v27, %v1362_v37 }
 0xa9a   :  { %2029 = vrot.lane.b32.xlu0 %v3444_v2, %s3775_s8  ;;  %2018 = vrot.lane.b32.xlu1 %v3458_v41, %s3774_s7 }
 0xa9b   :  { %v1383_v46 = vadd.f32 %v1381_v24, %v1370_v52  ;;  %v1371_v56 = vadd.f32 %v1369_v25, %v1358_v16 }
 0xa9c   :  { %v1386_v5 = vpop.permute.xlu0 %1385  ;;  %v1375_v49 = vpop.permute.xlu1 %1374 }
 0xa9d   :  { %v1394_v43 = vmul.f32 %v2229_v17, %v1386_v5  ;;  %v1382_v45 = vmul.f32 %v2228_v42, %v1375_v49 }
 0xa9e   :  { %2042 = vrot.lane.b32.xlu0 %v3444_v2, %s2463_s0  ;;  %2031 = vrot.lane.b32.xlu1 %v3458_v41, %s3775_s8 }
 0xa9f   :  { %v1396_v19 = vadd.f32 %v1394_v43, %v1383_v46  ;;  %v1384_v27 = vadd.f32 %v1382_v45, %v1371_v56  ;;  %v2236_v45 = vld [vmem:[#allocation7 + $0xc] ss:$0 sm:$0xff] }
 0xaa0   :  { %v1399_v34 = vpop.permute.xlu0 %1398  ;;  %v1388_v18 = vpop.permute.xlu1 %1387 }
 0xaa1   :  { %v1407_v54 = vmul.f32 %v2230_v8, %v1399_v34  ;;  %v1395_v30 = vmul.f32 %v2229_v17, %v1388_v18 }
 0xaa2   :  { %2055 = vrot.lane.b32.xlu0 %v3444_v2, %s2464_s12  ;;  %2044 = vrot.lane.b32.xlu1 %v3458_v41, %s2463_s0 }
 0xaa3   :  { %v1409_v37 = vadd.f32 %v1407_v54, %v1396_v19  ;;  %v1397_v5 = vadd.f32 %v1395_v30, %v1384_v27  ;;  %v2237_v19 = vld [vmem:[#allocation7 + $0xd] ss:$0 sm:$0xff]  ;;  %v1456_v30 = vmul.f32 %v2234_v1, %v3312_v7  ;;  %v2241_v7 = vld [vmem:[#allocation7 + $0x11] ss:$0 sm:$0xff] }
 0xaa4   :  { %v1412_v40 = vpop.permute.xlu0 %1411  ;;  %v1401_v51 = vpop.permute.xlu1 %1400 }
 0xaa5   :  { %v1420_v36 = vmul.f32 %v2231_v50, %v1412_v40  ;;  %v1408_v38 = vmul.f32 %v2230_v8, %v1401_v51  ;;  %v2235_v51 = vld [vmem:[#allocation7 + $0xb] ss:$0 sm:$0xff] }
 0xaa6   :  { %2068 = vrot.lane.b32.xlu0 %v3444_v2, %s2465_s13  ;;  %2057 = vrot.lane.b32.xlu1 %v3458_v41, %s2464_s12 }
 0xaa7   :  { %v1422_v49 = vadd.f32 %v1420_v36, %v1409_v37  ;;  %v1410_v17 = vadd.f32 %v1408_v38, %v1397_v5 }
 0xaa8   :  { %v1425_v44 = vpop.permute.xlu0 %1424  ;;  %v1414_v57 = vpop.permute.xlu1 %1413 }
 0xaa9   :  { %v1433_v52 = vmul.f32 %v2232_v14, %v1425_v44  ;;  %v1421_v34 = vmul.f32 %v2231_v50, %v1414_v57  ;;  %v1455_v44 = vmul.f32 %v2234_v1, %v3304_v62 }
 0xaaa   :  { %2081 = vrot.lane.b32.xlu0 %v3444_v2, %s2466_s1  ;;  %2070 = vrot.lane.b32.xlu1 %v3458_v41, %s2465_s13 }
 0xaab   :  { %v1435_v18 = vadd.f32 %v1433_v52, %v1422_v49  ;;  %v1423_v43 = vadd.f32 %v1421_v34, %v1410_v17  ;;  %v2239_v52 = vld [vmem:[#allocation7 + $0xf] ss:$0 sm:$0xff]  ;;  %v2240_v34 = vld [vmem:[#allocation7 + $0x10] ss:$0 sm:$0xff] }
 0xaac   :  { %v1438_v61 = vpop.permute.xlu0 %1437  ;;  %v1427_v0 = vpop.permute.xlu1 %1426 }
 0xaad   :  { %v1446_v25 = vmul.f32 %v2233_v23, %v1438_v61  ;;  %v1434_v40 = vmul.f32 %v2232_v14, %v1427_v0  ;;  %v2238_v14 = vld [vmem:[#allocation7 + $0xe] ss:$0 sm:$0xff] }
 0xaae   :  { %2094 = vrot.lane.b32.xlu0 %v3444_v2, %s2467_s10  ;;  %2083 = vrot.lane.b32.xlu1 %v3458_v41, %s2466_s1 }
 0xaaf   :  { %v1448_v16 = vadd.f32 %v1446_v25, %v1435_v18  ;;  %v1436_v8 = vadd.f32 %v1434_v40, %v1423_v43 }
 0xab0   :  { %v1460_v33 = vpop.permute.xlu0 %1459  ;;  %v1440_v58 = vpop.permute.xlu1 %1439 }
 0xab1   :  { %v1447_v46 = vmul.f32 %v2233_v23, %v1440_v58  ;;  %v1457_v61 = vadd.f32 %v1455_v44, %v1448_v16  ;;  %v1468_v50 = vmul.f32 %v2235_v51, %v1460_v33  ;;  %v2242_v44 = vld [vmem:[#allocation7 + $0x12] ss:$0 sm:$0xff] }
 0xab2   :  { %2107 = vrot.lane.b32.xlu0 %v3444_v2, %s2468_s14  ;;  %2096 = vrot.lane.b32.xlu1 %v3458_v41, %s2467_s10 }
 0xab3   :  { %v1449_v56 = vadd.f32 %v1447_v46, %v1436_v8  ;;  %v1470_v37 = vadd.f32 %v1468_v50, %v1457_v61 }
 0xab4   :  { %v1473_v6 = vpop.permute.xlu0 %1472  ;;  %v1462_v11 = vpop.permute.xlu1 %1461 }
 0xab5   :  { %v1481_v0 = vmul.f32 %v2236_v45, %v1473_v6  ;;  %v1458_v38 = vadd.f32 %v1456_v30, %v1449_v56  ;;  %v1469_v58 = vmul.f32 %v2235_v51, %v1462_v11 }
 0xab6   :  { %2120 = vrot.lane.b32.xlu0 %v3444_v2, %s2469_s21  ;;  %2109 = vrot.lane.b32.xlu1 %v3458_v41, %s2468_s14 }
 0xab7   :  { %v1483_v62 = vadd.f32 %v1481_v0, %v1470_v37  ;;  %v1471_v33 = vadd.f32 %v1469_v58, %v1458_v38 }
 0xab8   :  { %v1486_v24 = vpop.permute.xlu0 %1485  ;;  %v1475_v42 = vpop.permute.xlu1 %1474 }
 0xab9   :  { %v1494_v23 = vmul.f32 %v2237_v19, %v1486_v24  ;;  %v1482_v5 = vmul.f32 %v2236_v45, %v1475_v42 }
 0xaba   :  { %2122 = vrot.lane.b32.xlu1 %v3458_v41, %s2469_s21  ;;  %s2142_s21 = sshll.u32 %s2470_s6, 4  ;;  %s2143_s21 = int_to_ptr.vmem [resolvable:$true] %s2142_s21 }
 0xabb   :  { %v1496_v18 = vadd.f32 %v1494_v23, %v1483_v62  ;;  %v1484_v6 = vadd.f32 %v1482_v5, %v1471_v33  ;;  %v2245_v23 = vld [vmem:[#allocation7 + $0x15] ss:$0 sm:$0xff]  ;;  %v2246_v33 = vld [vmem:[#allocation7 + $0x16] ss:$0 sm:$0xff]  ;;  %s2411_s30 = scalar_lea.vmem %s2143_s21, 256  ;;  %p2416_p11 = scmp.lt.s32.totalorder %s2143_s21, %s2143_s21 }
 0xabc   :  { %v1499_v47 = vpop.permute.xlu0 %1498  ;;  %v1488_v26 = vpop.permute.xlu1 %1487  ;;  %p2412_p10 = scmp.ne.s32.totalorder %s2143_s21, %s2411_s30  ;;  %p2417_p12 = scmp.lt.s32.totalorder %s2411_s30, %s2411_s30 }
 0xabd   :  { %v1507_v49 = vmul.f32 %v2238_v14, %v1499_v47  ;;  %v1495_v40 = vmul.f32 %v2237_v19, %v1488_v26  ;;  %v2243_v47 = vld [vmem:[#allocation7 + $0x13] ss:$0 sm:$0xff] }
 0xabe   :  { %p2418_p13 = por %p2417_p12, %p2416_p11 }
 0xabf   :  { %v1509_v1 = vadd.f32 %v1507_v49, %v1496_v18  ;;  %v1497_v24 = vadd.f32 %v1495_v40, %v1484_v6  ;;  %v2247_v40 = vld [vmem:[#allocation7 + $0x17] ss:$0 sm:$0xff]  ;;  %v1611_v6 = vmul.f32 %v2246_v33, %v3356_v60 }
 0xac0   :  { %v1512_v54 = vpop.permute.xlu0 %1511  ;;  %v1501_v57 = vpop.permute.xlu1 %1500  ;;  %p2419_p0 = pnand %p2418_p13, %p2412_p10 }
 0xac1   :  { %v1520_v43 = vmul.f32 %v2239_v52, %v1512_v54  ;;  %v1508_v16 = vmul.f32 %v2238_v14, %v1501_v57  ;;  %v2244_v57 = vld [vmem:[#allocation7 + $0x14] ss:$0 sm:$0xff] }
 0xac3   :  { %v1522_v51 = vadd.f32 %v1520_v43, %v1509_v1  ;;  %v1510_v45 = vadd.f32 %v1508_v16, %v1497_v24 }
 0xac4   :  { %v1525_v36 = vpop.permute.xlu0 %1524  ;;  %v1514_v27 = vpop.permute.xlu1 %1513 }
 0xac5   :  { %v1533_v46 = vmul.f32 %v2240_v34, %v1525_v36  ;;  %v1521_v61 = vmul.f32 %v2239_v52, %v1514_v27 }
 0xac7   :  { %v1535_v50 = vadd.f32 %v1533_v46, %v1522_v51  ;;  %v1523_v54 = vadd.f32 %v1521_v61, %v1510_v45  ;;  %v2249_v61 = vld [vmem:[#allocation7 + $0x19] ss:$0 sm:$0xff] }
 0xac8   :  { %v1538_v25 = vpop.permute.xlu0 %1537  ;;  %v1527_v17 = vpop.permute.xlu1 %1526 }
 0xac9   :  { %v1546_v42 = vmul.f32 %v2241_v7, %v1538_v25  ;;  %v1534_v56 = vmul.f32 %v2240_v34, %v1527_v17  ;;  %v1598_v34 = vmul.f32 %v2245_v23, %v3350_v53 }
 0xacb   :  { %v1548_v19 = vadd.f32 %v1546_v42, %v1535_v50  ;;  %v1536_v14 = vadd.f32 %v1534_v56, %v1523_v54  ;;  %v2250_v56 = vld [vmem:[#allocation7 + $0x1a] ss:$0 sm:$0xff] }
 0xacc   :  { %v1551_v8 = vpop.permute.xlu0 %1550  ;;  %v1540_v11 = vpop.permute.xlu1 %1539 }
 0xacd   :  { %v1559_v30 = vmul.f32 %v2242_v44, %v1551_v8  ;;  %v1547_v37 = vmul.f32 %v2241_v7, %v1540_v11  ;;  %v1599_v8 = vmul.f32 %v2245_v23, %v3358_v15  ;;  %v1624_v11 = vmul.f32 %v2247_v40, %v3364_v29 }
 0xace   :  { %v1650_v15 = vmul.f32 %v2249_v61, %v3380_v21 }
 0xacf   :  { %v1561_v36 = vadd.f32 %v1559_v30, %v1548_v19  ;;  %v1549_v27 = vadd.f32 %v1547_v37, %v1536_v14  ;;  %v1625_v30 = vmul.f32 %v2247_v40, %v3374_v31  ;;  %v1651_v14 = vmul.f32 %v2249_v61, %v3390_v48 }
 0xad0   :  { %v1564_v0 = vpop.permute.xlu0 %1563  ;;  %v1553_v26 = vpop.permute.xlu1 %1552 }
 0xad1   :  { %v1572_v38 = vmul.f32 %v2243_v47, %v1564_v0  ;;  %v1560_v58 = vmul.f32 %v2242_v44, %v1553_v26  ;;  %v2248_v44 = vld [vmem:[#allocation7 + $0x18] ss:$0 sm:$0xff]  ;;  %v2251_v26 = vld [vmem:[#allocation7 + $0x1b] ss:$0 sm:$0xff] }
 0xad2   :  { %v1637_v45 = vmul.f32 %v2248_v44, %v3372_v20  ;;  %v1638_v37 = vmul.f32 %v2248_v44, %v3382_v4  ;;  %v1676_v31 = vmul.f32 %v2251_v26, %v3396_v3 }
 0xad3   :  { %v1574_v52 = vadd.f32 %v1572_v38, %v1561_v36  ;;  %v1562_v17 = vadd.f32 %v1560_v58, %v1549_v27  ;;  %v2253_v58 = vld [vmem:[#allocation7 + $0x1d] ss:$0 sm:$0xff] }
 0xad4   :  { %v1577_v62 = vpop.permute.xlu0 %1576  ;;  %v1566_v5 = vpop.permute.xlu1 %1565  ;;  %v1702_v48 = vmul.f32 %v2253_v58, %v3412_v12 }
 0xad5   :  { %v1585_v49 = vmul.f32 %v2244_v57, %v1577_v62  ;;  %v1573_v25 = vmul.f32 %v2243_v47, %v1566_v5  ;;  %v1612_v47 = vmul.f32 %v2246_v33, %v3366_v28  ;;  %v1663_v28 = vmul.f32 %v2250_v56, %v3388_v9  ;;  %v2255_v33 = vld [vmem:[#allocation7 + $0x1f] ss:$0 sm:$0xff] }
 0xad6   :  { %v1664_v5 = vmul.f32 %v2250_v56, %v3398_v22 }
 0xad7   :  { %v1587_v18 = vadd.f32 %v1585_v49, %v1574_v52  ;;  %v1575_v16 = vadd.f32 %v1573_v25, %v1562_v17  ;;  %v2254_v52 = vld [vmem:[#allocation7 + $0x1e] ss:$0 sm:$0xff]  ;;  %v1677_v49 = vmul.f32 %v2251_v26, %v3406_v35  ;;  %v1724_v35 = vmul.f32 %v2255_v33, %v3220_v63  ;;  %v2259_v63 = vld [vmem:[#allocation7 + $0x23] ss:$0 sm:$0xff]  ;;  %v2260_v26 = vld [vmem:[#allocation7 + $0x24] ss:$0 sm:$0xff] }
 0xad8   :  { %v3570_v43 = vpop.permute.xlu0 %1845  ;;  %v1579_v7 = vpop.permute.xlu1 %1578  ;;  %v1715_v22 = vmul.f32 %v2254_v52, %v3420_v10 }
 0xad9   :  { %v1600_v1 = vadd.f32 %v1598_v34, %v1587_v18  ;;  %v1586_v46 = vmul.f32 %v2244_v57, %v1579_v7  ;;  %v2252_v57 = vld [vmem:[#allocation7 + $0x1c] ss:$0 sm:$0xff]  ;;  %v2256_v7 = vld [vmem:[#allocation7 + $0x20] ss:$0 sm:$0xff] }
 0xada   :  { %v1689_v4 = vmul.f32 %v2252_v57, %v3404_v59  ;;  %v1690_v18 = vmul.f32 %v2252_v57, %v3414_v32  ;;  %v1716_v32 = vmul.f32 %v2254_v52, %v3430_v13 }
 0xadb   :  { %v1613_v24 = vadd.f32 %v1611_v6, %v1600_v1  ;;  %v1588_v51 = vadd.f32 %v1586_v46, %v1575_v16  ;;  %v1703_v6 = vmul.f32 %v2253_v58, %v3422_v55  ;;  %v2257_v16 = vld [vmem:[#allocation7 + $0x21] ss:$0 sm:$0xff]  ;;  %v3802_v58 = vld [vmem:[#allocation24_spill] sm:$0xff] }
 0xadc   :  { %v3575_v53 = vpop.permute.xlu0 %1864  ;;  %v3577_v42 = vpop.permute.xlu1 %1847 }
 0xadd   :  { %v1626_v60 = vadd.f32 %v1624_v11, %v1613_v24  ;;  %v1601_v50 = vadd.f32 %v1599_v8, %v1588_v51  ;;  %v1737_v8 = vmul.f32 %v2256_v7, %v3428_v39  ;;  %v2258_v24 = vld [vmem:[#allocation7 + $0x22] ss:$0 sm:$0xff]  ;;  %v3796_v51 = vld [vmem:[#allocation16_spill] sm:$0xff] }
 0xade   :  { %v1750_v61 = vmul.f32 %v2257_v16, %v3796_v51 }
 0xadf   :  { %v1639_v0 = vadd.f32 %v1637_v45, %v1626_v60  ;;  %v1614_v29 = vadd.f32 %v1612_v47, %v1601_v50  ;;  %v3797_v45 = vld [vmem:[#allocation21_spill] sm:$0xff] }
 0xae0   :  { %v3583_v54 = vpop.permute.xlu0 %1877  ;;  %v3585_v19 = vpop.permute.xlu1 %1866  ;;  %v1725_v60 = vmul.f32 %v2255_v33, %v3797_v45 }
 0xae1   :  { %v1652_v38 = vadd.f32 %v1650_v15, %v1639_v0  ;;  %v1627_v20 = vadd.f32 %v1625_v30, %v1614_v29  ;;  %v3798_v30 = vld [vmem:[#allocation20_spill] sm:$0xff]  ;;  %v3799_v0 = vld [vmem:[#allocation23_spill] sm:$0xff] }
 0xae2   :  { %v1738_v15 = vmul.f32 %v2256_v7, %v3798_v30  ;;  %v1763_v39 = vmul.f32 %v2258_v24, %v3799_v0 }
 0xae3   :  { %v1665_v36 = vadd.f32 %v1663_v28, %v1652_v38  ;;  %v1640_v21 = vadd.f32 %v1638_v37, %v1627_v20  ;;  %v3800_v37 = vld [vmem:[#allocation22_spill] sm:$0xff]  ;;  %v3801_v38 = vld [vmem:[#allocation25_spill] sm:$0xff] }
 0xae4   :  { %v3591_v23 = vpop.permute.xlu0 %1890  ;;  %v3593_v62 = vpop.permute.xlu1 %1879  ;;  %v1751_v28 = vmul.f32 %v2257_v16, %v3800_v37  ;;  %v1776_v20 = vmul.f32 %v2259_v63, %v3801_v38 }
 0xae5   :  { %v1678_v27 = vadd.f32 %v1676_v31, %v1665_v36  ;;  %v1653_v9 = vadd.f32 %v1651_v14, %v1640_v21  ;;  %v2261_v31 = vld [vmem:[#allocation7 + $0x25] ss:$0 sm:$0xff] }
 0xae7   :  { %v1691_v25 = vadd.f32 %v1689_v4, %v1678_v27  ;;  %v1666_v3 = vadd.f32 %v1664_v5, %v1653_v9  ;;  %v1764_v5 = vmul.f32 %v2258_v24, %v3802_v58  ;;  %v3803_v4 = vld [vmem:[#allocation27_spill] sm:$0xff]  ;;  %v3809_v24 = vld [vmem:[#allocation33_spill] sm:$0xff]  ;;  %v3813_v58 = vld [vmem:[#allocation36_spill] sm:$0xff] }
 0xae8   :  { %v3599_v34 = vpop.permute.xlu0 %1903  ;;  %v3601_v17 = vpop.permute.xlu1 %1892  ;;  %v1789_v27 = vmul.f32 %v2260_v26, %v3803_v4 }
 0xae9   :  { %v1704_v40 = vadd.f32 %v1702_v48, %v1691_v25  ;;  %v1679_v59 = vadd.f32 %v1677_v49, %v1666_v3  ;;  %v2262_v49 = vld [vmem:[#allocation7 + $0x26] ss:$0 sm:$0xff]  ;;  %v3805_v3 = vld [vmem:[#allocation29_spill] sm:$0xff] }
 0xaea   :  { %v3804_v48 = vld [vmem:[#allocation26_spill] sm:$0xff]  ;;  %v1802_v33 = vmul.f32 %v2261_v31, %v3805_v3 }
 0xaeb   :  { %v1717_v1 = vadd.f32 %v1715_v22, %v1704_v40  ;;  %v1692_v12 = vadd.f32 %v1690_v18, %v1679_v59  ;;  %v1777_v25 = vmul.f32 %v2259_v63, %v3804_v48  ;;  %v2263_v40 = vld [vmem:[#allocation7 + $0x27] ss:$0 sm:$0xff]  ;;  %v3810_v63 = vld [vmem:[#allocation32_spill] sm:$0xff] }
 0xaec   :  { %v3607_v46 = vpop.permute.xlu0 %1916  ;;  %v3609_v44 = vpop.permute.xlu1 %1905  ;;  %v1828_v51 = vmul.f32 %v2263_v40, %v3809_v24  ;;  %v1816_v30 = vmul.f32 %v2262_v49, %v3810_v63  ;;  %v2273_v63 = vld [vmem:[#allocation7 + $0x31] ss:$0 sm:$0xff] }
 0xaed   :  { %v1726_v11 = vadd.f32 %v1724_v35, %v1717_v1  ;;  %v1705_v10 = vadd.f32 %v1703_v6, %v1692_v12  ;;  %v3806_v6 = vld [vmem:[#allocation28_spill] sm:$0xff]  ;;  %v3807_v35 = vld [vmem:[#allocation31_spill] sm:$0xff] }
 0xaee   :  { %v1790_v1 = vmul.f32 %v2260_v26, %v3806_v6  ;;  %v1815_v12 = vmul.f32 %v2262_v49, %v3807_v35  ;;  %v3812_v26 = vld [vmem:[#allocation34_spill] sm:$0xff]  ;;  %v2270_v35 = vld [vmem:[#allocation7 + $0x2e] ss:$0 sm:$0xff] }
 0xaef   :  { %v1739_v47 = vadd.f32 %v1737_v8, %v1726_v11  ;;  %v1718_v55 = vadd.f32 %v1716_v32, %v1705_v10  ;;  %v2264_v32 = vld [vmem:[#allocation7 + $0x28] ss:$0 sm:$0xff]  ;;  %v3808_v11 = vld [vmem:[#allocation30_spill] sm:$0xff]  ;;  %v1829_v37 = vmul.f32 %v2263_v40, %v3812_v26 }
 0xaf0   :  { %v3615_v50 = vpop.permute.xlu0 %1929  ;;  %v3617_v56 = vpop.permute.xlu1 %1918  ;;  %v1803_v10 = vmul.f32 %v2261_v31, %v3808_v11 }
 0xaf1   :  { %v1752_v29 = vadd.f32 %v1750_v61, %v1739_v47  ;;  %v1727_v13 = vadd.f32 %v1725_v60, %v1718_v55  ;;  %v2265_v55 = vld [vmem:[#allocation7 + $0x29] ss:$0 sm:$0xff] }
 0xaf2   :  { %v1854_v38 = vmul.f32 %v2265_v55, %v3570_v43 }
 0xaf3   :  { %v1765_v57 = vadd.f32 %v1763_v39, %v1752_v29  ;;  %v1740_v14 = vadd.f32 %v1738_v15, %v1727_v13  ;;  %v3811_v15 = vld [vmem:[#allocation35_spill] sm:$0xff] }
 0xaf4   :  { %v3623_v36 = vpop.permute.xlu0 %1942  ;;  %v3625_v21 = vpop.permute.xlu1 %1931  ;;  %v1841_v0 = vmul.f32 %v2264_v32, %v3811_v15  ;;  %v2266_v13 = vld [vmem:[#allocation7 + $0x2a] ss:$0 sm:$0xff] }
 0xaf5   :  { %v1778_v9 = vadd.f32 %v1776_v20, %v1765_v57  ;;  %v1753_v52 = vadd.f32 %v1751_v28, %v1740_v14  ;;  %v2267_v57 = vld [vmem:[#allocation7 + $0x2b] ss:$0 sm:$0xff]  ;;  %v1874_v6 = vmul.f32 %v2266_v13, %v3585_v19 }
 0xaf6   :  { %v1886_v3 = vmul.f32 %v2267_v57, %v3583_v54 }
 0xaf7   :  { %v1791_v18 = vadd.f32 %v1789_v27, %v1778_v9  ;;  %v1766_v22 = vadd.f32 %v1764_v5, %v1753_v52  ;;  %v1842_v5 = vmul.f32 %v2264_v32, %v3813_v58  ;;  %v1873_v27 = vmul.f32 %v2266_v13, %v3575_v53  ;;  %v2268_v52 = vld [vmem:[#allocation7 + $0x2c] ss:$0 sm:$0xff]  ;;  %v2271_v32 = vld [vmem:[#allocation7 + $0x2f] ss:$0 sm:$0xff]  ;;  %v2276_v58 = vld [vmem:[#allocation7 + $0x34] ss:$0 sm:$0xff] }
 0xaf8   :  { %v3631_v59 = vpop.permute.xlu0 %1955  ;;  %v3633_v7 = vpop.permute.xlu1 %1944  ;;  %v1900_v24 = vmul.f32 %v2268_v52, %v3601_v17 }
 0xaf9   :  { %v1804_v16 = vadd.f32 %v1802_v33, %v1791_v18  ;;  %v1779_v8 = vadd.f32 %v1777_v25, %v1766_v22  ;;  %v1855_v25 = vmul.f32 %v2265_v55, %v3577_v42  ;;  %v2269_v33 = vld [vmem:[#allocation7 + $0x2d] ss:$0 sm:$0xff]  ;;  %v1938_v55 = vmul.f32 %v2271_v32, %v3615_v50 }
 0xafa   :  { %v1964_v26 = vmul.f32 %v2273_v63, %v3631_v59 }
 0xafb   :  { %v1817_v61 = vadd.f32 %v1815_v12, %v1804_v16  ;;  %v1792_v47 = vadd.f32 %v1790_v1, %v1779_v8  ;;  %v1899_v1 = vmul.f32 %v2268_v52, %v3591_v23  ;;  %v1887_v16 = vmul.f32 %v2267_v57, %v3593_v62 }
 0xafc   :  { %v3639_v45 = vpop.permute.xlu0 %1968  ;;  %v3641_v60 = vpop.permute.xlu1 %1957  ;;  %v1912_v8 = vmul.f32 %v2269_v33, %v3599_v34  ;;  %v1913_v23 = vmul.f32 %v2269_v33, %v3609_v44 }
 0xafd   :  { %v1830_v39 = vadd.f32 %v1828_v51, %v1817_v61  ;;  %v1805_v29 = vadd.f32 %v1803_v10, %v1792_v47  ;;  %v1925_v51 = vmul.f32 %v2270_v35, %v3607_v46  ;;  %v2272_v61 = vld [vmem:[#allocation7 + $0x30] ss:$0 sm:$0xff]  ;;  %v1939_v46 = vmul.f32 %v2271_v32, %v3625_v21  ;;  %v2281_v32 = vld [vmem:[#allocation7 + $0x39] ss:$0 sm:$0xff] }
 0xaff   :  { %v1843_v28 = vadd.f32 %v1841_v0, %v1830_v39  ;;  %v1818_v20 = vadd.f32 %v1816_v30, %v1805_v29  ;;  %v1926_v0 = vmul.f32 %v2270_v35, %v3617_v56  ;;  %v1951_v39 = vmul.f32 %v2272_v61, %v3623_v36  ;;  %v2274_v29 = vld [vmem:[#allocation7 + $0x32] ss:$0 sm:$0xff] }
 0xb00   :  { %v1982_v14 = vpop.permute.xlu0 %1981  ;;  %v3647_v31 = vpop.permute.xlu1 %1970  ;;  %v1977_v57 = vmul.f32 %v2274_v29, %v3639_v45  ;;  %v1965_v36 = vmul.f32 %v2273_v63, %v3641_v60  ;;  %v2000_v35 = vmul.f32 %v2276_v58, %v3458_v41 }
 0xb01   :  { %v1856_v4 = vadd.f32 %v1854_v38, %v1843_v28  ;;  %v1831_v9 = vadd.f32 %v1829_v37, %v1818_v20  ;;  %v2275_v37 = vld [vmem:[#allocation7 + $0x33] ss:$0 sm:$0xff]  ;;  %v1952_v20 = vmul.f32 %v2272_v61, %v3633_v7 }
 0xb03   :  { %v1875_v49 = vadd.f32 %v1873_v27, %v1856_v4  ;;  %v1844_v48 = vadd.f32 %v1842_v5, %v1831_v9  ;;  %v1990_v4 = vmul.f32 %v2275_v37, %v1982_v14  ;;  %v2277_v27 = vld [vmem:[#allocation7 + $0x35] ss:$0 sm:$0xff] }
 0xb04   :  { %v2004_v43 = vpop.permute.xlu0 %2003  ;;  %v1984_v18 = vpop.permute.xlu1 %1983 }
 0xb05   :  { %v1857_v22 = vadd.f32 %v1855_v25, %v1844_v48  ;;  %v1888_v40 = vadd.f32 %v1886_v3, %v1875_v49  ;;  %v1978_v49 = vmul.f32 %v2274_v29, %v3647_v31  ;;  %v1999_v48 = vmul.f32 %v2276_v58, %v3444_v2  ;;  %v2278_v25 = vld [vmem:[#allocation7 + $0x36] ss:$0 sm:$0xff] }
 0xb06   :  { %v2012_v33 = vmul.f32 %v2277_v27, %v2004_v43  ;;  %v1991_v45 = vmul.f32 %v2275_v37, %v1984_v18 }
 0xb07   :  { %v1876_v12 = vadd.f32 %v1874_v6, %v1857_v22  ;;  %v1901_v53 = vadd.f32 %v1899_v1, %v1888_v40  ;;  %v2279_v22 = vld [vmem:[#allocation7 + $0x37] ss:$0 sm:$0xff] }
 0xb08   :  { %v2017_v42 = vpop.permute.xlu0 %2016  ;;  %v2006_v11 = vpop.permute.xlu1 %2005 }
 0xb09   :  { %v1889_v54 = vadd.f32 %v1887_v16, %v1876_v12  ;;  %v1914_v10 = vadd.f32 %v1912_v8, %v1901_v53  ;;  %v2025_v14 = vmul.f32 %v2278_v25, %v2017_v42  ;;  %v2280_v12 = vld [vmem:[#allocation7 + $0x38] ss:$0 sm:$0xff]  ;;  %v2013_v8 = vmul.f32 %v2277_v27, %v2006_v11  ;;  %v2283_v42 = vld [vmem:[#allocation7 + $0x3b] ss:$0 sm:$0xff] }
 0xb0b   :  { %v1902_v19 = vadd.f32 %v1900_v24, %v1889_v54  ;;  %v1927_v47 = vadd.f32 %v1925_v51, %v1914_v10  ;;  %v2282_v51 = vld [vmem:[#allocation7 + $0x3a] ss:$0 sm:$0xff] }
 0xb0c   :  { %v2030_v62 = vpop.permute.xlu0 %2029  ;;  %v2019_v30 = vpop.permute.xlu1 %2018 }
 0xb0d   :  { %v1915_v34 = vadd.f32 %v1913_v23, %v1902_v19  ;;  %v1940_v15 = vadd.f32 %v1938_v55, %v1927_v47  ;;  %v2038_v31 = vmul.f32 %v2279_v22, %v2030_v62  ;;  %v2026_v43 = vmul.f32 %v2278_v25, %v2019_v30  ;;  %v2284_v62 = vld [vmem:[#allocation7 + $0x3c] ss:$0 sm:$0xff] }
 0xb0f   :  { %v1928_v17 = vadd.f32 %v1926_v0, %v1915_v34  ;;  %v1953_v13 = vadd.f32 %v1951_v39, %v1940_v15 }
 0xb10   :  { %v2043_v44 = vpop.permute.xlu0 %2042  ;;  %v2032_v28 = vpop.permute.xlu1 %2031 }
 0xb11   :  { %v1941_v50 = vadd.f32 %v1939_v46, %v1928_v17  ;;  %v1966_v38 = vadd.f32 %v1964_v26, %v1953_v13  ;;  %v2051_v18 = vmul.f32 %v2280_v12, %v2043_v44  ;;  %v2039_v47 = vmul.f32 %v2279_v22, %v2032_v28  ;;  %v2285_v13 = vld [vmem:[#allocation7 + $0x3d] ss:$0 sm:$0xff] }
 0xb13   :  { %v1954_v56 = vadd.f32 %v1952_v20, %v1941_v50  ;;  %v1979_v5 = vadd.f32 %v1977_v57, %v1966_v38  ;;  %v2286_v50 = vld [vmem:[#allocation7 + $0x3e] ss:$0 sm:$0xff] }
 0xb14   :  { %v2056_v9 = vpop.permute.xlu0 %2055  ;;  %v2045_v21 = vpop.permute.xlu1 %2044 }
 0xb15   :  { %v1967_v52 = vadd.f32 %v1965_v36, %v1954_v56  ;;  %v1992_v59 = vadd.f32 %v1990_v4, %v1979_v5  ;;  %v2064_v23 = vmul.f32 %v2281_v32, %v2056_v9  ;;  %v2052_v15 = vmul.f32 %v2280_v12, %v2045_v21 }
 0xb17   :  { %v1980_v3 = vadd.f32 %v1978_v49, %v1967_v52  ;;  %v2001_v7 = vadd.f32 %v1999_v48, %v1992_v59  ;;  %v2343_v48 = vld [vmem:[#allocation2] sm:$0xff] }
 0xb18   :  { %v2069_v40 = vpop.permute.xlu0 %2068  ;;  %v2058_v6 = vpop.permute.xlu1 %2057 }
 0xb19   :  { %v2014_v1 = vadd.f32 %v2012_v33, %v2001_v7  ;;  %v1993_v60 = vadd.f32 %v1991_v45, %v1980_v3  ;;  %v2077_v11 = vmul.f32 %v2282_v51, %v2069_v40  ;;  %v2065_v29 = vmul.f32 %v2281_v32, %v2058_v6  ;;  %v2344_v45 = vld [vmem:[#allocation2 + $0x8] sm:$0xff] }
 0xb1b   :  { %v2027_v53 = vadd.f32 %v2025_v14, %v2014_v1  ;;  %v2002_v16 = vadd.f32 %v2000_v35, %v1993_v60 }
 0xb1c   :  { %v2082_v2 = vpop.permute.xlu0 %2081  ;;  %v2071_v54 = vpop.permute.xlu1 %2070 }
 0xb1d   :  { %v2015_v10 = vadd.f32 %v2013_v8, %v2002_v16  ;;  %v2040_v24 = vadd.f32 %v2038_v31, %v2027_v53  ;;  %v2090_v17 = vmul.f32 %v2283_v42, %v2082_v2  ;;  %v2078_v44 = vmul.f32 %v2282_v51, %v2071_v54 }
 0xb1f   :  { %v2028_v61 = vadd.f32 %v2026_v43, %v2015_v10  ;;  %v2053_v19 = vadd.f32 %v2051_v18, %v2040_v24 }
 0xb20   :  { %v2095_v55 = vpop.permute.xlu0 %2094  ;;  %v2084_v41 = vpop.permute.xlu1 %2083 }
 0xb21   :  { %v2041_v63 = vadd.f32 %v2039_v47, %v2028_v61  ;;  %v2066_v34 = vadd.f32 %v2064_v23, %v2053_v19  ;;  %v2103_v28 = vmul.f32 %v2284_v62, %v2095_v55  ;;  %v2091_v57 = vmul.f32 %v2283_v42, %v2084_v41 }
 0xb23   :  { %v2054_v0 = vadd.f32 %v2052_v15, %v2041_v63  ;;  %v2079_v39 = vadd.f32 %v2077_v11, %v2066_v34 }
 0xb24   :  { %v2108_v30 = vpop.permute.xlu0 %2107  ;;  %v2097_v46 = vpop.permute.xlu1 %2096 }
 0xb25   :  { %v2067_v26 = vadd.f32 %v2065_v29, %v2054_v0  ;;  %v2092_v37 = vadd.f32 %v2090_v17, %v2079_v39  ;;  %v2116_v58 = vmul.f32 %v2285_v13, %v2108_v30  ;;  %v2104_v27 = vmul.f32 %v2284_v62, %v2097_v46 }
 0xb27   :  { %v2080_v38 = vadd.f32 %v2078_v44, %v2067_v26  ;;  %v2105_v20 = vadd.f32 %v2103_v28, %v2092_v37 }
 0xb28   :  { %v2121_v56 = vpop.permute.xlu0 %2120  ;;  %v2110_v5 = vpop.permute.xlu1 %2109 }
 0xb29   :  { %v2093_v36 = vadd.f32 %v2091_v57, %v2080_v38  ;;  %v2118_v4 = vadd.f32 %v2116_v58, %v2105_v20  ;;  %v2129_v9 = vmul.f32 %v2286_v50, %v2121_v56  ;;  %v2117_v59 = vmul.f32 %v2285_v13, %v2110_v5 }
 0xb2b   :  { %v2106_v21 = vadd.f32 %v2104_v27, %v2093_v36  ;;  %v2131_v52 = vadd.f32 %v2129_v9, %v2118_v4 }
 0xb2c   :  { %v2123_v49 = vpop.permute.xlu1 %2122 }
 0xb2d   :  { %v2133_v25 = vadd.f32 %v2343_v48, %v2131_v52  ;;  %v2119_v3 = vadd.f32 %v2117_v59, %v2106_v21  ;;  %v2130_v7 = vmul.f32 %v2286_v50, %v2123_v49 }
 0xb2f   :  { %2135 = vst [vmem:[#allocation8] sm:$0xff] %v2133_v25  ;;  %v2132_v33 = vadd.f32 %v2130_v7, %v2119_v3 }
 0xb31   :  { %v2134_v22 = vadd.f32 %v2344_v45, %v2132_v33 }
 0xb33   :  { %2136 = vst [vmem:[#allocation8 + $0x8] sm:$0xff] %v2134_v22 }
 0xb34   :  { %2422 = shalt.err (!%p2419_p0)
}
 0xb35   :  { %s2423_s4 = scalar_lea.hbm %s3695_s9, 256 }
 0xb36   :  { %p2424_p1 = scmp.ne.s32.totalorder %s3695_s9, %s2423_s4  ;;  %p2427_p2 = scmp.lt.u32.totalorder %s2423_s4, %s3695_s9 }
 0xb38   :  { %p2429_p3 = pnand %p2427_p2, %p2424_p1 }
 0xb3a   :  { %2432 = shalt.err (!%p2429_p3)
}
 0xb3b   :  { %s3814_s19 = smov 128  }
 0xb3c   :  { %2148 = dma.vmem_to_hbm [thread:$0]  %s2143_s21, 256, %s3695_s9, [#allocation4], %s3814_s19, %s3814_s19, %s2442_s22  }
 0xb3d   :  { %2437 = dma.done.wait [#allocation4], 256  }
 0xb3e   :  { %2438 = vsyncadd [#allocation4], 4294967040 }
 0xb3f   :  { %2152 = vsyncpa [#allocation3], 1 }
 0xb40   :  { %2153 = vsyncpa [#allocation6], 1 }
 0xb41   :  { %2154 = vsyncpa [#allocation4], 1 }

</bundles_post_ra>
